<compile_context>
chip_gen: v6e
topology: v6e:2x2x1
jax: 0.10.0
libtpu: 0.0.40
codegen_flags: <defaults>
</compile_context>

<pallas_src>
import functools

import jax
import jax.numpy as jnp
import numpy as np
from jax import lax
from jax.experimental import pallas as pl
from jax.experimental.pallas import tpu as pltpu


def _round_up(x, m):
    return ((x + m - 1) // m) * m


# ----------------------------- fused kernel ----------------------------------
def _fused_predictor_kernel(gx0_ref, whh0_ref, wih1_ref, b1_ref, whh1_ref,
                            w1_ref, b1fc_ref, w2_ref, b2fc_ref,
                            out_ref, h0_seq_scr, gx1_scr):
    """Full Predictor forward for one (padded) batch, single invocation.

    gx0_ref : (T, BP, 4*HP) f32   layer-0 gate pre-activations (x@Wih0 + b0)
    whh0/wih1/whh1 : (HP, 4*HP)   recurrent / layer-1 input weights
    w1 : (HP, 128), w2 : (128, OP) MLP head weights
    out_ref : (BP, OP) f32        lane-dense padded output
    h0_seq_scr : (T*BP, HP) f32   layer-0 hidden sequence (VMEM scratch)
    gx1_scr    : (T*BP, 4*HP) f32 hoisted layer-1 gate pre-activations
    """
    T, BP, _ = gx0_ref.shape
    HP = whh0_ref.shape[0]
    w_dtype = whh0_ref.dtype

    def lstm_cell(gates, c):
        # gates: (BP, 4*HP), PyTorch gate order i, f, g, o; slices lane-aligned.
        i_g = jax.nn.sigmoid(gates[:, 0 * HP:1 * HP])
        f_g = jax.nn.sigmoid(gates[:, 1 * HP:2 * HP])
        g_g = jnp.tanh(gates[:, 2 * HP:3 * HP])
        o_g = jax.nn.sigmoid(gates[:, 3 * HP:4 * HP])
        c_new = f_g * c + i_g * g_g
        h_new = o_g * jnp.tanh(c_new)
        return h_new, c_new

    zeros = jnp.zeros((BP, HP), jnp.float32)

    # ---- layer 0 recurrence (input projection already hoisted into gx0) ----
    whh0 = whh0_ref[...]

    def step0(t, carry):
        h, c = carry
        gates = gx0_ref[t] + jnp.dot(h.astype(w_dtype), whh0,
                                     preferred_element_type=jnp.float32)
        h_new, c_new = lstm_cell(gates, c)
        row = pl.multiple_of(t * BP, BP)
        h0_seq_scr[pl.ds(row, BP), :] = h_new
        return h_new, c_new

    lax.fori_loop(0, T, step0, (zeros, zeros), unroll=True)

    # ---- layer 1 input projection hoisted out of the recurrence (M = T*BP) ----
    gx1_scr[...] = (jnp.dot(h0_seq_scr[...].astype(w_dtype), wih1_ref[...],
                            preferred_element_type=jnp.float32)
                    + b1_ref[...])

    # ---- layer 1 recurrence; only h at t == T-1 is kept ----
    whh1 = whh1_ref[...]

    def step1(t, carry):
        h, c = carry
        row = pl.multiple_of(t * BP, BP)
        gates = gx1_scr[pl.ds(row, BP), :] + jnp.dot(
            h.astype(w_dtype), whh1, preferred_element_type=jnp.float32)
        return lstm_cell(gates, c)

    h_last, _ = lax.fori_loop(0, T, step1, (zeros, zeros), unroll=True)

    # ---- MLP head fused into the same kernel ----
    hr = jnp.maximum(h_last, 0.0)
    z = jnp.dot(hr.astype(w_dtype), w1_ref[...],
                preferred_element_type=jnp.float32) + b1fc_ref[...]
    z = jnp.maximum(z, 0.0)
    out_ref[...] = (jnp.dot(z.astype(w_dtype), w2_ref[...],
                            preferred_element_type=jnp.float32)
                    + b2fc_ref[...])


# ----------------------------- parameter layout -------------------------------
def prepare_params(params, hidden_size, output_size, weight_dtype=jnp.float32):
    """Pad / lay out parameters for the fused kernel.

    Each gate block (i, f, g, o) is padded from H to HP = round_up(H, 128)
    lanes so in-kernel gate slices are lane-aligned; padded weight rows/cols
    and biases are zero so the padded hidden/cell state stays exactly zero.
    Weight matrices may be stored in bfloat16; biases stay f32.
    """
    H = hidden_size
    HP = _round_up(max(H, 128), 128)
    OP = _round_up(max(output_size, 128), 128)
    wd = weight_dtype

    def pad_gate_cols(w):
        lead = w.shape[:-1]
        w4 = w.reshape(lead + (4, H))
        w4 = jnp.pad(w4, [(0, 0)] * len(lead) + [(0, 0), (0, HP - H)])
        return w4.reshape(lead + (4 * HP,))

    def pad_rows(w):
        return jnp.pad(w, ((0, HP - w.shape[0]), (0, 0)))

    return {
        "wih0": pad_gate_cols(params["wih0_t"]).astype(wd),             # (I, 4HP)
        "b0":   pad_gate_cols(params["b0"]).astype(jnp.float32),        # (1, 4HP)
        "whh0": pad_rows(pad_gate_cols(params["whh0_t"])).astype(wd),   # (HP, 4HP)
        "wih1": pad_rows(pad_gate_cols(params["wih1_t"])).astype(wd),   # (HP, 4HP)
        "b1":   pad_gate_cols(params["b1"]).astype(jnp.float32),        # (1, 4HP)
        "whh1": pad_rows(pad_gate_cols(params["whh1_t"])).astype(wd),   # (HP, 4HP)
        "w1":   pad_rows(params["w1_t"]).astype(wd),                    # (HP, 128)
        "b1fc": params["b1_fc"].astype(jnp.float32),                    # (1, 128)
        "w2":   jnp.pad(params["w2_t"],
                        ((0, 0), (0, OP - output_size))).astype(wd),    # (128, OP)
        "b2fc": jnp.pad(params["b2_fc"],
                        ((0, 0), (0, OP - output_size))).astype(jnp.float32),
    }


# ------------------------------- forward pass ---------------------------------
@functools.partial(jax.jit, static_argnames=("output_size",))
def predictor_forward(x_bti, kparams, *, output_size):
    """x_bti: (B, T, input_size), batch_first like the PyTorch module."""
    B, T, _ = x_bti.shape
    HP = kparams["whh0"].shape[0]
    OP = kparams["w2"].shape[1]
    BP = _round_up(max(B, 8), 8)

    # time-major, batch padded to a full sublane multiple
    x_tbi = jnp.transpose(x_bti, (1, 0, 2)).astype(jnp.float32)
    x_tbi = jnp.pad(x_tbi, ((0, 0), (0, BP - B), (0, 0)))

    # Hoisted layer-0 input projection: one matmul over all T timesteps (XLA).
    gx0 = (jnp.einsum("tbi,ig->tbg", x_tbi,
                      kparams["wih0"].astype(jnp.float32))
           + kparams["b0"])                                   # (T, BP, 4*HP) f32

    inputs = (gx0, kparams["whh0"], kparams["wih1"], kparams["b1"],
              kparams["whh1"], kparams["w1"], kparams["b1fc"],
              kparams["w2"], kparams["b2fc"])

    # Single invocation: everything is VMEM-resident once (no pipelining /
    # double buffering).  Set the scoped VMEM limit explicitly with headroom.
    nbytes = sum(int(np.prod(a.shape)) * a.dtype.itemsize for a in inputs)
    nbytes += BP * OP * 4                              # output
    nbytes += T * BP * (HP + 4 * HP) * 4               # scratch buffers
    vmem_limit = int(min(2 * nbytes + (4 << 20), 64 << 20))

    out = pl.pallas_call(
        _fused_predictor_kernel,
        out_shape=jax.ShapeDtypeStruct((BP, OP), jnp.float32),
        scratch_shapes=[
            pltpu.VMEM((T * BP, HP), jnp.float32),        # layer-0 hidden sequence
            pltpu.VMEM((T * BP, 4 * HP), jnp.float32),    # layer-1 gate pre-acts
        ],
        compiler_params=pltpu.CompilerParams(vmem_limit_bytes=vmem_limit),
    )(*inputs)
    return out[:B, :output_size]


# --------------------------- pure-JAX reference -------------------------------
def lstm_layer_ref(x_tbf, wih_t, whh_t, b):
    T, B, _ = x_tbf.shape
    H = whh_t.shape[0]

    def step(carry, x_t):
        h, c = carry
        gates = x_t @ wih_t + h @ whh_t + b
        i_g = jax.nn.sigmoid(gates[:, 0 * H:1 * H])
        f_g = jax.nn.sigmoid(gates[:, 1 * H:2 * H])
        g_g = jnp.tanh(gates[:, 2 * H:3 * H])
        o_g = jax.nn.sigmoid(gates[:, 3 * H:4 * H])
        c_new = f_g * c + i_g * g_g
        h_new = o_g * jnp.tanh(c_new)
        return (h_new, c_new), h_new

    init = (jnp.zeros((B, H), jnp.float32), jnp.zeros((B, H), jnp.float32))
    _, hs = jax.lax.scan(step, init, x_tbf)
    return hs


def predictor_ref(x_bti, params):
    x = jnp.transpose(x_bti, (1, 0, 2))
    h_seq = lstm_layer_ref(x, params["wih0_t"], params["whh0_t"], params["b0"])
    h_seq = lstm_layer_ref(h_seq, params["wih1_t"], params["whh1_t"], params["b1"])
    h = jnp.maximum(h_seq[-1], 0.0)
    z = jnp.maximum(h @ params["w1_t"] + params["b1_fc"], 0.0)
    return z @ params["w2_t"] + params["b2_fc"]


# ------------------------------- param init -----------------------------------
def init_params(key, input_size, hidden_size, output_size):
    H, I = hidden_size, input_size
    ks = jax.random.split(key, 14)
    klstm = 1.0 / np.sqrt(H)

    def u(k, shape, bound):
        return jax.random.uniform(k, shape, jnp.float32, -bound, bound)

    return {
        # layer 0 (PyTorch weight_ih (4H,I), weight_hh (4H,H), stored transposed)
        "wih0_t": u(ks[0], (I, 4 * H), klstm),
        "whh0_t": u(ks[1], (H, 4 * H), klstm),
        "b0": (u(ks[2], (1, 4 * H), klstm) + u(ks[3], (1, 4 * H), klstm)),
        # layer 1
        "wih1_t": u(ks[4], (H, 4 * H), klstm),
        "whh1_t": u(ks[5], (H, 4 * H), klstm),
        "b1": (u(ks[6], (1, 4 * H), klstm) + u(ks[7], (1, 4 * H), klstm)),
        # fc1: Linear(H, 128), fc2: Linear(128, output_size)
        "w1_t": u(ks[8], (H, 128), 1.0 / np.sqrt(H)),
        "b1_fc": u(ks[9], (1, 128), 1.0 / np.sqrt(H)),
        "w2_t": u(ks[10], (128, output_size), 1.0 / np.sqrt(128)),
        "b2_fc": u(ks[11], (1, output_size), 1.0 / np.sqrt(128)),
    }


# ---------------------------------- main ---------------------------------------
if __name__ == "__main__":
    # Small, module-consistent shapes: batch=2, seq=8, input_size=1,
    # hidden_size=32 (stand-in for 800), num_layers=2, output_size=1.
    B, T, I, H, O = 2, 8, 1, 32, 1

    key = jax.random.PRNGKey(0)
    kx, kp = jax.random.split(key)
    x = jax.random.normal(kx, (B, T, I), jnp.float32)   # batch_first, like PyTorch
    params = init_params(kp, I, H, O)

    ref = predictor_ref(x, params)

    # f32-weight path: strict check against the pure-JAX reference.
    kparams_f32 = prepare_params(params, H, O, weight_dtype=jnp.float32)
    out_f32 = jax.block_until_ready(predictor_forward(x, kparams_f32, output_size=O))
    assert out_f32.shape == (B, O)
    np.testing.assert_allclose(np.asarray(out_f32), np.asarray(ref),
                               rtol=2e-5, atol=2e-5)

    # bf16-weight path (f32 state / accumulation): looser tolerance.
    kparams_bf16 = prepare_params(params, H, O, weight_dtype=jnp.bfloat16)
    out_bf16 = jax.block_until_ready(predictor_forward(x, kparams_bf16, output_size=O))
    np.testing.assert_allclose(np.asarray(out_bf16), np.asarray(ref),
                               rtol=5e-2, atol=5e-2)

    print("KERNEL_OK")
</pallas_src>

<mosaic_0001>
module attributes {stable_mosaic.version = 11 : i64} {
  func.func @_fused_predictor_kernel(%arg0: memref<8x8x512xf32, #tpu.memory_space<vmem>>, %arg1: memref<128x512xf32, #tpu.memory_space<vmem>>, %arg2: memref<128x512xf32, #tpu.memory_space<vmem>>, %arg3: memref<1x512xf32, #tpu.memory_space<vmem>>, %arg4: memref<128x512xf32, #tpu.memory_space<vmem>>, %arg5: memref<128x128xf32, #tpu.memory_space<vmem>>, %arg6: memref<1x128xf32, #tpu.memory_space<vmem>>, %arg7: memref<128x128xf32, #tpu.memory_space<vmem>>, %arg8: memref<1x128xf32, #tpu.memory_space<vmem>>, %arg9: memref<8x128xf32, #tpu.memory_space<vmem>>, %arg10: memref<64x128xf32, #tpu.memory_space<vmem>>, %arg11: memref<64x512xf32, #tpu.memory_space<vmem>>) attributes {dimension_semantics = [], scalar_prefetch = 0 : i64, scratch_operands = 2 : i64, tpu.core_type = #tpu.core_type<tc>} {
    %cst = arith.constant 0.000000e+00 : f32
    %0 = vector.broadcast %cst : f32 to vector<8x128xf32>
    %c0 = arith.constant 0 : index
    %c0_0 = arith.constant 0 : index
    %1 = vector.load %arg1[%c0, %c0_0] : memref<128x512xf32, #tpu.memory_space<vmem>>, vector<128x512xf32>
    %c0_i32 = arith.constant 0 : i32
    %2 = arith.index_cast %c0_i32 : i32 to index
    %c0_1 = arith.constant 0 : index
    %c0_2 = arith.constant 0 : index
    %3 = vector.load %arg0[%2, %c0_1, %c0_2] : memref<8x8x512xf32, #tpu.memory_space<vmem>>, vector<1x8x512xf32>
    %4 = vector.shape_cast %3 : vector<1x8x512xf32> to vector<8x512xf32>
    %cst_3 = arith.constant dense<0.000000e+00> : vector<8x512xf32>
    %5 = tpu.matmul %0, %1, %cst_3 {dimension_numbers = #tpu.dot_dimension_numbers<[1], [0], [0], [1], [0, 0, 1, 1], [], []>} : vector<8x128xf32>, vector<128x512xf32>, vector<8x512xf32> -> vector<8x512xf32>
    %6 = arith.addf %4, %5 : vector<8x512xf32>
    %7 = vector.extract_strided_slice %6 {offsets = [0, 0], sizes = [8, 128], strides = [1, 1]} : vector<8x512xf32> to vector<8x128xf32>
    %8 = arith.negf %7 : vector<8x128xf32>
    %9 = math.exp %8 : vector<8x128xf32>
    %cst_4 = arith.constant 1.000000e+00 : f32
    %10 = vector.broadcast %cst_4 : f32 to vector<8x128xf32>
    %11 = arith.addf %10, %9 : vector<8x128xf32>
    %12 = arith.divf %10, %11 : vector<8x128xf32>
    %13 = vector.extract_strided_slice %6 {offsets = [0, 128], sizes = [8, 128], strides = [1, 1]} : vector<8x512xf32> to vector<8x128xf32>
    %14 = arith.negf %13 : vector<8x128xf32>
    %15 = math.exp %14 : vector<8x128xf32>
    %cst_5 = arith.constant 1.000000e+00 : f32
    %16 = vector.broadcast %cst_5 : f32 to vector<8x128xf32>
    %17 = arith.addf %16, %15 : vector<8x128xf32>
    %18 = arith.divf %16, %17 : vector<8x128xf32>
    %19 = vector.extract_strided_slice %6 {offsets = [0, 256], sizes = [8, 128], strides = [1, 1]} : vector<8x512xf32> to vector<8x128xf32>
    %20 = math.tanh %19 : vector<8x128xf32>
    %21 = vector.extract_strided_slice %6 {offsets = [0, 384], sizes = [8, 128], strides = [1, 1]} : vector<8x512xf32> to vector<8x128xf32>
    %22 = arith.negf %21 : vector<8x128xf32>
    %23 = math.exp %22 : vector<8x128xf32>
    %cst_6 = arith.constant 1.000000e+00 : f32
    %24 = vector.broadcast %cst_6 : f32 to vector<8x128xf32>
    %25 = arith.addf %24, %23 : vector<8x128xf32>
    %26 = arith.divf %24, %25 : vector<8x128xf32>
    %27 = arith.mulf %18, %0 : vector<8x128xf32>
    %28 = arith.mulf %12, %20 : vector<8x128xf32>
    %29 = arith.addf %27, %28 : vector<8x128xf32>
    %30 = math.tanh %29 : vector<8x128xf32>
    %31 = arith.mulf %26, %30 : vector<8x128xf32>
    %c8_i32 = arith.constant 8 : i32
    %32 = arith.muli %c0_i32, %c8_i32 : i32
    %33 = tpu.assume_multiple %32, 8 : i32
    %34 = arith.index_cast %33 : i32 to index
    %c0_7 = arith.constant 0 : index
    %35 = vector.load %arg10[%34, %c0_7] : memref<64x128xf32, #tpu.memory_space<vmem>>, vector<8x128xf32>
    tpu.vector_store %arg10[%34, %c0_7], %31 {strides = array<i32>} : memref<64x128xf32, #tpu.memory_space<vmem>>, vector<8x128xf32>,
    %c1_i32 = arith.constant 1 : i32
    %36 = arith.index_cast %c1_i32 : i32 to index
    %c0_8 = arith.constant 0 : index
    %c0_9 = arith.constant 0 : index
    %37 = vector.load %arg0[%36, %c0_8, %c0_9] : memref<8x8x512xf32, #tpu.memory_space<vmem>>, vector<1x8x512xf32>
    %38 = vector.shape_cast %37 : vector<1x8x512xf32> to vector<8x512xf32>
    %cst_10 = arith.constant dense<0.000000e+00> : vector<8x512xf32>
    %39 = tpu.matmul %31, %1, %cst_10 {dimension_numbers = #tpu.dot_dimension_numbers<[1], [0], [0], [1], [0, 0, 1, 1], [], []>} : vector<8x128xf32>, vector<128x512xf32>, vector<8x512xf32> -> vector<8x512xf32>
    %40 = arith.addf %38, %39 : vector<8x512xf32>
    %41 = vector.extract_strided_slice %40 {offsets = [0, 0], sizes = [8, 128], strides = [1, 1]} : vector<8x512xf32> to vector<8x128xf32>
    %42 = arith.negf %41 : vector<8x128xf32>
    %43 = math.exp %42 : vector<8x128xf32>
    %cst_11 = arith.constant 1.000000e+00 : f32
    %44 = vector.broadcast %cst_11 : f32 to vector<8x128xf32>
    %45 = arith.addf %44, %43 : vector<8x128xf32>
    %46 = arith.divf %44, %45 : vector<8x128xf32>
    %47 = vector.extract_strided_slice %40 {offsets = [0, 128], sizes = [8, 128], strides = [1, 1]} : vector<8x512xf32> to vector<8x128xf32>
    %48 = arith.negf %47 : vector<8x128xf32>
    %49 = math.exp %48 : vector<8x128xf32>
    %cst_12 = arith.constant 1.000000e+00 : f32
    %50 = vector.broadcast %cst_12 : f32 to vector<8x128xf32>
    %51 = arith.addf %50, %49 : vector<8x128xf32>
    %52 = arith.divf %50, %51 : vector<8x128xf32>
    %53 = vector.extract_strided_slice %40 {offsets = [0, 256], sizes = [8, 128], strides = [1, 1]} : vector<8x512xf32> to vector<8x128xf32>
    %54 = math.tanh %53 : vector<8x128xf32>
    %55 = vector.extract_strided_slice %40 {offsets = [0, 384], sizes = [8, 128], strides = [1, 1]} : vector<8x512xf32> to vector<8x128xf32>
    %56 = arith.negf %55 : vector<8x128xf32>
    %57 = math.exp %56 : vector<8x128xf32>
    %cst_13 = arith.constant 1.000000e+00 : f32
    %58 = vector.broadcast %cst_13 : f32 to vector<8x128xf32>
    %59 = arith.addf %58, %57 : vector<8x128xf32>
    %60 = arith.divf %58, %59 : vector<8x128xf32>
    %61 = arith.mulf %52, %29 : vector<8x128xf32>
    %62 = arith.mulf %46, %54 : vector<8x128xf32>
    %63 = arith.addf %61, %62 : vector<8x128xf32>
    %64 = math.tanh %63 : vector<8x128xf32>
    %65 = arith.mulf %60, %64 : vector<8x128xf32>
    %c8_i32_14 = arith.constant 8 : i32
    %66 = arith.muli %c1_i32, %c8_i32_14 : i32
    %67 = tpu.assume_multiple %66, 8 : i32
    %68 = arith.index_cast %67 : i32 to index
    %c0_15 = arith.constant 0 : index
    %69 = vector.load %arg10[%68, %c0_15] : memref<64x128xf32, #tpu.memory_space<vmem>>, vector<8x128xf32>
    tpu.vector_store %arg10[%68, %c0_15], %65 {strides = array<i32>} : memref<64x128xf32, #tpu.memory_space<vmem>>, vector<8x128xf32>,
    %c2_i32 = arith.constant 2 : i32
    %70 = arith.index_cast %c2_i32 : i32 to index
    %c0_16 = arith.constant 0 : index
    %c0_17 = arith.constant 0 : index
    %71 = vector.load %arg0[%70, %c0_16, %c0_17] : memref<8x8x512xf32, #tpu.memory_space<vmem>>, vector<1x8x512xf32>
    %72 = vector.shape_cast %71 : vector<1x8x512xf32> to vector<8x512xf32>
    %cst_18 = arith.constant dense<0.000000e+00> : vector<8x512xf32>
    %73 = tpu.matmul %65, %1, %cst_18 {dimension_numbers = #tpu.dot_dimension_numbers<[1], [0], [0], [1], [0, 0, 1, 1], [], []>} : vector<8x128xf32>, vector<128x512xf32>, vector<8x512xf32> -> vector<8x512xf32>
    %74 = arith.addf %72, %73 : vector<8x512xf32>
    %75 = vector.extract_strided_slice %74 {offsets = [0, 0], sizes = [8, 128], strides = [1, 1]} : vector<8x512xf32> to vector<8x128xf32>
    %76 = arith.negf %75 : vector<8x128xf32>
    %77 = math.exp %76 : vector<8x128xf32>
    %cst_19 = arith.constant 1.000000e+00 : f32
    %78 = vector.broadcast %cst_19 : f32 to vector<8x128xf32>
    %79 = arith.addf %78, %77 : vector<8x128xf32>
    %80 = arith.divf %78, %79 : vector<8x128xf32>
    %81 = vector.extract_strided_slice %74 {offsets = [0, 128], sizes = [8, 128], strides = [1, 1]} : vector<8x512xf32> to vector<8x128xf32>
    %82 = arith.negf %81 : vector<8x128xf32>
    %83 = math.exp %82 : vector<8x128xf32>
    %cst_20 = arith.constant 1.000000e+00 : f32
    %84 = vector.broadcast %cst_20 : f32 to vector<8x128xf32>
    %85 = arith.addf %84, %83 : vector<8x128xf32>
    %86 = arith.divf %84, %85 : vector<8x128xf32>
    %87 = vector.extract_strided_slice %74 {offsets = [0, 256], sizes = [8, 128], strides = [1, 1]} : vector<8x512xf32> to vector<8x128xf32>
    %88 = math.tanh %87 : vector<8x128xf32>
    %89 = vector.extract_strided_slice %74 {offsets = [0, 384], sizes = [8, 128], strides = [1, 1]} : vector<8x512xf32> to vector<8x128xf32>
    %90 = arith.negf %89 : vector<8x128xf32>
    %91 = math.exp %90 : vector<8x128xf32>
    %cst_21 = arith.constant 1.000000e+00 : f32
    %92 = vector.broadcast %cst_21 : f32 to vector<8x128xf32>
    %93 = arith.addf %92, %91 : vector<8x128xf32>
    %94 = arith.divf %92, %93 : vector<8x128xf32>
    %95 = arith.mulf %86, %63 : vector<8x128xf32>
    %96 = arith.mulf %80, %88 : vector<8x128xf32>
    %97 = arith.addf %95, %96 : vector<8x128xf32>
    %98 = math.tanh %97 : vector<8x128xf32>
    %99 = arith.mulf %94, %98 : vector<8x128xf32>
    %c8_i32_22 = arith.constant 8 : i32
    %100 = arith.muli %c2_i32, %c8_i32_22 : i32
    %101 = tpu.assume_multiple %100, 8 : i32
    %102 = arith.index_cast %101 : i32 to index
    %c0_23 = arith.constant 0 : index
    %103 = vector.load %arg10[%102, %c0_23] : memref<64x128xf32, #tpu.memory_space<vmem>>, vector<8x128xf32>
    tpu.vector_store %arg10[%102, %c0_23], %99 {strides = array<i32>} : memref<64x128xf32, #tpu.memory_space<vmem>>, vector<8x128xf32>,
    %c3_i32 = arith.constant 3 : i32
    %104 = arith.index_cast %c3_i32 : i32 to index
    %c0_24 = arith.constant 0 : index
    %c0_25 = arith.constant 0 : index
    %105 = vector.load %arg0[%104, %c0_24, %c0_25] : memref<8x8x512xf32, #tpu.memory_space<vmem>>, vector<1x8x512xf32>
    %106 = vector.shape_cast %105 : vector<1x8x512xf32> to vector<8x512xf32>
    %cst_26 = arith.constant dense<0.000000e+00> : vector<8x512xf32>
    %107 = tpu.matmul %99, %1, %cst_26 {dimension_numbers = #tpu.dot_dimension_numbers<[1], [0], [0], [1], [0, 0, 1, 1], [], []>} : vector<8x128xf32>, vector<128x512xf32>, vector<8x512xf32> -> vector<8x512xf32>
    %108 = arith.addf %106, %107 : vector<8x512xf32>
    %109 = vector.extract_strided_slice %108 {offsets = [0, 0], sizes = [8, 128], strides = [1, 1]} : vector<8x512xf32> to vector<8x128xf32>
    %110 = arith.negf %109 : vector<8x128xf32>
    %111 = math.exp %110 : vector<8x128xf32>
    %cst_27 = arith.constant 1.000000e+00 : f32
    %112 = vector.broadcast %cst_27 : f32 to vector<8x128xf32>
    %113 = arith.addf %112, %111 : vector<8x128xf32>
    %114 = arith.divf %112, %113 : vector<8x128xf32>
    %115 = vector.extract_strided_slice %108 {offsets = [0, 128], sizes = [8, 128], strides = [1, 1]} : vector<8x512xf32> to vector<8x128xf32>
    %116 = arith.negf %115 : vector<8x128xf32>
    %117 = math.exp %116 : vector<8x128xf32>
    %cst_28 = arith.constant 1.000000e+00 : f32
    %118 = vector.broadcast %cst_28 : f32 to vector<8x128xf32>
    %119 = arith.addf %118, %117 : vector<8x128xf32>
    %120 = arith.divf %118, %119 : vector<8x128xf32>
    %121 = vector.extract_strided_slice %108 {offsets = [0, 256], sizes = [8, 128], strides = [1, 1]} : vector<8x512xf32> to vector<8x128xf32>
    %122 = math.tanh %121 : vector<8x128xf32>
    %123 = vector.extract_strided_slice %108 {offsets = [0, 384], sizes = [8, 128], strides = [1, 1]} : vector<8x512xf32> to vector<8x128xf32>
    %124 = arith.negf %123 : vector<8x128xf32>
    %125 = math.exp %124 : vector<8x128xf32>
    %cst_29 = arith.constant 1.000000e+00 : f32
    %126 = vector.broadcast %cst_29 : f32 to vector<8x128xf32>
    %127 = arith.addf %126, %125 : vector<8x128xf32>
    %128 = arith.divf %126, %127 : vector<8x128xf32>
    %129 = arith.mulf %120, %97 : vector<8x128xf32>
    %130 = arith.mulf %114, %122 : vector<8x128xf32>
    %131 = arith.addf %129, %130 : vector<8x128xf32>
    %132 = math.tanh %131 : vector<8x128xf32>
    %133 = arith.mulf %128, %132 : vector<8x128xf32>
    %c8_i32_30 = arith.constant 8 : i32
    %134 = arith.muli %c3_i32, %c8_i32_30 : i32
    %135 = tpu.assume_multiple %134, 8 : i32
    %136 = arith.index_cast %135 : i32 to index
    %c0_31 = arith.constant 0 : index
    %137 = vector.load %arg10[%136, %c0_31] : memref<64x128xf32, #tpu.memory_space<vmem>>, vector<8x128xf32>
    tpu.vector_store %arg10[%136, %c0_31], %133 {strides = array<i32>} : memref<64x128xf32, #tpu.memory_space<vmem>>, vector<8x128xf32>,
    %c4_i32 = arith.constant 4 : i32
    %138 = arith.index_cast %c4_i32 : i32 to index
    %c0_32 = arith.constant 0 : index
    %c0_33 = arith.constant 0 : index
    %139 = vector.load %arg0[%138, %c0_32, %c0_33] : memref<8x8x512xf32, #tpu.memory_space<vmem>>, vector<1x8x512xf32>
    %140 = vector.shape_cast %139 : vector<1x8x512xf32> to vector<8x512xf32>
    %cst_34 = arith.constant dense<0.000000e+00> : vector<8x512xf32>
    %141 = tpu.matmul %133, %1, %cst_34 {dimension_numbers = #tpu.dot_dimension_numbers<[1], [0], [0], [1], [0, 0, 1, 1], [], []>} : vector<8x128xf32>, vector<128x512xf32>, vector<8x512xf32> -> vector<8x512xf32>
    %142 = arith.addf %140, %141 : vector<8x512xf32>
    %143 = vector.extract_strided_slice %142 {offsets = [0, 0], sizes = [8, 128], strides = [1, 1]} : vector<8x512xf32> to vector<8x128xf32>
    %144 = arith.negf %143 : vector<8x128xf32>
    %145 = math.exp %144 : vector<8x128xf32>
    %cst_35 = arith.constant 1.000000e+00 : f32
    %146 = vector.broadcast %cst_35 : f32 to vector<8x128xf32>
    %147 = arith.addf %146, %145 : vector<8x128xf32>
    %148 = arith.divf %146, %147 : vector<8x128xf32>
    %149 = vector.extract_strided_slice %142 {offsets = [0, 128], sizes = [8, 128], strides = [1, 1]} : vector<8x512xf32> to vector<8x128xf32>
    %150 = arith.negf %149 : vector<8x128xf32>
    %151 = math.exp %150 : vector<8x128xf32>
    %cst_36 = arith.constant 1.000000e+00 : f32
    %152 = vector.broadcast %cst_36 : f32 to vector<8x128xf32>
    %153 = arith.addf %152, %151 : vector<8x128xf32>
    %154 = arith.divf %152, %153 : vector<8x128xf32>
    %155 = vector.extract_strided_slice %142 {offsets = [0, 256], sizes = [8, 128], strides = [1, 1]} : vector<8x512xf32> to vector<8x128xf32>
    %156 = math.tanh %155 : vector<8x128xf32>
    %157 = vector.extract_strided_slice %142 {offsets = [0, 384], sizes = [8, 128], strides = [1, 1]} : vector<8x512xf32> to vector<8x128xf32>
    %158 = arith.negf %157 : vector<8x128xf32>
    %159 = math.exp %158 : vector<8x128xf32>
    %cst_37 = arith.constant 1.000000e+00 : f32
    %160 = vector.broadcast %cst_37 : f32 to vector<8x128xf32>
    %161 = arith.addf %160, %159 : vector<8x128xf32>
    %162 = arith.divf %160, %161 : vector<8x128xf32>
    %163 = arith.mulf %154, %131 : vector<8x128xf32>
    %164 = arith.mulf %148, %156 : vector<8x128xf32>
    %165 = arith.addf %163, %164 : vector<8x128xf32>
    %166 = math.tanh %165 : vector<8x128xf32>
    %167 = arith.mulf %162, %166 : vector<8x128xf32>
    %c8_i32_38 = arith.constant 8 : i32
    %168 = arith.muli %c4_i32, %c8_i32_38 : i32
    %169 = tpu.assume_multiple %168, 8 : i32
    %170 = arith.index_cast %169 : i32 to index
    %c0_39 = arith.constant 0 : index
    %171 = vector.load %arg10[%170, %c0_39] : memref<64x128xf32, #tpu.memory_space<vmem>>, vector<8x128xf32>
    tpu.vector_store %arg10[%170, %c0_39], %167 {strides = array<i32>} : memref<64x128xf32, #tpu.memory_space<vmem>>, vector<8x128xf32>,
    %c5_i32 = arith.constant 5 : i32
    %172 = arith.index_cast %c5_i32 : i32 to index
    %c0_40 = arith.constant 0 : index
    %c0_41 = arith.constant 0 : index
    %173 = vector.load %arg0[%172, %c0_40, %c0_41] : memref<8x8x512xf32, #tpu.memory_space<vmem>>, vector<1x8x512xf32>
    %174 = vector.shape_cast %173 : vector<1x8x512xf32> to vector<8x512xf32>
    %cst_42 = arith.constant dense<0.000000e+00> : vector<8x512xf32>
    %175 = tpu.matmul %167, %1, %cst_42 {dimension_numbers = #tpu.dot_dimension_numbers<[1], [0], [0], [1], [0, 0, 1, 1], [], []>} : vector<8x128xf32>, vector<128x512xf32>, vector<8x512xf32> -> vector<8x512xf32>
    %176 = arith.addf %174, %175 : vector<8x512xf32>
    %177 = vector.extract_strided_slice %176 {offsets = [0, 0], sizes = [8, 128], strides = [1, 1]} : vector<8x512xf32> to vector<8x128xf32>
    %178 = arith.negf %177 : vector<8x128xf32>
    %179 = math.exp %178 : vector<8x128xf32>
    %cst_43 = arith.constant 1.000000e+00 : f32
    %180 = vector.broadcast %cst_43 : f32 to vector<8x128xf32>
    %181 = arith.addf %180, %179 : vector<8x128xf32>
    %182 = arith.divf %180, %181 : vector<8x128xf32>
    %183 = vector.extract_strided_slice %176 {offsets = [0, 128], sizes = [8, 128], strides = [1, 1]} : vector<8x512xf32> to vector<8x128xf32>
    %184 = arith.negf %183 : vector<8x128xf32>
    %185 = math.exp %184 : vector<8x128xf32>
    %cst_44 = arith.constant 1.000000e+00 : f32
    %186 = vector.broadcast %cst_44 : f32 to vector<8x128xf32>
    %187 = arith.addf %186, %185 : vector<8x128xf32>
    %188 = arith.divf %186, %187 : vector<8x128xf32>
    %189 = vector.extract_strided_slice %176 {offsets = [0, 256], sizes = [8, 128], strides = [1, 1]} : vector<8x512xf32> to vector<8x128xf32>
    %190 = math.tanh %189 : vector<8x128xf32>
    %191 = vector.extract_strided_slice %176 {offsets = [0, 384], sizes = [8, 128], strides = [1, 1]} : vector<8x512xf32> to vector<8x128xf32>
    %192 = arith.negf %191 : vector<8x128xf32>
    %193 = math.exp %192 : vector<8x128xf32>
    %cst_45 = arith.constant 1.000000e+00 : f32
    %194 = vector.broadcast %cst_45 : f32 to vector<8x128xf32>
    %195 = arith.addf %194, %193 : vector<8x128xf32>
    %196 = arith.divf %194, %195 : vector<8x128xf32>
    %197 = arith.mulf %188, %165 : vector<8x128xf32>
    %198 = arith.mulf %182, %190 : vector<8x128xf32>
    %199 = arith.addf %197, %198 : vector<8x128xf32>
    %200 = math.tanh %199 : vector<8x128xf32>
    %201 = arith.mulf %196, %200 : vector<8x128xf32>
    %c8_i32_46 = arith.constant 8 : i32
    %202 = arith.muli %c5_i32, %c8_i32_46 : i32
    %203 = tpu.assume_multiple %202, 8 : i32
    %204 = arith.index_cast %203 : i32 to index
    %c0_47 = arith.constant 0 : index
    %205 = vector.load %arg10[%204, %c0_47] : memref<64x128xf32, #tpu.memory_space<vmem>>, vector<8x128xf32>
    tpu.vector_store %arg10[%204, %c0_47], %201 {strides = array<i32>} : memref<64x128xf32, #tpu.memory_space<vmem>>, vector<8x128xf32>,
    %c6_i32 = arith.constant 6 : i32
    %206 = arith.index_cast %c6_i32 : i32 to index
    %c0_48 = arith.constant 0 : index
    %c0_49 = arith.constant 0 : index
    %207 = vector.load %arg0[%206, %c0_48, %c0_49] : memref<8x8x512xf32, #tpu.memory_space<vmem>>, vector<1x8x512xf32>
    %208 = vector.shape_cast %207 : vector<1x8x512xf32> to vector<8x512xf32>
    %cst_50 = arith.constant dense<0.000000e+00> : vector<8x512xf32>
    %209 = tpu.matmul %201, %1, %cst_50 {dimension_numbers = #tpu.dot_dimension_numbers<[1], [0], [0], [1], [0, 0, 1, 1], [], []>} : vector<8x128xf32>, vector<128x512xf32>, vector<8x512xf32> -> vector<8x512xf32>
    %210 = arith.addf %208, %209 : vector<8x512xf32>
    %211 = vector.extract_strided_slice %210 {offsets = [0, 0], sizes = [8, 128], strides = [1, 1]} : vector<8x512xf32> to vector<8x128xf32>
    %212 = arith.negf %211 : vector<8x128xf32>
    %213 = math.exp %212 : vector<8x128xf32>
    %cst_51 = arith.constant 1.000000e+00 : f32
    %214 = vector.broadcast %cst_51 : f32 to vector<8x128xf32>
    %215 = arith.addf %214, %213 : vector<8x128xf32>
    %216 = arith.divf %214, %215 : vector<8x128xf32>
    %217 = vector.extract_strided_slice %210 {offsets = [0, 128], sizes = [8, 128], strides = [1, 1]} : vector<8x512xf32> to vector<8x128xf32>
    %218 = arith.negf %217 : vector<8x128xf32>
    %219 = math.exp %218 : vector<8x128xf32>
    %cst_52 = arith.constant 1.000000e+00 : f32
    %220 = vector.broadcast %cst_52 : f32 to vector<8x128xf32>
    %221 = arith.addf %220, %219 : vector<8x128xf32>
    %222 = arith.divf %220, %221 : vector<8x128xf32>
    %223 = vector.extract_strided_slice %210 {offsets = [0, 256], sizes = [8, 128], strides = [1, 1]} : vector<8x512xf32> to vector<8x128xf32>
    %224 = math.tanh %223 : vector<8x128xf32>
    %225 = vector.extract_strided_slice %210 {offsets = [0, 384], sizes = [8, 128], strides = [1, 1]} : vector<8x512xf32> to vector<8x128xf32>
    %226 = arith.negf %225 : vector<8x128xf32>
    %227 = math.exp %226 : vector<8x128xf32>
    %cst_53 = arith.constant 1.000000e+00 : f32
    %228 = vector.broadcast %cst_53 : f32 to vector<8x128xf32>
    %229 = arith.addf %228, %227 : vector<8x128xf32>
    %230 = arith.divf %228, %229 : vector<8x128xf32>
    %231 = arith.mulf %222, %199 : vector<8x128xf32>
    %232 = arith.mulf %216, %224 : vector<8x128xf32>
    %233 = arith.addf %231, %232 : vector<8x128xf32>
    %234 = math.tanh %233 : vector<8x128xf32>
    %235 = arith.mulf %230, %234 : vector<8x128xf32>
    %c8_i32_54 = arith.constant 8 : i32
    %236 = arith.muli %c6_i32, %c8_i32_54 : i32
    %237 = tpu.assume_multiple %236, 8 : i32
    %238 = arith.index_cast %237 : i32 to index
    %c0_55 = arith.constant 0 : index
    %239 = vector.load %arg10[%238, %c0_55] : memref<64x128xf32, #tpu.memory_space<vmem>>, vector<8x128xf32>
    tpu.vector_store %arg10[%238, %c0_55], %235 {strides = array<i32>} : memref<64x128xf32, #tpu.memory_space<vmem>>, vector<8x128xf32>,
    %c7_i32 = arith.constant 7 : i32
    %240 = arith.index_cast %c7_i32 : i32 to index
    %c0_56 = arith.constant 0 : index
    %c0_57 = arith.constant 0 : index
    %241 = vector.load %arg0[%240, %c0_56, %c0_57] : memref<8x8x512xf32, #tpu.memory_space<vmem>>, vector<1x8x512xf32>
    %242 = vector.shape_cast %241 : vector<1x8x512xf32> to vector<8x512xf32>
    %cst_58 = arith.constant dense<0.000000e+00> : vector<8x512xf32>
    %243 = tpu.matmul %235, %1, %cst_58 {dimension_numbers = #tpu.dot_dimension_numbers<[1], [0], [0], [1], [0, 0, 1, 1], [], []>} : vector<8x128xf32>, vector<128x512xf32>, vector<8x512xf32> -> vector<8x512xf32>
    %244 = arith.addf %242, %243 : vector<8x512xf32>
    %245 = vector.extract_strided_slice %244 {offsets = [0, 0], sizes = [8, 128], strides = [1, 1]} : vector<8x512xf32> to vector<8x128xf32>
    %246 = arith.negf %245 : vector<8x128xf32>
    %247 = math.exp %246 : vector<8x128xf32>
    %cst_59 = arith.constant 1.000000e+00 : f32
    %248 = vector.broadcast %cst_59 : f32 to vector<8x128xf32>
    %249 = arith.addf %248, %247 : vector<8x128xf32>
    %250 = arith.divf %248, %249 : vector<8x128xf32>
    %251 = vector.extract_strided_slice %244 {offsets = [0, 128], sizes = [8, 128], strides = [1, 1]} : vector<8x512xf32> to vector<8x128xf32>
    %252 = arith.negf %251 : vector<8x128xf32>
    %253 = math.exp %252 : vector<8x128xf32>
    %cst_60 = arith.constant 1.000000e+00 : f32
    %254 = vector.broadcast %cst_60 : f32 to vector<8x128xf32>
    %255 = arith.addf %254, %253 : vector<8x128xf32>
    %256 = arith.divf %254, %255 : vector<8x128xf32>
    %257 = vector.extract_strided_slice %244 {offsets = [0, 256], sizes = [8, 128], strides = [1, 1]} : vector<8x512xf32> to vector<8x128xf32>
    %258 = math.tanh %257 : vector<8x128xf32>
    %259 = vector.extract_strided_slice %244 {offsets = [0, 384], sizes = [8, 128], strides = [1, 1]} : vector<8x512xf32> to vector<8x128xf32>
    %260 = arith.negf %259 : vector<8x128xf32>
    %261 = math.exp %260 : vector<8x128xf32>
    %cst_61 = arith.constant 1.000000e+00 : f32
    %262 = vector.broadcast %cst_61 : f32 to vector<8x128xf32>
    %263 = arith.addf %262, %261 : vector<8x128xf32>
    %264 = arith.divf %262, %263 : vector<8x128xf32>
    %265 = arith.mulf %256, %233 : vector<8x128xf32>
    %266 = arith.mulf %250, %258 : vector<8x128xf32>
    %267 = arith.addf %265, %266 : vector<8x128xf32>
    %268 = math.tanh %267 : vector<8x128xf32>
    %269 = arith.mulf %264, %268 : vector<8x128xf32>
    %c8_i32_62 = arith.constant 8 : i32
    %270 = arith.muli %c7_i32, %c8_i32_62 : i32
    %271 = tpu.assume_multiple %270, 8 : i32
    %272 = arith.index_cast %271 : i32 to index
    %c0_63 = arith.constant 0 : index
    %273 = vector.load %arg10[%272, %c0_63] : memref<64x128xf32, #tpu.memory_space<vmem>>, vector<8x128xf32>
    tpu.vector_store %arg10[%272, %c0_63], %269 {strides = array<i32>} : memref<64x128xf32, #tpu.memory_space<vmem>>, vector<8x128xf32>,
    %c8_i32_64 = arith.constant 8 : i32
    %c0_65 = arith.constant 0 : index
    %c0_66 = arith.constant 0 : index
    %274 = vector.load %arg10[%c0_65, %c0_66] : memref<64x128xf32, #tpu.memory_space<vmem>>, vector<64x128xf32>
    %c0_67 = arith.constant 0 : index
    %c0_68 = arith.constant 0 : index
    %275 = vector.load %arg2[%c0_67, %c0_68] : memref<128x512xf32, #tpu.memory_space<vmem>>, vector<128x512xf32>
    %cst_69 = arith.constant dense<0.000000e+00> : vector<64x512xf32>
    %276 = tpu.matmul %274, %275, %cst_69 {dimension_numbers = #tpu.dot_dimension_numbers<[1], [0], [0], [1], [0, 0, 1, 1], [], []>} : vector<64x128xf32>, vector<128x512xf32>, vector<64x512xf32> -> vector<64x512xf32>
    %c0_70 = arith.constant 0 : index
    %c0_71 = arith.constant 0 : index
    %277 = vector.load %arg3[%c0_70, %c0_71] : memref<1x512xf32, #tpu.memory_space<vmem>>, vector<1x512xf32>
    %278 = vector.broadcast %277 : vector<1x512xf32> to vector<64x512xf32>
    %279 = arith.addf %276, %278 : vector<64x512xf32>
    %c0_72 = arith.constant 0 : index
    %c0_73 = arith.constant 0 : index
    %280 = vector.load %arg11[%c0_72, %c0_73] : memref<64x512xf32, #tpu.memory_space<vmem>>, vector<64x512xf32>
    tpu.vector_store %arg11[%c0_72, %c0_73], %279 {strides = array<i32>} : memref<64x512xf32, #tpu.memory_space<vmem>>, vector<64x512xf32>,
    %c0_74 = arith.constant 0 : index
    %c0_75 = arith.constant 0 : index
    %281 = vector.load %arg4[%c0_74, %c0_75] : memref<128x512xf32, #tpu.memory_space<vmem>>, vector<128x512xf32>
    %c0_i32_76 = arith.constant 0 : i32
    %c8_i32_77 = arith.constant 8 : i32
    %282 = arith.muli %c0_i32_76, %c8_i32_77 : i32
    %283 = tpu.assume_multiple %282, 8 : i32
    %284 = arith.index_cast %283 : i32 to index
    %c0_78 = arith.constant 0 : index
    %285 = vector.load %arg11[%284, %c0_78] : memref<64x512xf32, #tpu.memory_space<vmem>>, vector<8x512xf32>
    %cst_79 = arith.constant dense<0.000000e+00> : vector<8x512xf32>
    %286 = tpu.matmul %0, %281, %cst_79 {dimension_numbers = #tpu.dot_dimension_numbers<[1], [0], [0], [1], [0, 0, 1, 1], [], []>} : vector<8x128xf32>, vector<128x512xf32>, vector<8x512xf32> -> vector<8x512xf32>
    %287 = arith.addf %285, %286 : vector<8x512xf32>
    %288 = vector.extract_strided_slice %287 {offsets = [0, 0], sizes = [8, 128], strides = [1, 1]} : vector<8x512xf32> to vector<8x128xf32>
    %289 = arith.negf %288 : vector<8x128xf32>
    %290 = math.exp %289 : vector<8x128xf32>
    %cst_80 = arith.constant 1.000000e+00 : f32
    %291 = vector.broadcast %cst_80 : f32 to vector<8x128xf32>
    %292 = arith.addf %291, %290 : vector<8x128xf32>
    %293 = arith.divf %291, %292 : vector<8x128xf32>
    %294 = vector.extract_strided_slice %287 {offsets = [0, 128], sizes = [8, 128], strides = [1, 1]} : vector<8x512xf32> to vector<8x128xf32>
    %295 = arith.negf %294 : vector<8x128xf32>
    %296 = math.exp %295 : vector<8x128xf32>
    %cst_81 = arith.constant 1.000000e+00 : f32
    %297 = vector.broadcast %cst_81 : f32 to vector<8x128xf32>
    %298 = arith.addf %297, %296 : vector<8x128xf32>
    %299 = arith.divf %297, %298 : vector<8x128xf32>
    %300 = vector.extract_strided_slice %287 {offsets = [0, 256], sizes = [8, 128], strides = [1, 1]} : vector<8x512xf32> to vector<8x128xf32>
    %301 = math.tanh %300 : vector<8x128xf32>
    %302 = vector.extract_strided_slice %287 {offsets = [0, 384], sizes = [8, 128], strides = [1, 1]} : vector<8x512xf32> to vector<8x128xf32>
    %303 = arith.negf %302 : vector<8x128xf32>
    %304 = math.exp %303 : vector<8x128xf32>
    %cst_82 = arith.constant 1.000000e+00 : f32
    %305 = vector.broadcast %cst_82 : f32 to vector<8x128xf32>
    %306 = arith.addf %305, %304 : vector<8x128xf32>
    %307 = arith.divf %305, %306 : vector<8x128xf32>
    %308 = arith.mulf %299, %0 : vector<8x128xf32>
    %309 = arith.mulf %293, %301 : vector<8x128xf32>
    %310 = arith.addf %308, %309 : vector<8x128xf32>
    %311 = math.tanh %310 : vector<8x128xf32>
    %312 = arith.mulf %307, %311 : vector<8x128xf32>
    %c1_i32_83 = arith.constant 1 : i32
    %c8_i32_84 = arith.constant 8 : i32
    %313 = arith.muli %c1_i32_83, %c8_i32_84 : i32
    %314 = tpu.assume_multiple %313, 8 : i32
    %315 = arith.index_cast %314 : i32 to index
    %c0_85 = arith.constant 0 : index
    %316 = vector.load %arg11[%315, %c0_85] : memref<64x512xf32, #tpu.memory_space<vmem>>, vector<8x512xf32>
    %cst_86 = arith.constant dense<0.000000e+00> : vector<8x512xf32>
    %317 = tpu.matmul %312, %281, %cst_86 {dimension_numbers = #tpu.dot_dimension_numbers<[1], [0], [0], [1], [0, 0, 1, 1], [], []>} : vector<8x128xf32>, vector<128x512xf32>, vector<8x512xf32> -> vector<8x512xf32>
    %318 = arith.addf %316, %317 : vector<8x512xf32>
    %319 = vector.extract_strided_slice %318 {offsets = [0, 0], sizes = [8, 128], strides = [1, 1]} : vector<8x512xf32> to vector<8x128xf32>
    %320 = arith.negf %319 : vector<8x128xf32>
    %321 = math.exp %320 : vector<8x128xf32>
    %cst_87 = arith.constant 1.000000e+00 : f32
    %322 = vector.broadcast %cst_87 : f32 to vector<8x128xf32>
    %323 = arith.addf %322, %321 : vector<8x128xf32>
    %324 = arith.divf %322, %323 : vector<8x128xf32>
    %325 = vector.extract_strided_slice %318 {offsets = [0, 128], sizes = [8, 128], strides = [1, 1]} : vector<8x512xf32> to vector<8x128xf32>
    %326 = arith.negf %325 : vector<8x128xf32>
    %327 = math.exp %326 : vector<8x128xf32>
    %cst_88 = arith.constant 1.000000e+00 : f32
    %328 = vector.broadcast %cst_88 : f32 to vector<8x128xf32>
    %329 = arith.addf %328, %327 : vector<8x128xf32>
    %330 = arith.divf %328, %329 : vector<8x128xf32>
    %331 = vector.extract_strided_slice %318 {offsets = [0, 256], sizes = [8, 128], strides = [1, 1]} : vector<8x512xf32> to vector<8x128xf32>
    %332 = math.tanh %331 : vector<8x128xf32>
    %333 = vector.extract_strided_slice %318 {offsets = [0, 384], sizes = [8, 128], strides = [1, 1]} : vector<8x512xf32> to vector<8x128xf32>
    %334 = arith.negf %333 : vector<8x128xf32>
    %335 = math.exp %334 : vector<8x128xf32>
    %cst_89 = arith.constant 1.000000e+00 : f32
    %336 = vector.broadcast %cst_89 : f32 to vector<8x128xf32>
    %337 = arith.addf %336, %335 : vector<8x128xf32>
    %338 = arith.divf %336, %337 : vector<8x128xf32>
    %339 = arith.mulf %330, %310 : vector<8x128xf32>
    %340 = arith.mulf %324, %332 : vector<8x128xf32>
    %341 = arith.addf %339, %340 : vector<8x128xf32>
    %342 = math.tanh %341 : vector<8x128xf32>
    %343 = arith.mulf %338, %342 : vector<8x128xf32>
    %c2_i32_90 = arith.constant 2 : i32
    %c8_i32_91 = arith.constant 8 : i32
    %344 = arith.muli %c2_i32_90, %c8_i32_91 : i32
    %345 = tpu.assume_multiple %344, 8 : i32
    %346 = arith.index_cast %345 : i32 to index
    %c0_92 = arith.constant 0 : index
    %347 = vector.load %arg11[%346, %c0_92] : memref<64x512xf32, #tpu.memory_space<vmem>>, vector<8x512xf32>
    %cst_93 = arith.constant dense<0.000000e+00> : vector<8x512xf32>
    %348 = tpu.matmul %343, %281, %cst_93 {dimension_numbers = #tpu.dot_dimension_numbers<[1], [0], [0], [1], [0, 0, 1, 1], [], []>} : vector<8x128xf32>, vector<128x512xf32>, vector<8x512xf32> -> vector<8x512xf32>
    %349 = arith.addf %347, %348 : vector<8x512xf32>
    %350 = vector.extract_strided_slice %349 {offsets = [0, 0], sizes = [8, 128], strides = [1, 1]} : vector<8x512xf32> to vector<8x128xf32>
    %351 = arith.negf %350 : vector<8x128xf32>
    %352 = math.exp %351 : vector<8x128xf32>
    %cst_94 = arith.constant 1.000000e+00 : f32
    %353 = vector.broadcast %cst_94 : f32 to vector<8x128xf32>
    %354 = arith.addf %353, %352 : vector<8x128xf32>
    %355 = arith.divf %353, %354 : vector<8x128xf32>
    %356 = vector.extract_strided_slice %349 {offsets = [0, 128], sizes = [8, 128], strides = [1, 1]} : vector<8x512xf32> to vector<8x128xf32>
    %357 = arith.negf %356 : vector<8x128xf32>
    %358 = math.exp %357 : vector<8x128xf32>
    %cst_95 = arith.constant 1.000000e+00 : f32
    %359 = vector.broadcast %cst_95 : f32 to vector<8x128xf32>
    %360 = arith.addf %359, %358 : vector<8x128xf32>
    %361 = arith.divf %359, %360 : vector<8x128xf32>
    %362 = vector.extract_strided_slice %349 {offsets = [0, 256], sizes = [8, 128], strides = [1, 1]} : vector<8x512xf32> to vector<8x128xf32>
    %363 = math.tanh %362 : vector<8x128xf32>
    %364 = vector.extract_strided_slice %349 {offsets = [0, 384], sizes = [8, 128], strides = [1, 1]} : vector<8x512xf32> to vector<8x128xf32>
    %365 = arith.negf %364 : vector<8x128xf32>
    %366 = math.exp %365 : vector<8x128xf32>
    %cst_96 = arith.constant 1.000000e+00 : f32
    %367 = vector.broadcast %cst_96 : f32 to vector<8x128xf32>
    %368 = arith.addf %367, %366 : vector<8x128xf32>
    %369 = arith.divf %367, %368 : vector<8x128xf32>
    %370 = arith.mulf %361, %341 : vector<8x128xf32>
    %371 = arith.mulf %355, %363 : vector<8x128xf32>
    %372 = arith.addf %370, %371 : vector<8x128xf32>
    %373 = math.tanh %372 : vector<8x128xf32>
    %374 = arith.mulf %369, %373 : vector<8x128xf32>
    %c3_i32_97 = arith.constant 3 : i32
    %c8_i32_98 = arith.constant 8 : i32
    %375 = arith.muli %c3_i32_97, %c8_i32_98 : i32
    %376 = tpu.assume_multiple %375, 8 : i32
    %377 = arith.index_cast %376 : i32 to index
    %c0_99 = arith.constant 0 : index
    %378 = vector.load %arg11[%377, %c0_99] : memref<64x512xf32, #tpu.memory_space<vmem>>, vector<8x512xf32>
    %cst_100 = arith.constant dense<0.000000e+00> : vector<8x512xf32>
    %379 = tpu.matmul %374, %281, %cst_100 {dimension_numbers = #tpu.dot_dimension_numbers<[1], [0], [0], [1], [0, 0, 1, 1], [], []>} : vector<8x128xf32>, vector<128x512xf32>, vector<8x512xf32> -> vector<8x512xf32>
    %380 = arith.addf %378, %379 : vector<8x512xf32>
    %381 = vector.extract_strided_slice %380 {offsets = [0, 0], sizes = [8, 128], strides = [1, 1]} : vector<8x512xf32> to vector<8x128xf32>
    %382 = arith.negf %381 : vector<8x128xf32>
    %383 = math.exp %382 : vector<8x128xf32>
    %cst_101 = arith.constant 1.000000e+00 : f32
    %384 = vector.broadcast %cst_101 : f32 to vector<8x128xf32>
    %385 = arith.addf %384, %383 : vector<8x128xf32>
    %386 = arith.divf %384, %385 : vector<8x128xf32>
    %387 = vector.extract_strided_slice %380 {offsets = [0, 128], sizes = [8, 128], strides = [1, 1]} : vector<8x512xf32> to vector<8x128xf32>
    %388 = arith.negf %387 : vector<8x128xf32>
    %389 = math.exp %388 : vector<8x128xf32>
    %cst_102 = arith.constant 1.000000e+00 : f32
    %390 = vector.broadcast %cst_102 : f32 to vector<8x128xf32>
    %391 = arith.addf %390, %389 : vector<8x128xf32>
    %392 = arith.divf %390, %391 : vector<8x128xf32>
    %393 = vector.extract_strided_slice %380 {offsets = [0, 256], sizes = [8, 128], strides = [1, 1]} : vector<8x512xf32> to vector<8x128xf32>
    %394 = math.tanh %393 : vector<8x128xf32>
    %395 = vector.extract_strided_slice %380 {offsets = [0, 384], sizes = [8, 128], strides = [1, 1]} : vector<8x512xf32> to vector<8x128xf32>
    %396 = arith.negf %395 : vector<8x128xf32>
    %397 = math.exp %396 : vector<8x128xf32>
    %cst_103 = arith.constant 1.000000e+00 : f32
    %398 = vector.broadcast %cst_103 : f32 to vector<8x128xf32>
    %399 = arith.addf %398, %397 : vector<8x128xf32>
    %400 = arith.divf %398, %399 : vector<8x128xf32>
    %401 = arith.mulf %392, %372 : vector<8x128xf32>
    %402 = arith.mulf %386, %394 : vector<8x128xf32>
    %403 = arith.addf %401, %402 : vector<8x128xf32>
    %404 = math.tanh %403 : vector<8x128xf32>
    %405 = arith.mulf %400, %404 : vector<8x128xf32>
    %c4_i32_104 = arith.constant 4 : i32
    %c8_i32_105 = arith.constant 8 : i32
    %406 = arith.muli %c4_i32_104, %c8_i32_105 : i32
    %407 = tpu.assume_multiple %406, 8 : i32
    %408 = arith.index_cast %407 : i32 to index
    %c0_106 = arith.constant 0 : index
    %409 = vector.load %arg11[%408, %c0_106] : memref<64x512xf32, #tpu.memory_space<vmem>>, vector<8x512xf32>
    %cst_107 = arith.constant dense<0.000000e+00> : vector<8x512xf32>
    %410 = tpu.matmul %405, %281, %cst_107 {dimension_numbers = #tpu.dot_dimension_numbers<[1], [0], [0], [1], [0, 0, 1, 1], [], []>} : vector<8x128xf32>, vector<128x512xf32>, vector<8x512xf32> -> vector<8x512xf32>
    %411 = arith.addf %409, %410 : vector<8x512xf32>
    %412 = vector.extract_strided_slice %411 {offsets = [0, 0], sizes = [8, 128], strides = [1, 1]} : vector<8x512xf32> to vector<8x128xf32>
    %413 = arith.negf %412 : vector<8x128xf32>
    %414 = math.exp %413 : vector<8x128xf32>
    %cst_108 = arith.constant 1.000000e+00 : f32
    %415 = vector.broadcast %cst_108 : f32 to vector<8x128xf32>
    %416 = arith.addf %415, %414 : vector<8x128xf32>
    %417 = arith.divf %415, %416 : vector<8x128xf32>
    %418 = vector.extract_strided_slice %411 {offsets = [0, 128], sizes = [8, 128], strides = [1, 1]} : vector<8x512xf32> to vector<8x128xf32>
    %419 = arith.negf %418 : vector<8x128xf32>
    %420 = math.exp %419 : vector<8x128xf32>
    %cst_109 = arith.constant 1.000000e+00 : f32
    %421 = vector.broadcast %cst_109 : f32 to vector<8x128xf32>
    %422 = arith.addf %421, %420 : vector<8x128xf32>
    %423 = arith.divf %421, %422 : vector<8x128xf32>
    %424 = vector.extract_strided_slice %411 {offsets = [0, 256], sizes = [8, 128], strides = [1, 1]} : vector<8x512xf32> to vector<8x128xf32>
    %425 = math.tanh %424 : vector<8x128xf32>
    %426 = vector.extract_strided_slice %411 {offsets = [0, 384], sizes = [8, 128], strides = [1, 1]} : vector<8x512xf32> to vector<8x128xf32>
    %427 = arith.negf %426 : vector<8x128xf32>
    %428 = math.exp %427 : vector<8x128xf32>
    %cst_110 = arith.constant 1.000000e+00 : f32
    %429 = vector.broadcast %cst_110 : f32 to vector<8x128xf32>
    %430 = arith.addf %429, %428 : vector<8x128xf32>
    %431 = arith.divf %429, %430 : vector<8x128xf32>
    %432 = arith.mulf %423, %403 : vector<8x128xf32>
    %433 = arith.mulf %417, %425 : vector<8x128xf32>
    %434 = arith.addf %432, %433 : vector<8x128xf32>
    %435 = math.tanh %434 : vector<8x128xf32>
    %436 = arith.mulf %431, %435 : vector<8x128xf32>
    %c5_i32_111 = arith.constant 5 : i32
    %c8_i32_112 = arith.constant 8 : i32
    %437 = arith.muli %c5_i32_111, %c8_i32_112 : i32
    %438 = tpu.assume_multiple %437, 8 : i32
    %439 = arith.index_cast %438 : i32 to index
    %c0_113 = arith.constant 0 : index
    %440 = vector.load %arg11[%439, %c0_113] : memref<64x512xf32, #tpu.memory_space<vmem>>, vector<8x512xf32>
    %cst_114 = arith.constant dense<0.000000e+00> : vector<8x512xf32>
    %441 = tpu.matmul %436, %281, %cst_114 {dimension_numbers = #tpu.dot_dimension_numbers<[1], [0], [0], [1], [0, 0, 1, 1], [], []>} : vector<8x128xf32>, vector<128x512xf32>, vector<8x512xf32> -> vector<8x512xf32>
    %442 = arith.addf %440, %441 : vector<8x512xf32>
    %443 = vector.extract_strided_slice %442 {offsets = [0, 0], sizes = [8, 128], strides = [1, 1]} : vector<8x512xf32> to vector<8x128xf32>
    %444 = arith.negf %443 : vector<8x128xf32>
    %445 = math.exp %444 : vector<8x128xf32>
    %cst_115 = arith.constant 1.000000e+00 : f32
    %446 = vector.broadcast %cst_115 : f32 to vector<8x128xf32>
    %447 = arith.addf %446, %445 : vector<8x128xf32>
    %448 = arith.divf %446, %447 : vector<8x128xf32>
    %449 = vector.extract_strided_slice %442 {offsets = [0, 128], sizes = [8, 128], strides = [1, 1]} : vector<8x512xf32> to vector<8x128xf32>
    %450 = arith.negf %449 : vector<8x128xf32>
    %451 = math.exp %450 : vector<8x128xf32>
    %cst_116 = arith.constant 1.000000e+00 : f32
    %452 = vector.broadcast %cst_116 : f32 to vector<8x128xf32>
    %453 = arith.addf %452, %451 : vector<8x128xf32>
    %454 = arith.divf %452, %453 : vector<8x128xf32>
    %455 = vector.extract_strided_slice %442 {offsets = [0, 256], sizes = [8, 128], strides = [1, 1]} : vector<8x512xf32> to vector<8x128xf32>
    %456 = math.tanh %455 : vector<8x128xf32>
    %457 = vector.extract_strided_slice %442 {offsets = [0, 384], sizes = [8, 128], strides = [1, 1]} : vector<8x512xf32> to vector<8x128xf32>
    %458 = arith.negf %457 : vector<8x128xf32>
    %459 = math.exp %458 : vector<8x128xf32>
    %cst_117 = arith.constant 1.000000e+00 : f32
    %460 = vector.broadcast %cst_117 : f32 to vector<8x128xf32>
    %461 = arith.addf %460, %459 : vector<8x128xf32>
    %462 = arith.divf %460, %461 : vector<8x128xf32>
    %463 = arith.mulf %454, %434 : vector<8x128xf32>
    %464 = arith.mulf %448, %456 : vector<8x128xf32>
    %465 = arith.addf %463, %464 : vector<8x128xf32>
    %466 = math.tanh %465 : vector<8x128xf32>
    %467 = arith.mulf %462, %466 : vector<8x128xf32>
    %c6_i32_118 = arith.constant 6 : i32
    %c8_i32_119 = arith.constant 8 : i32
    %468 = arith.muli %c6_i32_118, %c8_i32_119 : i32
    %469 = tpu.assume_multiple %468, 8 : i32
    %470 = arith.index_cast %469 : i32 to index
    %c0_120 = arith.constant 0 : index
    %471 = vector.load %arg11[%470, %c0_120] : memref<64x512xf32, #tpu.memory_space<vmem>>, vector<8x512xf32>
    %cst_121 = arith.constant dense<0.000000e+00> : vector<8x512xf32>
    %472 = tpu.matmul %467, %281, %cst_121 {dimension_numbers = #tpu.dot_dimension_numbers<[1], [0], [0], [1], [0, 0, 1, 1], [], []>} : vector<8x128xf32>, vector<128x512xf32>, vector<8x512xf32> -> vector<8x512xf32>
    %473 = arith.addf %471, %472 : vector<8x512xf32>
    %474 = vector.extract_strided_slice %473 {offsets = [0, 0], sizes = [8, 128], strides = [1, 1]} : vector<8x512xf32> to vector<8x128xf32>
    %475 = arith.negf %474 : vector<8x128xf32>
    %476 = math.exp %475 : vector<8x128xf32>
    %cst_122 = arith.constant 1.000000e+00 : f32
    %477 = vector.broadcast %cst_122 : f32 to vector<8x128xf32>
    %478 = arith.addf %477, %476 : vector<8x128xf32>
    %479 = arith.divf %477, %478 : vector<8x128xf32>
    %480 = vector.extract_strided_slice %473 {offsets = [0, 128], sizes = [8, 128], strides = [1, 1]} : vector<8x512xf32> to vector<8x128xf32>
    %481 = arith.negf %480 : vector<8x128xf32>
    %482 = math.exp %481 : vector<8x128xf32>
    %cst_123 = arith.constant 1.000000e+00 : f32
    %483 = vector.broadcast %cst_123 : f32 to vector<8x128xf32>
    %484 = arith.addf %483, %482 : vector<8x128xf32>
    %485 = arith.divf %483, %484 : vector<8x128xf32>
    %486 = vector.extract_strided_slice %473 {offsets = [0, 256], sizes = [8, 128], strides = [1, 1]} : vector<8x512xf32> to vector<8x128xf32>
    %487 = math.tanh %486 : vector<8x128xf32>
    %488 = vector.extract_strided_slice %473 {offsets = [0, 384], sizes = [8, 128], strides = [1, 1]} : vector<8x512xf32> to vector<8x128xf32>
    %489 = arith.negf %488 : vector<8x128xf32>
    %490 = math.exp %489 : vector<8x128xf32>
    %cst_124 = arith.constant 1.000000e+00 : f32
    %491 = vector.broadcast %cst_124 : f32 to vector<8x128xf32>
    %492 = arith.addf %491, %490 : vector<8x128xf32>
    %493 = arith.divf %491, %492 : vector<8x128xf32>
    %494 = arith.mulf %485, %465 : vector<8x128xf32>
    %495 = arith.mulf %479, %487 : vector<8x128xf32>
    %496 = arith.addf %494, %495 : vector<8x128xf32>
    %497 = math.tanh %496 : vector<8x128xf32>
    %498 = arith.mulf %493, %497 : vector<8x128xf32>
    %c7_i32_125 = arith.constant 7 : i32
    %c8_i32_126 = arith.constant 8 : i32
    %499 = arith.muli %c7_i32_125, %c8_i32_126 : i32
    %500 = tpu.assume_multiple %499, 8 : i32
    %501 = arith.index_cast %500 : i32 to index
    %c0_127 = arith.constant 0 : index
    %502 = vector.load %arg11[%501, %c0_127] : memref<64x512xf32, #tpu.memory_space<vmem>>, vector<8x512xf32>
    %cst_128 = arith.constant dense<0.000000e+00> : vector<8x512xf32>
    %503 = tpu.matmul %498, %281, %cst_128 {dimension_numbers = #tpu.dot_dimension_numbers<[1], [0], [0], [1], [0, 0, 1, 1], [], []>} : vector<8x128xf32>, vector<128x512xf32>, vector<8x512xf32> -> vector<8x512xf32>
    %504 = arith.addf %502, %503 : vector<8x512xf32>
    %505 = vector.extract_strided_slice %504 {offsets = [0, 0], sizes = [8, 128], strides = [1, 1]} : vector<8x512xf32> to vector<8x128xf32>
    %506 = arith.negf %505 : vector<8x128xf32>
    %507 = math.exp %506 : vector<8x128xf32>
    %cst_129 = arith.constant 1.000000e+00 : f32
    %508 = vector.broadcast %cst_129 : f32 to vector<8x128xf32>
    %509 = arith.addf %508, %507 : vector<8x128xf32>
    %510 = arith.divf %508, %509 : vector<8x128xf32>
    %511 = vector.extract_strided_slice %504 {offsets = [0, 128], sizes = [8, 128], strides = [1, 1]} : vector<8x512xf32> to vector<8x128xf32>
    %512 = arith.negf %511 : vector<8x128xf32>
    %513 = math.exp %512 : vector<8x128xf32>
    %cst_130 = arith.constant 1.000000e+00 : f32
    %514 = vector.broadcast %cst_130 : f32 to vector<8x128xf32>
    %515 = arith.addf %514, %513 : vector<8x128xf32>
    %516 = arith.divf %514, %515 : vector<8x128xf32>
    %517 = vector.extract_strided_slice %504 {offsets = [0, 256], sizes = [8, 128], strides = [1, 1]} : vector<8x512xf32> to vector<8x128xf32>
    %518 = math.tanh %517 : vector<8x128xf32>
    %519 = vector.extract_strided_slice %504 {offsets = [0, 384], sizes = [8, 128], strides = [1, 1]} : vector<8x512xf32> to vector<8x128xf32>
    %520 = arith.negf %519 : vector<8x128xf32>
    %521 = math.exp %520 : vector<8x128xf32>
    %cst_131 = arith.constant 1.000000e+00 : f32
    %522 = vector.broadcast %cst_131 : f32 to vector<8x128xf32>
    %523 = arith.addf %522, %521 : vector<8x128xf32>
    %524 = arith.divf %522, %523 : vector<8x128xf32>
    %525 = arith.mulf %516, %496 : vector<8x128xf32>
    %526 = arith.mulf %510, %518 : vector<8x128xf32>
    %527 = arith.addf %525, %526 : vector<8x128xf32>
    %528 = math.tanh %527 : vector<8x128xf32>
    %529 = arith.mulf %524, %528 : vector<8x128xf32>
    %c8_i32_132 = arith.constant 8 : i32
    %cst_133 = arith.constant 0.000000e+00 : f32
    %530 = vector.broadcast %cst_133 : f32 to vector<8x128xf32>
    %531 = arith.maximumf %529, %530 : vector<8x128xf32>
    %c0_134 = arith.constant 0 : index
    %c0_135 = arith.constant 0 : index
    %532 = vector.load %arg5[%c0_134, %c0_135] : memref<128x128xf32, #tpu.memory_space<vmem>>, vector<128x128xf32>
    %cst_136 = arith.constant dense<0.000000e+00> : vector<8x128xf32>
    %533 = tpu.matmul %531, %532, %cst_136 {dimension_numbers = #tpu.dot_dimension_numbers<[1], [0], [0], [1], [0, 0, 1, 1], [], []>} : vector<8x128xf32>, vector<128x128xf32>, vector<8x128xf32> -> vector<8x128xf32>
    %c0_137 = arith.constant 0 : index
    %c0_138 = arith.constant 0 : index
    %534 = vector.load %arg6[%c0_137, %c0_138] : memref<1x128xf32, #tpu.memory_space<vmem>>, vector<1x128xf32>
    %535 = vector.broadcast %534 : vector<1x128xf32> to vector<8x128xf32>
    %536 = arith.addf %533, %535 : vector<8x128xf32>
    %cst_139 = arith.constant 0.000000e+00 : f32
    %537 = vector.broadcast %cst_139 : f32 to vector<8x128xf32>
    %538 = arith.maximumf %536, %537 : vector<8x128xf32>
    %c0_140 = arith.constant 0 : index
    %c0_141 = arith.constant 0 : index
    %539 = vector.load %arg7[%c0_140, %c0_141] : memref<128x128xf32, #tpu.memory_space<vmem>>, vector<128x128xf32>
    %cst_142 = arith.constant dense<0.000000e+00> : vector<8x128xf32>
    %540 = tpu.matmul %538, %539, %cst_142 {dimension_numbers = #tpu.dot_dimension_numbers<[1], [0], [0], [1], [0, 0, 1, 1], [], []>} : vector<8x128xf32>, vector<128x128xf32>, vector<8x128xf32> -> vector<8x128xf32>
    %c0_143 = arith.constant 0 : index
    %c0_144 = arith.constant 0 : index
    %541 = vector.load %arg8[%c0_143, %c0_144] : memref<1x128xf32, #tpu.memory_space<vmem>>, vector<1x128xf32>
    %542 = vector.broadcast %541 : vector<1x128xf32> to vector<8x128xf32>
    %543 = arith.addf %540, %542 : vector<8x128xf32>
    %c0_145 = arith.constant 0 : index
    %c0_146 = arith.constant 0 : index
    %544 = vector.load %arg9[%c0_145, %c0_146] : memref<8x128xf32, #tpu.memory_space<vmem>>, vector<8x128xf32>
    tpu.vector_store %arg9[%c0_145, %c0_146], %543 {strides = array<i32>} : memref<8x128xf32, #tpu.memory_space<vmem>>, vector<8x128xf32>,
    return
  }
}

</mosaic_0001>

<bundles_post_ra>
// kernel: predictor_forward.1
= control target key start
LH: loop header
LB: loop body
LE: loop exit
PB: predicated region body
PF: predicated region fallthrough
CT: control target
= control target key end

     0   :  { %14 = vsyncpa [#allocation5], 0  ;;  %s6336_s0 = inlined_call_operand.vmem [shape: f32[8,8,512], index: 0, kind: input, shape index: {}]   ;;  %s6337_s1 = inlined_call_operand.hbm [shape: f32[128,512], index: 1, kind: input, shape index: {}]   ;;  %s6338_s2 = inlined_call_operand.hbm [shape: f32[128,512], index: 2, kind: input, shape index: {}]   ;;  %s6339_s3 = inlined_call_operand.vmem [shape: f32[1,512], index: 3, kind: input, shape index: {}]   ;;  %s6340_s4 = inlined_call_operand.hbm [shape: f32[128,512], index: 4, kind: input, shape index: {}]   ;;  %s6341_s5 = inlined_call_operand.vmem [shape: f32[128,128], index: 5, kind: input, shape index: {}]   ;;  %s6342_s6 = inlined_call_operand.vmem [shape: f32[1,128], index: 6, kind: input, shape index: {}]   ;;  %s6343_s7 = inlined_call_operand.vmem [shape: f32[128,128], index: 7, kind: input, shape index: {}]   ;;  %s6344_s8 = inlined_call_operand.vmem [shape: f32[1,128], index: 8, kind: input, shape index: {}]   ;;  %s6345_s9 = inlined_call_operand.vmem [shape: f32[8,128], index: 9, kind: output, shape index: {}]  }
   0x1   :  { %15 = vsyncpa [#allocation7], 0  ;;  %s4222_s30 = smov [#allocation6]   ;;  %s4223_s11 = smov [#allocation4]  }
   0x2   :  { %s35_s10 = sshll.u32 %s4222_s30, 4  ;;  %s23_s12 = sshll.u32 %s4223_s11, 4  ;;  %s36_s10 = int_to_ptr.vmem [resolvable:$true] %s35_s10  ;;  %s24_s12 = int_to_ptr.vmem [resolvable:$true] %s23_s12 }
   0x3   :  { %s4166_s13 = scalar_lea.vmem %s36_s10, 8192  ;;  %p4171_p1 = scmp.lt.s32.totalorder %s36_s10, %s36_s10 }
   0x4   :  { %p4167_p0 = scmp.ne.s32.totalorder %s36_s10, %s4166_s13  ;;  %p4172_p2 = scmp.lt.s32.totalorder %s4166_s13, %s4166_s13 }
   0x6   :  { %p4173_p3 = por %p4172_p2, %p4171_p1 }
   0x8   :  { %p4174_p4 = pnand %p4173_p3, %p4167_p0 }
   0xa   :  { %4177 = shalt.err (!%p4174_p4)
}
   0xb   :  { %s4224_s14 = smov 512   ;;  %s4225_s15 = smov 32  }
   0xc   :  { %41 = dma.hbm_to_vmem [thread:$0]  %s6338_s2, 8192, %s36_s10, [#allocation7], %s4224_s14, %s4224_s14, %s4225_s15  }
   0xd   :  { %s4186_s18 = scalar_lea.vmem %s24_s12, 8192  ;;  %p4191_p6 = scmp.lt.s32.totalorder %s24_s12, %s24_s12 }
   0xe   :  { %p4187_p5 = scmp.ne.s32.totalorder %s24_s12, %s4186_s18  ;;  %p4192_p7 = scmp.lt.s32.totalorder %s4186_s18, %s4186_s18 }
  0x10   :  { %p4193_p8 = por %p4192_p7, %p4191_p6 }
  0x12   :  { %p4194_p9 = pnand %p4193_p8, %p4187_p5 }
  0x14   :  { %4197 = shalt.err (!%p4194_p9)
}
  0x15   :  { %29 = dma.hbm_to_vmem [thread:$0]  %s6337_s1, 8192, %s24_s12, [#allocation5], %s4224_s14, %s4224_s14, %s4225_s15  }
  0x16   :  { %s4226_s21 = smov [#allocation8]  }
  0x17   :  { %s49_s22 = sshll.u32 %s4226_s21, 4  ;;  %s50_s22 = int_to_ptr.vmem [resolvable:$true] %s49_s22 }
  0x18   :  { %s4206_s23 = scalar_lea.vmem %s50_s22, 8192  ;;  %p4211_p11 = scmp.lt.s32.totalorder %s50_s22, %s50_s22 }
  0x19   :  { %p4207_p10 = scmp.ne.s32.totalorder %s50_s22, %s4206_s23  ;;  %p4212_p12 = scmp.lt.s32.totalorder %s4206_s23, %s4206_s23 }
  0x1b   :  { %p4213_p13 = por %p4212_p12, %p4211_p11 }
  0x1d   :  { %p4214_p0 = pnand %p4213_p13, %p4207_p10 }
  0x1f   :  { %4217 = shalt.err (!%p4214_p0)
}
  0x20   :  { %55 = dma.hbm_to_vmem [thread:$0]  %s6340_s4, 8192, %s50_s22, [#allocation7], %s4224_s14, %s4224_s14, %s4225_s15  }
  0x21   :  { %4218 = dma.done.wait [#allocation5], 8192  }
  0x22   :  { %4219 = vsyncadd [#allocation5], 4294959104 }
  0x23   :  { %4220 = dma.done.wait [#allocation7], 16384  }
  0x24   :  { %4221 = vsyncadd [#allocation7], 4294950912  ;;  %v6348_v0 = vmov 0.0   ;;  %v4290_v1 = vld [vmem:[#allocation4 + $0x1e8] sm:$0xff]  ;;  %v4292_v2 = vld [vmem:[#allocation4 + $0x1e0] sm:$0xff]  ;;  %vm4228_vm0 = vmmov 0  }
  0x25   :  { %205 = vmatprep.mubr.f32.mxu0 %v6348_v0  ;;  %276 = vmatprep.mubr.f32.mxu1 %v6348_v0  ;;  %6522 = vst [vmem:[#allocation11_spill] sm:$0xff] %v4290_v1  ;;  %v4294_v3 = vld [vmem:[#allocation4 + $0x1c8] sm:$0xff]  ;;  %v4297_v4 = vld [vmem:[#allocation4 + $0x1c0] sm:$0xff]  ;;  %v4311_v9 = vld [vmem:[#allocation4 + $0x1f8] sm:$0xff] }
  0x26   :  { %141 = vmatprep.subr.mxu0 %v4290_v1  ;;  %v4300_v5 = vld [vmem:[#allocation4 + $0x1a8] sm:$0xff]  ;;  %v4303_v6 = vld [vmem:[#allocation4 + $0x1a0] sm:$0xff]  ;;  %6523 = vst [vmem:[#allocation12_spill] sm:$0xff] %v4311_v9  ;;  %212 = vmatprep.subr.mxu1 %v4311_v9  ;;  %v4317_v11 = vld [vmem:[#allocation4 + $0x1f0] sm:$0xff] }
  0x27   :  { %142 = vmatpush1.msra.mxu0 %v4292_v2  ;;  %v4306_v7 = vld [vmem:[#allocation4 + $0x188] sm:$0xff]  ;;  %v4309_v8 = vld [vmem:[#allocation4 + $0x180] sm:$0xff]  ;;  %213 = vmatpush1.msra.mxu1 %v4317_v11  ;;  %v4323_v13 = vld [vmem:[#allocation4 + $0x1d8] sm:$0xff] }
  0x28   :  { %143 = vmatprep.subr.mxu0 %v4294_v3  ;;  %v4314_v10 = vld [vmem:[#allocation4 + $0x168] sm:$0xff]  ;;  %v4320_v12 = vld [vmem:[#allocation4 + $0x160] sm:$0xff]  ;;  %v4325_v14 = vld [vmem:[#allocation4 + $0x1d0] sm:$0xff]  ;;  %214 = vmatprep.subr.mxu1 %v4323_v13 }
  0x29   :  { %144 = vmatpush1.msra.mxu0 %v4297_v4  ;;  %v4328_v15 = vld [vmem:[#allocation4 + $0x148] sm:$0xff]  ;;  %v4331_v16 = vld [vmem:[#allocation4 + $0x1b8] sm:$0xff]  ;;  %v4334_v17 = vld [vmem:[#allocation4 + $0x140] sm:$0xff]  ;;  %215 = vmatpush1.msra.mxu1 %v4325_v14 }
  0x2a   :  { %145 = vmatprep.subr.mxu0 %v4300_v5  ;;  %v4337_v18 = vld [vmem:[#allocation4 + $0x1b0] sm:$0xff]  ;;  %v4339_v19 = vld [vmem:[#allocation4 + $0x198] sm:$0xff]  ;;  %v4342_v20 = vld [vmem:[#allocation4 + $0x128] sm:$0xff]  ;;  %216 = vmatprep.subr.mxu1 %v4331_v16 }
  0x2b   :  { %146 = vmatpush1.msra.mxu0 %v4303_v6  ;;  %v4345_v21 = vld [vmem:[#allocation4 + $0x190] sm:$0xff]  ;;  %v4348_v22 = vld [vmem:[#allocation4 + $0x120] sm:$0xff]  ;;  %217 = vmatpush1.msra.mxu1 %v4337_v18  ;;  %v4351_v23 = vld [vmem:[#allocation4 + $0x178] sm:$0xff] }
  0x2c   :  { %147 = vmatprep.subr.mxu0 %v4306_v7  ;;  %v4354_v24 = vld [vmem:[#allocation4 + $0x108] sm:$0xff]  ;;  %218 = vmatprep.subr.mxu1 %v4339_v19  ;;  %v4357_v25 = vld [vmem:[#allocation4 + $0x170] sm:$0xff]  ;;  %v4360_v26 = vld [vmem:[#allocation4 + $0x100] sm:$0xff] }
  0x2d   :  { %148 = vmatpush1.msra.mxu0 %v4309_v8  ;;  %219 = vmatpush1.msra.mxu1 %v4345_v21  ;;  %v4363_v27 = vld [vmem:[#allocation4 + $0x158] sm:$0xff]  ;;  %v4366_v28 = vld [vmem:[#allocation4 + $0xe8] sm:$0xff]  ;;  %v4369_v29 = vld [vmem:[#allocation4 + $0x150] sm:$0xff] }
  0x2e   :  { %149 = vmatprep.subr.mxu0 %v4314_v10  ;;  %220 = vmatprep.subr.mxu1 %v4351_v23  ;;  %v4372_v30 = vld [vmem:[#allocation4 + $0xe0] sm:$0xff]  ;;  %v4375_v31 = vld [vmem:[#allocation4 + $0x138] sm:$0xff]  ;;  %v4378_v32 = vld [vmem:[#allocation4 + $0xc8] sm:$0xff] }
  0x2f   :  { %150 = vmatpush1.msra.mxu0 %v4320_v12  ;;  %221 = vmatpush1.msra.mxu1 %v4357_v25  ;;  %v4381_v33 = vld [vmem:[#allocation4 + $0x130] sm:$0xff]  ;;  %v4384_v34 = vld [vmem:[#allocation4 + $0xc0] sm:$0xff]  ;;  %v4387_v35 = vld [vmem:[#allocation4 + $0x118] sm:$0xff] }
  0x30   :  { %151 = vmatprep.subr.mxu0 %v4328_v15  ;;  %222 = vmatprep.subr.mxu1 %v4363_v27  ;;  %v4390_v36 = vld [vmem:[#allocation4 + $0xa8] sm:$0xff]  ;;  %v4393_v37 = vld [vmem:[#allocation4 + $0x110] sm:$0xff]  ;;  %v4396_v38 = vld [vmem:[#allocation4 + $0xa0] sm:$0xff] }
  0x31   :  { %152 = vmatpush1.msra.mxu0 %v4334_v17  ;;  %223 = vmatpush1.msra.mxu1 %v4369_v29  ;;  %v4399_v39 = vld [vmem:[#allocation4 + $0xf8] sm:$0xff]  ;;  %v4402_v40 = vld [vmem:[#allocation4 + $0x88] sm:$0xff]  ;;  %v4405_v41 = vld [vmem:[#allocation4 + $0xf0] sm:$0xff] }
  0x32   :  { %153 = vmatprep.subr.mxu0 %v4342_v20  ;;  %224 = vmatprep.subr.mxu1 %v4375_v31  ;;  %v4408_v42 = vld [vmem:[#allocation4 + $0x80] sm:$0xff]  ;;  %v4411_v43 = vld [vmem:[#allocation4 + $0xd8] sm:$0xff]  ;;  %v4414_v44 = vld [vmem:[#allocation4 + $0x68] sm:$0xff] }
  0x33   :  { %154 = vmatpush1.msra.mxu0 %v4348_v22  ;;  %225 = vmatpush1.msra.mxu1 %v4381_v33  ;;  %6524 = vst [vmem:[#allocation13_spill] sm:$0xff] %v4414_v44  ;;  %v4417_v45 = vld [vmem:[#allocation4 + $0xd0] sm:$0xff]  ;;  %v4420_v46 = vld [vmem:[#allocation4 + $0x60] sm:$0xff]  ;;  %v4423_v47 = vld [vmem:[#allocation4 + $0xb8] sm:$0xff] }
  0x34   :  { %155 = vmatprep.subr.mxu0 %v4354_v24  ;;  %226 = vmatprep.subr.mxu1 %v4387_v35  ;;  %6525 = vst [vmem:[#allocation14_spill] sm:$0xff] %v4420_v46  ;;  %v4426_v48 = vld [vmem:[#allocation4 + $0x48] sm:$0xff]  ;;  %v4429_v49 = vld [vmem:[#allocation4 + $0xb0] sm:$0xff]  ;;  %v4432_v50 = vld [vmem:[#allocation4 + $0x40] sm:$0xff] }
  0x35   :  { %156 = vmatpush1.msra.mxu0 %v4360_v26  ;;  %227 = vmatpush1.msra.mxu1 %v4393_v37  ;;  %6526 = vst [vmem:[#allocation15_spill] sm:$0xff] %v4426_v48  ;;  %6527 = vst [vmem:[#allocation16_spill] sm:$0xff] %v4432_v50  ;;  %v4435_v51 = vld [vmem:[#allocation4 + $0x98] sm:$0xff]  ;;  %v4438_v52 = vld [vmem:[#allocation4 + $0x28] sm:$0xff] }
  0x36   :  { %157 = vmatprep.subr.mxu0 %v4366_v28  ;;  %228 = vmatprep.subr.mxu1 %v4399_v39  ;;  %6528 = vst [vmem:[#allocation17_spill] sm:$0xff] %v4438_v52  ;;  %v4441_v53 = vld [vmem:[#allocation4 + $0x90] sm:$0xff]  ;;  %v4444_v54 = vld [vmem:[#allocation4 + $0x20] sm:$0xff]  ;;  %v4447_v55 = vld [vmem:[#allocation4 + $0x78] sm:$0xff] }
  0x37   :  { %158 = vmatpush1.msra.mxu0 %v4372_v30  ;;  %229 = vmatpush1.msra.mxu1 %v4405_v41  ;;  %6529 = vst [vmem:[#allocation18_spill] sm:$0xff] %v4441_v53  ;;  %6530 = vst [vmem:[#allocation19_spill] sm:$0xff] %v4444_v54  ;;  %v4450_v56 = vld [vmem:[#allocation4 + $0x8] sm:$0xff]  ;;  %v4453_v57 = vld [vmem:[#allocation4 + $0x70] sm:$0xff] }
  0x38   :  { %159 = vmatprep.subr.mxu0 %v4378_v32  ;;  %230 = vmatprep.subr.mxu1 %v4411_v43  ;;  %6531 = vst [vmem:[#allocation20_spill] sm:$0xff] %v4447_v55  ;;  %6532 = vst [vmem:[#allocation21_spill] sm:$0xff] %v4450_v56  ;;  %v4456_v58 = vld [vmem:[#allocation4] sm:$0xff]  ;;  %v4459_v59 = vld [vmem:[#allocation4 + $0x58] sm:$0xff] }
  0x39   :  { %160 = vmatpush1.msra.mxu0 %v4384_v34  ;;  %231 = vmatpush1.msra.mxu1 %v4417_v45  ;;  %6533 = vst [vmem:[#allocation22_spill] sm:$0xff] %v4453_v57  ;;  %6534 = vst [vmem:[#allocation23_spill] sm:$0xff] %v4456_v58  ;;  %v4463_v60 = vld [vmem:[#allocation4 + $0x50] sm:$0xff]  ;;  %v4467_v61 = vld [vmem:[#allocation4 + $0x38] sm:$0xff] }
  0x3a   :  { %161 = vmatprep.subr.mxu0 %v4390_v36  ;;  %232 = vmatprep.subr.mxu1 %v4423_v47  ;;  %6535 = vst [vmem:[#allocation24_spill] sm:$0xff] %v4459_v59  ;;  %6536 = vst [vmem:[#allocation25_spill] sm:$0xff] %v4463_v60  ;;  %v4471_v62 = vld [vmem:[#allocation4 + $0x30] sm:$0xff]  ;;  %v4475_v63 = vld [vmem:[#allocation4 + $0x18] sm:$0xff] }
  0x3b   :  { %162 = vmatpush1.msra.mxu0 %v4396_v38  ;;  %233 = vmatpush1.msra.mxu1 %v4429_v49  ;;  %6537 = vst [vmem:[#allocation26_spill] sm:$0xff] %v4467_v61  ;;  %6538 = vst [vmem:[#allocation27_spill] sm:$0xff] %v4471_v62 }
  0x3c   :  { %163 = vmatprep.subr.mxu0 %v4402_v40  ;;  %234 = vmatprep.subr.mxu1 %v4435_v51  ;;  %6539 = vst [vmem:[#allocation28_spill] sm:$0xff] %v4475_v63 }
  0x3d   :  { %164 = vmatpush1.msra.mxu0 %v4408_v42  ;;  %235 = vmatpush1.msra.mxu1 %v4441_v53 }
  0x3e   :  { %165 = vmatprep.subr.mxu0 %v4414_v44  ;;  %236 = vmatprep.subr.mxu1 %v4447_v55 }
  0x3f   :  { %166 = vmatpush1.msra.mxu0 %v4420_v46  ;;  %237 = vmatpush1.msra.mxu1 %v4453_v57 }
  0x40   :  { %167 = vmatprep.subr.mxu0 %v4426_v48  ;;  %238 = vmatprep.subr.mxu1 %v4459_v59 }
  0x41   :  { %168 = vmatpush1.msra.mxu0 %v4432_v50  ;;  %239 = vmatpush1.msra.mxu1 %v4463_v60 }
  0x42   :  { %169 = vmatprep.subr.mxu0 %v4438_v52  ;;  %240 = vmatprep.subr.mxu1 %v4467_v61 }
  0x43   :  { %170 = vmatpush1.msra.mxu0 %v4444_v54  ;;  %v4478_v54 = vld [vmem:[#allocation4 + $0x10] sm:$0xff]  ;;  %241 = vmatpush1.msra.mxu1 %v4471_v62 }
  0x44   :  { %171 = vmatprep.subr.mxu0 %v4450_v56  ;;  %6540 = vst [vmem:[#allocation29_spill] sm:$0xff] %v4478_v54  ;;  %242 = vmatprep.subr.mxu1 %v4475_v63 }
  0x45   :  { %172 = vmatpush1.msra.mxu0 %v4456_v58  ;;  %243 = vmatpush1.msra.mxu1 %v4478_v54 }
  0x46   :  { %206 = vmatmul.mubr.f32.vlgmr.msra.gmra.mxu0 %v6348_v0  ;;  %317 = vmatprep.subr.mxu0 %v4290_v1 }
  0x47   :  { %318 = vmatpush1.msra.mxu0 %v4292_v2  ;;  %277 = vmatmul.mubr.f32.vlgmr.msra.gmra.mxu1 %v6348_v0  ;;  %v6541_v0 = vld [vmem:[#allocation19_spill] sm:$0xff] }
  0x48   :  { %319 = vmatprep.subr.mxu0 %v4294_v3  ;;  %388 = vmatprep.subr.mxu1 %v4311_v9 }
  0x49   :  { %320 = vmatpush1.msra.mxu0 %v4297_v4  ;;  %389 = vmatpush1.msra.mxu1 %v4317_v11 }
  0x4a   :  { %321 = vmatprep.subr.mxu0 %v4300_v5  ;;  %390 = vmatprep.subr.mxu1 %v4323_v13 }
  0x4b   :  { %322 = vmatpush1.msra.mxu0 %v4303_v6  ;;  %391 = vmatpush1.msra.mxu1 %v4325_v14 }
  0x4c   :  { %323 = vmatprep.subr.mxu0 %v4306_v7  ;;  %392 = vmatprep.subr.mxu1 %v4331_v16 }
  0x4d   :  { %324 = vmatpush1.msra.mxu0 %v4309_v8  ;;  %393 = vmatpush1.msra.mxu1 %v4337_v18 }
  0x4e   :  { %325 = vmatprep.subr.mxu0 %v4314_v10  ;;  %394 = vmatprep.subr.mxu1 %v4339_v19 }
  0x4f   :  { %326 = vmatpush1.msra.mxu0 %v4320_v12  ;;  %395 = vmatpush1.msra.mxu1 %v4345_v21 }
  0x50   :  { %327 = vmatprep.subr.mxu0 %v4328_v15  ;;  %396 = vmatprep.subr.mxu1 %v4351_v23 }
  0x51   :  { %328 = vmatpush1.msra.mxu0 %v4334_v17  ;;  %397 = vmatpush1.msra.mxu1 %v4357_v25 }
  0x52   :  { %329 = vmatprep.subr.mxu0 %v4342_v20  ;;  %398 = vmatprep.subr.mxu1 %v4363_v27 }
  0x53   :  { %330 = vmatpush1.msra.mxu0 %v4348_v22  ;;  %399 = vmatpush1.msra.mxu1 %v4369_v29 }
  0x54   :  { %331 = vmatprep.subr.mxu0 %v4354_v24  ;;  %400 = vmatprep.subr.mxu1 %v4375_v31 }
  0x55   :  { %332 = vmatpush1.msra.mxu0 %v4360_v26  ;;  %401 = vmatpush1.msra.mxu1 %v4381_v33 }
  0x56   :  { %333 = vmatprep.subr.mxu0 %v4366_v28  ;;  %402 = vmatprep.subr.mxu1 %v4387_v35 }
  0x57   :  { %334 = vmatpush1.msra.mxu0 %v4372_v30  ;;  %403 = vmatpush1.msra.mxu1 %v4393_v37 }
  0x58   :  { %335 = vmatprep.subr.mxu0 %v4378_v32  ;;  %404 = vmatprep.subr.mxu1 %v4399_v39 }
  0x59   :  { %336 = vmatpush1.msra.mxu0 %v4384_v34  ;;  %405 = vmatpush1.msra.mxu1 %v4405_v41 }
  0x5a   :  { %337 = vmatprep.subr.mxu0 %v4390_v36  ;;  %406 = vmatprep.subr.mxu1 %v4411_v43 }
  0x5b   :  { %338 = vmatpush1.msra.mxu0 %v4396_v38  ;;  %407 = vmatpush1.msra.mxu1 %v4417_v45 }
  0x5c   :  { %339 = vmatprep.subr.mxu0 %v4402_v40  ;;  %408 = vmatprep.subr.mxu1 %v4423_v47 }
  0x5d   :  { %340 = vmatpush1.msra.mxu0 %v4408_v42  ;;  %409 = vmatpush1.msra.mxu1 %v4429_v49 }
  0x5e   :  { %341 = vmatprep.subr.mxu0 %v4414_v44  ;;  %410 = vmatprep.subr.mxu1 %v4435_v51 }
  0x5f   :  { %342 = vmatpush1.msra.mxu0 %v4420_v46  ;;  %411 = vmatpush1.msra.mxu1 %v4441_v53 }
  0x60   :  { %343 = vmatprep.subr.mxu0 %v4426_v48  ;;  %412 = vmatprep.subr.mxu1 %v4447_v55  ;;  %v6542_v48 = vmov 0.0  }
  0x61   :  { %344 = vmatpush1.msra.mxu0 %v4432_v50  ;;  %413 = vmatpush1.msra.mxu1 %v4453_v57 }
  0x62   :  { %345 = vmatprep.subr.mxu0 %v4438_v52  ;;  %414 = vmatprep.subr.mxu1 %v4459_v59 }
  0x63   :  { %346 = vmatpush1.msra.mxu0 %v6541_v0  ;;  %415 = vmatpush1.msra.mxu1 %v4463_v60  ;;  %v139_v60 = vld [vmem:[%s6336_s0 + $0x10] sm:$0xff] }
  0x64   :  { %347 = vmatprep.subr.mxu0 %v4450_v56  ;;  %416 = vmatprep.subr.mxu1 %v4467_v61  ;;  %v137_v56 = vld [vmem:[%s6336_s0] sm:$0xff] }
  0x65   :  { %348 = vmatpush1.msra.mxu0 %v4456_v58  ;;  %417 = vmatpush1.msra.mxu1 %v4471_v62  ;;  %v138_v58 = vld [vmem:[%s6336_s0 + $0x8] sm:$0xff] }
  0x66   :  { %381 = vmatprep.mubr.f32.mxu0 %v6542_v48  ;;  %418 = vmatprep.subr.mxu1 %v4475_v63 }
  0x67   :  { %452 = vmatprep.mubr.f32.mxu1 %v6542_v48  ;;  %419 = vmatpush1.msra.mxu1 %v4478_v54 }
  0x68   :  { %494 = vmatprep.subr.mxu0 %v4290_v1  ;;  %565 = vmatprep.subr.mxu1 %v4311_v9  ;;  %v140_v9 = vld [vmem:[%s6336_s0 + $0x18] sm:$0xff] }
 0x106   :  { %v207_v0 = vpop.f32.mrf.mxu0 }
 0x107   :  { %v283_v62 = vadd.f32 %v207_v0, %v137_v56  ;;  %v278_v54 = vpop.f32.mrf.mxu1 }
 0x108   :  { %v209_v61 = vpop.f32.mrf.mxu0  ;;  %v285_v59 = vadd.f32 %v278_v54, %v139_v60  ;;  %v6546_v54 = vld [vmem:[#allocation20_spill] sm:$0xff] }
 0x109   :  { %v3585_v63 = vmul.f32 -1.442695, %v283_v62  ;;  %v284_v52 = vadd.f32 %v209_v61, %v138_v58  ;;  %v280_v1 = vpop.f32.mrf.mxu1  ;;  %v6550_v60 = vld [vmem:[#allocation24_spill] sm:$0xff] }
 0x10a   :  { %v286_v50 = vadd.f32 %v280_v1, %v140_v9 }
 0x10b   :  { %3774 = vpow2.f32 %v3585_v63  ;;  %v3586_v48 = vmul.f32 -1.442695, %v284_v52 }
 0x10c   :  { %v3587_v57 = vmul.f32 -1.442695, %v286_v50 }
 0x10d   :  { %3776 = vpow2.f32 %v3586_v48 }
 0x10e   :  { %3778 = vtanh.f32 %v285_v59  ;;  %v6549_v59 = vld [vmem:[#allocation15_spill] sm:$0xff] }
 0x10f   :  { %3780 = vpow2.f32 %v3587_v57  ;;  %v6548_v57 = vld [vmem:[#allocation22_spill] sm:$0xff] }
 0x118   :  { %v3775_v0 = vpop.eup %3774 }
 0x119   :  { %v290_v56 = vadd.f32 1.0, %v3775_v0  ;;  %v6551_v0 = vld [vmem:[#allocation16_spill] sm:$0xff] }
 0x11a   :  { %v3777_v58 = vpop.eup %3776 }
 0x11b   :  { %3782 = vrcp.f32 %v290_v56  ;;  %v296_v52 = vadd.f32 1.0, %v3777_v58  ;;  %v3779_v48 = vpop.eup %3778  ;;  %v6552_v56 = vld [vmem:[#allocation25_spill] sm:$0xff] }
 0x11c   :  { %v3781_v61 = vpop.eup %3780  ;;  %v6553_v58 = vld [vmem:[#allocation17_spill] sm:$0xff] }
 0x11d   :  { %3784 = vrcp.f32 %v296_v52  ;;  %v303_v46 = vadd.f32 1.0, %v3781_v61  ;;  %v6554_v52 = vld [vmem:[#allocation26_spill] sm:$0xff]  ;;  %v6556_v61 = vld [vmem:[#allocation27_spill] sm:$0xff] }
 0x11f   :  { %3786 = vrcp.f32 %v303_v46  ;;  %v6545_v46 = vld [vmem:[#allocation13_spill] sm:$0xff] }
 0x128   :  { %v3783_v62 = vpop.eup %3782 }
 0x129   :  { %v307_v44 = vmul.f32 %v3783_v62, %v3779_v48  ;;  %v6555_v48 = vld [vmem:[#allocation19_spill] sm:$0xff]  ;;  %v6557_v62 = vld [vmem:[#allocation21_spill] sm:$0xff] }
 0x12a   :  { %v3785_v63 = vpop.eup %3784 }
 0x12b   :  { %v306_v55 = vmul.f32 0.0, %v3785_v63  ;;  %v6558_v63 = vld [vmem:[#allocation28_spill] sm:$0xff] }
 0x12c   :  { %v3787_v1 = vpop.eup %3786 }
 0x12d   :  { %v4564_v53 = vadd.f32 %v307_v44, %v306_v55  ;;  %v6544_v44 = vld [vmem:[#allocation18_spill] sm:$0xff] }
 0x12e   :  { %v6547_v55 = vld [vmem:[#allocation14_spill] sm:$0xff] }
 0x12f   :  { %3788 = vtanh.f32 %v4564_v53 }
 0x13c   :  { %v3789_v9 = vpop.eup %3788 }
 0x13d   :  { %v4567_v50 = vmul.f32 %v3789_v9, %v3787_v1  ;;  %v6559_v1 = vld [vmem:[#allocation23_spill] sm:$0xff]  ;;  %v6560_v9 = vmov 0.0  }
 0x13f   :  { %6543 = vst [vmem:[#allocation30_spill] sm:$0xff] %v4567_v50  ;;  %382 = vmatmul.mubr.f32.vlgmr.msra.gmra.mxu0 %v4567_v50  ;;  %453 = vmatmul.mubr.f32.vlgmr.msra.gmra.mxu1 %v4567_v50  ;;  %v6561_v50 = vld [vmem:[#allocation29_spill] sm:$0xff] }
 0x140   :  { %495 = vmatpush1.msra.mxu0 %v4292_v2  ;;  %566 = vmatpush1.msra.mxu1 %v4317_v11 }
 0x141   :  { %496 = vmatprep.subr.mxu0 %v4294_v3  ;;  %567 = vmatprep.subr.mxu1 %v4323_v13 }
 0x142   :  { %497 = vmatpush1.msra.mxu0 %v4297_v4  ;;  %568 = vmatpush1.msra.mxu1 %v4325_v14 }
 0x143   :  { %498 = vmatprep.subr.mxu0 %v4300_v5  ;;  %569 = vmatprep.subr.mxu1 %v4331_v16 }
 0x144   :  { %499 = vmatpush1.msra.mxu0 %v4303_v6  ;;  %570 = vmatpush1.msra.mxu1 %v4337_v18 }
 0x145   :  { %500 = vmatprep.subr.mxu0 %v4306_v7  ;;  %571 = vmatprep.subr.mxu1 %v4339_v19 }
 0x146   :  { %501 = vmatpush1.msra.mxu0 %v4309_v8  ;;  %572 = vmatpush1.msra.mxu1 %v4345_v21 }
 0x147   :  { %502 = vmatprep.subr.mxu0 %v4314_v10  ;;  %573 = vmatprep.subr.mxu1 %v4351_v23 }
 0x148   :  { %503 = vmatpush1.msra.mxu0 %v4320_v12  ;;  %574 = vmatpush1.msra.mxu1 %v4357_v25 }
 0x149   :  { %504 = vmatprep.subr.mxu0 %v4328_v15  ;;  %575 = vmatprep.subr.mxu1 %v4363_v27 }
 0x14a   :  { %505 = vmatpush1.msra.mxu0 %v4334_v17  ;;  %576 = vmatpush1.msra.mxu1 %v4369_v29 }
 0x14b   :  { %506 = vmatprep.subr.mxu0 %v4342_v20  ;;  %577 = vmatprep.subr.mxu1 %v4375_v31 }
 0x14c   :  { %507 = vmatpush1.msra.mxu0 %v4348_v22  ;;  %578 = vmatpush1.msra.mxu1 %v4381_v33 }
 0x14d   :  { %508 = vmatprep.subr.mxu0 %v4354_v24  ;;  %579 = vmatprep.subr.mxu1 %v4387_v35 }
 0x14e   :  { %509 = vmatpush1.msra.mxu0 %v4360_v26  ;;  %580 = vmatpush1.msra.mxu1 %v4393_v37 }
 0x14f   :  { %510 = vmatprep.subr.mxu0 %v4366_v28  ;;  %581 = vmatprep.subr.mxu1 %v4399_v39 }
 0x150   :  { %511 = vmatpush1.msra.mxu0 %v4372_v30  ;;  %582 = vmatpush1.msra.mxu1 %v4405_v41 }
 0x151   :  { %512 = vmatprep.subr.mxu0 %v4378_v32  ;;  %583 = vmatprep.subr.mxu1 %v4411_v43 }
 0x152   :  { %513 = vmatpush1.msra.mxu0 %v4384_v34  ;;  %584 = vmatpush1.msra.mxu1 %v4417_v45 }
 0x153   :  { %514 = vmatprep.subr.mxu0 %v4390_v36  ;;  %585 = vmatprep.subr.mxu1 %v4423_v47 }
 0x154   :  { %515 = vmatpush1.msra.mxu0 %v4396_v38  ;;  %586 = vmatpush1.msra.mxu1 %v4429_v49 }
 0x155   :  { %516 = vmatprep.subr.mxu0 %v4402_v40  ;;  %587 = vmatprep.subr.mxu1 %v4435_v51 }
 0x156   :  { %517 = vmatpush1.msra.mxu0 %v4408_v42  ;;  %588 = vmatpush1.msra.mxu1 %v6544_v44 }
 0x157   :  { %518 = vmatprep.subr.mxu0 %v6545_v46  ;;  %589 = vmatprep.subr.mxu1 %v6546_v54 }
 0x158   :  { %519 = vmatpush1.msra.mxu0 %v6547_v55  ;;  %590 = vmatpush1.msra.mxu1 %v6548_v57 }
 0x159   :  { %520 = vmatprep.subr.mxu0 %v6549_v59  ;;  %591 = vmatprep.subr.mxu1 %v6550_v60  ;;  %v3590_v59 = vld [vmem:[%s6336_s0 + $0x30] sm:$0xff] }
 0x15a   :  { %521 = vmatpush1.msra.mxu0 %v6551_v0  ;;  %592 = vmatpush1.msra.mxu1 %v6552_v56  ;;  %v6562_v56 = vld [vmem:[#allocation11_spill] sm:$0xff] }
 0x15b   :  { %522 = vmatprep.subr.mxu0 %v6553_v58  ;;  %593 = vmatprep.subr.mxu1 %v6554_v52  ;;  %v6563_v58 = vld [vmem:[#allocation12_spill] sm:$0xff] }
 0x15c   :  { %523 = vmatpush1.msra.mxu0 %v6555_v48  ;;  %594 = vmatpush1.msra.mxu1 %v6556_v61  ;;  %v3588_v61 = vld [vmem:[%s6336_s0 + $0x20] sm:$0xff] }
 0x15d   :  { %524 = vmatprep.subr.mxu0 %v6557_v62  ;;  %595 = vmatprep.subr.mxu1 %v6558_v63  ;;  %v3589_v63 = vld [vmem:[%s6336_s0 + $0x28] sm:$0xff] }
 0x15e   :  { %525 = vmatpush1.msra.mxu0 %v6559_v1  ;;  %558 = vmatprep.mubr.f32.mxu0 %v6560_v9 }
 0x15f   :  { %596 = vmatpush1.msra.mxu1 %v6561_v50  ;;  %629 = vmatprep.mubr.f32.mxu1 %v6560_v9 }
 0x160   :  { %671 = vmatprep.subr.mxu0 %v6562_v56  ;;  %742 = vmatprep.subr.mxu1 %v6563_v58  ;;  %v3591_v58 = vld [vmem:[%s6336_s0 + $0x38] sm:$0xff] }
 0x1ff   :  { %v383_v48 = vpop.f32.mrf.mxu0  ;;  %v454_v50 = vpop.f32.mrf.mxu1 }
 0x200   :  { %v459_v1 = vadd.f32 %v3588_v61, %v383_v48  ;;  %v461_v48 = vadd.f32 %v3590_v59, %v454_v50  ;;  %v6567_v59 = vld [vmem:[#allocation14_spill] sm:$0xff] }
 0x201   :  { %v385_v62 = vpop.f32.mrf.mxu0  ;;  %v456_v56 = vpop.f32.mrf.mxu1 }
 0x202   :  { %v3592_v52 = vmul.f32 -1.442695, %v459_v1  ;;  %v460_v0 = vadd.f32 %v3589_v63, %v385_v62  ;;  %v462_v60 = vadd.f32 %v3591_v58, %v456_v56 }
 0x204   :  { %3790 = vpow2.f32 %v3592_v52  ;;  %v3593_v9 = vmul.f32 -1.442695, %v460_v0  ;;  %v3594_v57 = vmul.f32 -1.442695, %v462_v60  ;;  %v6568_v60 = vld [vmem:[#allocation22_spill] sm:$0xff] }
 0x206   :  { %3792 = vpow2.f32 %v3593_v9 }
 0x207   :  { %3794 = vpow2.f32 %v3594_v57 }
 0x211   :  { %v3791_v55 = vpop.eup %3790 }
 0x212   :  { %v466_v61 = vadd.f32 1.0, %v3791_v55 }
 0x213   :  { %v3793_v1 = vpop.eup %3792 }
 0x214   :  { %3796 = vrcp.f32 %v466_v61  ;;  %v472_v52 = vadd.f32 1.0, %v3793_v1  ;;  %v3795_v0 = vpop.eup %3794  ;;  %v6570_v61 = vld [vmem:[#allocation24_spill] sm:$0xff] }
 0x215   :  { %3798 = vtanh.f32 %v461_v48  ;;  %v479_v54 = vadd.f32 1.0, %v3795_v0  ;;  %v6569_v48 = vld [vmem:[#allocation15_spill] sm:$0xff]  ;;  %v6571_v1 = vld [vmem:[#allocation16_spill] sm:$0xff]  ;;  %v6573_v0 = vld [vmem:[#allocation17_spill] sm:$0xff] }
 0x216   :  { %3800 = vrcp.f32 %v472_v52  ;;  %v6572_v52 = vld [vmem:[#allocation25_spill] sm:$0xff] }
 0x217   :  { %3802 = vrcp.f32 %v479_v54  ;;  %v6566_v54 = vld [vmem:[#allocation20_spill] sm:$0xff] }
 0x221   :  { %v3797_v62 = vpop.eup %3796 }
 0x222   :  { %v3799_v63 = vpop.eup %3798 }
 0x223   :  { %v3801_v9 = vpop.eup %3800  ;;  %v483_v56 = vmul.f32 %v3799_v63, %v3797_v62  ;;  %v6574_v62 = vld [vmem:[#allocation26_spill] sm:$0xff]  ;;  %v6575_v63 = vld [vmem:[#allocation19_spill] sm:$0xff] }
 0x224   :  { %v482_v58 = vmul.f32 %v3801_v9, %v4564_v53  ;;  %v3803_v50 = vpop.eup %3802  ;;  %v6565_v53 = vld [vmem:[#allocation13_spill] sm:$0xff]  ;;  %v6576_v9 = vld [vmem:[#allocation27_spill] sm:$0xff] }
 0x226   :  { %v4650_v46 = vadd.f32 %v483_v56, %v482_v58  ;;  %v6577_v56 = vld [vmem:[#allocation21_spill] sm:$0xff]  ;;  %v6578_v58 = vld [vmem:[#allocation28_spill] sm:$0xff] }
 0x228   :  { %3804 = vtanh.f32 %v4650_v46 }
 0x235   :  { %v3805_v55 = vpop.eup %3804 }
 0x236   :  { %v4653_v57 = vmul.f32 %v3805_v55, %v3803_v50  ;;  %v6579_v50 = vld [vmem:[#allocation23_spill] sm:$0xff]  ;;  %v6580_v55 = vmov 0.0  }
 0x238   :  { %6564 = vst [vmem:[#allocation18_spill] sm:$0xff] %v4653_v57  ;;  %559 = vmatmul.mubr.f32.vlgmr.msra.gmra.mxu0 %v4653_v57  ;;  %630 = vmatmul.mubr.f32.vlgmr.msra.gmra.mxu1 %v4653_v57  ;;  %v6581_v57 = vld [vmem:[#allocation29_spill] sm:$0xff] }
 0x239   :  { %672 = vmatpush1.msra.mxu0 %v4292_v2  ;;  %743 = vmatpush1.msra.mxu1 %v4317_v11 }
 0x23a   :  { %673 = vmatprep.subr.mxu0 %v4294_v3  ;;  %744 = vmatprep.subr.mxu1 %v4323_v13 }
 0x23b   :  { %674 = vmatpush1.msra.mxu0 %v4297_v4  ;;  %745 = vmatpush1.msra.mxu1 %v4325_v14 }
 0x23c   :  { %675 = vmatprep.subr.mxu0 %v4300_v5  ;;  %746 = vmatprep.subr.mxu1 %v4331_v16 }
 0x23d   :  { %676 = vmatpush1.msra.mxu0 %v4303_v6  ;;  %747 = vmatpush1.msra.mxu1 %v4337_v18 }
 0x23e   :  { %677 = vmatprep.subr.mxu0 %v4306_v7  ;;  %748 = vmatprep.subr.mxu1 %v4339_v19 }
 0x23f   :  { %678 = vmatpush1.msra.mxu0 %v4309_v8  ;;  %749 = vmatpush1.msra.mxu1 %v4345_v21 }
 0x240   :  { %679 = vmatprep.subr.mxu0 %v4314_v10  ;;  %750 = vmatprep.subr.mxu1 %v4351_v23 }
 0x241   :  { %680 = vmatpush1.msra.mxu0 %v4320_v12  ;;  %751 = vmatpush1.msra.mxu1 %v4357_v25 }
 0x242   :  { %681 = vmatprep.subr.mxu0 %v4328_v15  ;;  %752 = vmatprep.subr.mxu1 %v4363_v27 }
 0x243   :  { %682 = vmatpush1.msra.mxu0 %v4334_v17  ;;  %753 = vmatpush1.msra.mxu1 %v4369_v29 }
 0x244   :  { %683 = vmatprep.subr.mxu0 %v4342_v20  ;;  %754 = vmatprep.subr.mxu1 %v4375_v31 }
 0x245   :  { %684 = vmatpush1.msra.mxu0 %v4348_v22  ;;  %755 = vmatpush1.msra.mxu1 %v4381_v33 }
 0x246   :  { %685 = vmatprep.subr.mxu0 %v4354_v24  ;;  %756 = vmatprep.subr.mxu1 %v4387_v35 }
 0x247   :  { %686 = vmatpush1.msra.mxu0 %v4360_v26  ;;  %757 = vmatpush1.msra.mxu1 %v4393_v37 }
 0x248   :  { %687 = vmatprep.subr.mxu0 %v4366_v28  ;;  %758 = vmatprep.subr.mxu1 %v4399_v39 }
 0x249   :  { %688 = vmatpush1.msra.mxu0 %v4372_v30  ;;  %759 = vmatpush1.msra.mxu1 %v4405_v41 }
 0x24a   :  { %689 = vmatprep.subr.mxu0 %v4378_v32  ;;  %760 = vmatprep.subr.mxu1 %v4411_v43 }
 0x24b   :  { %690 = vmatpush1.msra.mxu0 %v4384_v34  ;;  %761 = vmatpush1.msra.mxu1 %v4417_v45 }
 0x24c   :  { %691 = vmatprep.subr.mxu0 %v4390_v36  ;;  %762 = vmatprep.subr.mxu1 %v4423_v47 }
 0x24d   :  { %692 = vmatpush1.msra.mxu0 %v4396_v38  ;;  %763 = vmatpush1.msra.mxu1 %v4429_v49 }
 0x24e   :  { %693 = vmatprep.subr.mxu0 %v4402_v40  ;;  %764 = vmatprep.subr.mxu1 %v4435_v51 }
 0x24f   :  { %694 = vmatpush1.msra.mxu0 %v4408_v42  ;;  %765 = vmatpush1.msra.mxu1 %v6544_v44 }
 0x250   :  { %695 = vmatprep.subr.mxu0 %v6565_v53  ;;  %766 = vmatprep.subr.mxu1 %v6566_v54 }
 0x251   :  { %696 = vmatpush1.msra.mxu0 %v6567_v59  ;;  %767 = vmatpush1.msra.mxu1 %v6568_v60 }
 0x252   :  { %697 = vmatprep.subr.mxu0 %v6569_v48  ;;  %768 = vmatprep.subr.mxu1 %v6570_v61  ;;  %v3597_v48 = vld [vmem:[%s6336_s0 + $0x50] sm:$0xff] }
 0x253   :  { %698 = vmatpush1.msra.mxu0 %v6571_v1  ;;  %769 = vmatpush1.msra.mxu1 %v6572_v52  ;;  %v6582_v52 = vld [vmem:[#allocation11_spill] sm:$0xff] }
 0x254   :  { %699 = vmatprep.subr.mxu0 %v6573_v0  ;;  %770 = vmatprep.subr.mxu1 %v6574_v62  ;;  %v6583_v0 = vld [vmem:[#allocation12_spill] sm:$0xff] }
 0x255   :  { %700 = vmatpush1.msra.mxu0 %v6575_v63  ;;  %771 = vmatpush1.msra.mxu1 %v6576_v9  ;;  %v3595_v9 = vld [vmem:[%s6336_s0 + $0x40] sm:$0xff] }
 0x256   :  { %701 = vmatprep.subr.mxu0 %v6577_v56  ;;  %772 = vmatprep.subr.mxu1 %v6578_v58  ;;  %v3596_v58 = vld [vmem:[%s6336_s0 + $0x48] sm:$0xff] }
 0x257   :  { %702 = vmatpush1.msra.mxu0 %v6579_v50  ;;  %735 = vmatprep.mubr.f32.mxu0 %v6580_v55 }
 0x258   :  { %773 = vmatpush1.msra.mxu1 %v6581_v57  ;;  %806 = vmatprep.mubr.f32.mxu1 %v6580_v55 }
 0x259   :  { %848 = vmatprep.subr.mxu0 %v6582_v52  ;;  %919 = vmatprep.subr.mxu1 %v6583_v0  ;;  %v3598_v52 = vld [vmem:[%s6336_s0 + $0x58] sm:$0xff] }
 0x2f8   :  { %v560_v63 = vpop.f32.mrf.mxu0  ;;  %v631_v57 = vpop.f32.mrf.mxu1 }
 0x2f9   :  { %v636_v50 = vadd.f32 %v3595_v9, %v560_v63  ;;  %v638_v63 = vadd.f32 %v3597_v48, %v631_v57 }
 0x2fa   :  { %v562_v56 = vpop.f32.mrf.mxu0  ;;  %v633_v0 = vpop.f32.mrf.mxu1 }
 0x2fb   :  { %v3599_v62 = vmul.f32 -1.442695, %v636_v50  ;;  %v637_v1 = vadd.f32 %v3596_v58, %v562_v56  ;;  %v639_v61 = vadd.f32 %v3598_v52, %v633_v0 }
 0x2fd   :  { %3806 = vpow2.f32 %v3599_v62  ;;  %v3600_v55 = vmul.f32 -1.442695, %v637_v1  ;;  %v3601_v60 = vmul.f32 -1.442695, %v639_v61 }
 0x2ff   :  { %3808 = vpow2.f32 %v3600_v55 }
 0x300   :  { %3810 = vpow2.f32 %v3601_v60 }
 0x30a   :  { %v3807_v59 = vpop.eup %3806 }
 0x30b   :  { %v643_v9 = vadd.f32 1.0, %v3807_v59 }
 0x30c   :  { %v3809_v50 = vpop.eup %3808 }
 0x30d   :  { %3812 = vrcp.f32 %v643_v9  ;;  %v649_v62 = vadd.f32 1.0, %v3809_v50  ;;  %v3811_v1 = vpop.eup %3810 }
 0x30e   :  { %3814 = vtanh.f32 %v638_v63  ;;  %v656_v54 = vadd.f32 1.0, %v3811_v1  ;;  %v4831_v1 = vld [vmem:[#allocation4 + $0x1e0] sm:$0xff] }
 0x30f   :  { %3816 = vrcp.f32 %v649_v62 }
 0x310   :  { %3818 = vrcp.f32 %v656_v54 }
 0x31a   :  { %v3813_v56 = vpop.eup %3812 }
 0x31b   :  { %v3815_v58 = vpop.eup %3814 }
 0x31c   :  { %v3817_v55 = vpop.eup %3816  ;;  %v660_v0 = vmul.f32 %v3815_v58, %v3813_v56  ;;  %v4834_v56 = vld [vmem:[#allocation4 + $0x1f0] sm:$0xff]  ;;  %v4840_v58 = vld [vmem:[#allocation4 + $0x1d8] sm:$0xff] }
 0x31d   :  { %v659_v52 = vmul.f32 %v3817_v55, %v4650_v46  ;;  %v3819_v57 = vpop.eup %3818  ;;  %v4843_v55 = vld [vmem:[#allocation4 + $0x1c0] sm:$0xff] }
 0x31f   :  { %v4736_v53 = vadd.f32 %v660_v0, %v659_v52  ;;  %v4846_v0 = vld [vmem:[#allocation4 + $0x1d0] sm:$0xff]  ;;  %v4849_v52 = vld [vmem:[#allocation4 + $0x1a8] sm:$0xff] }
 0x321   :  { %3820 = vtanh.f32 %v4736_v53 }
 0x32e   :  { %v3821_v59 = vpop.eup %3820 }
 0x32f   :  { %v4739_v60 = vmul.f32 %v3821_v59, %v3819_v57  ;;  %v4852_v57 = vld [vmem:[#allocation4 + $0x1b8] sm:$0xff]  ;;  %v4855_v59 = vld [vmem:[#allocation4 + $0x1a0] sm:$0xff] }
 0x331   :  { %6584 = vst [vmem:[#allocation11_spill] sm:$0xff] %v4739_v60  ;;  %736 = vmatmul.mubr.f32.vlgmr.msra.gmra.mxu0 %v4739_v60  ;;  %807 = vmatmul.mubr.f32.vlgmr.msra.gmra.mxu1 %v4739_v60 }
 0x332   :  { %849 = vmatpush1.msra.mxu0 %v4292_v2  ;;  %920 = vmatpush1.msra.mxu1 %v4317_v11  ;;  %v6585_v2 = vld [vmem:[#allocation13_spill] sm:$0xff] }
 0x333   :  { %850 = vmatprep.subr.mxu0 %v4294_v3  ;;  %921 = vmatprep.subr.mxu1 %v4323_v13  ;;  %v6586_v3 = vld [vmem:[#allocation20_spill] sm:$0xff]  ;;  %v6593_v11 = vld [vmem:[#allocation17_spill] sm:$0xff]  ;;  %v6595_v13 = vld [vmem:[#allocation19_spill] sm:$0xff] }
 0x334   :  { %851 = vmatpush1.msra.mxu0 %v4297_v4  ;;  %922 = vmatpush1.msra.mxu1 %v4325_v14  ;;  %v6587_v4 = vld [vmem:[#allocation14_spill] sm:$0xff]  ;;  %v6596_v14 = vld [vmem:[#allocation27_spill] sm:$0xff] }
 0x335   :  { %852 = vmatprep.subr.mxu0 %v4300_v5  ;;  %923 = vmatprep.subr.mxu1 %v4331_v16  ;;  %v6588_v5 = vld [vmem:[#allocation22_spill] sm:$0xff]  ;;  %v6598_v16 = vld [vmem:[#allocation28_spill] sm:$0xff] }
 0x336   :  { %853 = vmatpush1.msra.mxu0 %v4303_v6  ;;  %924 = vmatpush1.msra.mxu1 %v4337_v18  ;;  %v6589_v6 = vld [vmem:[#allocation15_spill] sm:$0xff]  ;;  %v6600_v18 = vmov 0.0  }
 0x337   :  { %854 = vmatprep.subr.mxu0 %v4306_v7  ;;  %925 = vmatprep.subr.mxu1 %v4339_v19  ;;  %v6590_v7 = vld [vmem:[#allocation24_spill] sm:$0xff]  ;;  %v6601_v19 = vld [vmem:[#allocation29_spill] sm:$0xff] }
 0x338   :  { %855 = vmatpush1.msra.mxu0 %v4309_v8  ;;  %926 = vmatpush1.msra.mxu1 %v4345_v21  ;;  %v6591_v8 = vld [vmem:[#allocation16_spill] sm:$0xff] }
 0x339   :  { %856 = vmatprep.subr.mxu0 %v4314_v10  ;;  %927 = vmatprep.subr.mxu1 %v4351_v23  ;;  %v6592_v10 = vld [vmem:[#allocation25_spill] sm:$0xff]  ;;  %v6603_v21 = vld [vmem:[#allocation12_spill] sm:$0xff] }
 0x33a   :  { %857 = vmatpush1.msra.mxu0 %v4320_v12  ;;  %928 = vmatpush1.msra.mxu1 %v4357_v25  ;;  %v6594_v12 = vld [vmem:[#allocation26_spill] sm:$0xff] }
 0x33b   :  { %858 = vmatprep.subr.mxu0 %v4328_v15  ;;  %929 = vmatprep.subr.mxu1 %v4363_v27  ;;  %v6597_v15 = vld [vmem:[#allocation21_spill] sm:$0xff] }
 0x33c   :  { %859 = vmatpush1.msra.mxu0 %v4334_v17  ;;  %930 = vmatpush1.msra.mxu1 %v4369_v29  ;;  %v6599_v17 = vld [vmem:[#allocation23_spill] sm:$0xff] }
 0x33d   :  { %860 = vmatprep.subr.mxu0 %v4342_v20  ;;  %931 = vmatprep.subr.mxu1 %v4375_v31  ;;  %v4807_v20 = vld [vmem:[#allocation4 + $0x1e8] sm:$0xff]  ;;  %v3605_v31 = vld [vmem:[%s6336_s0 + $0x78] sm:$0xff] }
 0x33e   :  { %861 = vmatpush1.msra.mxu0 %v4348_v22  ;;  %932 = vmatpush1.msra.mxu1 %v4381_v33  ;;  %6602 = vst [vmem:[#allocation13_spill] sm:$0xff] %v4807_v20  ;;  %v3602_v22 = vld [vmem:[%s6336_s0 + $0x60] sm:$0xff] }
 0x33f   :  { %862 = vmatprep.subr.mxu0 %v4354_v24  ;;  %933 = vmatprep.subr.mxu1 %v4387_v35  ;;  %v3603_v24 = vld [vmem:[%s6336_s0 + $0x68] sm:$0xff] }
 0x340   :  { %863 = vmatpush1.msra.mxu0 %v4360_v26  ;;  %934 = vmatpush1.msra.mxu1 %v4393_v37 }
 0x341   :  { %864 = vmatprep.subr.mxu0 %v4366_v28  ;;  %935 = vmatprep.subr.mxu1 %v4399_v39 }
 0x342   :  { %865 = vmatpush1.msra.mxu0 %v4372_v30  ;;  %936 = vmatpush1.msra.mxu1 %v4405_v41 }
 0x343   :  { %866 = vmatprep.subr.mxu0 %v4378_v32  ;;  %937 = vmatprep.subr.mxu1 %v4411_v43 }
 0x344   :  { %867 = vmatpush1.msra.mxu0 %v4384_v34  ;;  %938 = vmatpush1.msra.mxu1 %v4417_v45  ;;  %v3604_v34 = vld [vmem:[%s6336_s0 + $0x70] sm:$0xff] }
 0x345   :  { %868 = vmatprep.subr.mxu0 %v4390_v36  ;;  %939 = vmatprep.subr.mxu1 %v4423_v47 }
 0x346   :  { %869 = vmatpush1.msra.mxu0 %v4396_v38  ;;  %940 = vmatpush1.msra.mxu1 %v4429_v49 }
 0x347   :  { %870 = vmatprep.subr.mxu0 %v4402_v40  ;;  %941 = vmatprep.subr.mxu1 %v4435_v51 }
 0x348   :  { %871 = vmatpush1.msra.mxu0 %v4408_v42  ;;  %942 = vmatpush1.msra.mxu1 %v6544_v44 }
 0x349   :  { %872 = vmatprep.subr.mxu0 %v6585_v2  ;;  %943 = vmatprep.subr.mxu1 %v6586_v3  ;;  %v4858_v2 = vld [vmem:[#allocation4 + $0x1b0] sm:$0xff] }
 0x34a   :  { %873 = vmatpush1.msra.mxu0 %v6587_v4  ;;  %944 = vmatpush1.msra.mxu1 %v6588_v5  ;;  %v4861_v4 = vld [vmem:[#allocation4 + $0x188] sm:$0xff] }
 0x34b   :  { %874 = vmatprep.subr.mxu0 %v6589_v6  ;;  %945 = vmatprep.subr.mxu1 %v6590_v7  ;;  %v4864_v6 = vld [vmem:[#allocation4 + $0x198] sm:$0xff] }
 0x34c   :  { %875 = vmatpush1.msra.mxu0 %v6591_v8  ;;  %946 = vmatpush1.msra.mxu1 %v6592_v10  ;;  %v4867_v8 = vld [vmem:[#allocation4 + $0x180] sm:$0xff] }
 0x34d   :  { %876 = vmatprep.subr.mxu0 %v6593_v11  ;;  %947 = vmatprep.subr.mxu1 %v6594_v12  ;;  %v4870_v11 = vld [vmem:[#allocation4 + $0x190] sm:$0xff] }
 0x34e   :  { %877 = vmatpush1.msra.mxu0 %v6595_v13  ;;  %948 = vmatpush1.msra.mxu1 %v6596_v14 }
 0x34f   :  { %878 = vmatprep.subr.mxu0 %v6597_v15  ;;  %949 = vmatprep.subr.mxu1 %v6598_v16 }
 0x350   :  { %879 = vmatpush1.msra.mxu0 %v6599_v17  ;;  %912 = vmatprep.mubr.f32.mxu0 %v6600_v18 }
 0x351   :  { %950 = vmatpush1.msra.mxu1 %v6601_v19  ;;  %983 = vmatprep.mubr.f32.mxu1 %v6600_v18 }
 0x352   :  { %1025 = vmatprep.subr.mxu0 %v4807_v20  ;;  %1096 = vmatprep.subr.mxu1 %v6603_v21  ;;  %v4873_v21 = vld [vmem:[#allocation4 + $0x168] sm:$0xff] }
 0x3f1   :  { %v737_v23 = vpop.f32.mrf.mxu0  ;;  %v808_v29 = vpop.f32.mrf.mxu1 }
 0x3f2   :  { %v813_v25 = vadd.f32 %v3602_v22, %v737_v23  ;;  %v815_v37 = vadd.f32 %v3604_v34, %v808_v29  ;;  %v4876_v22 = vld [vmem:[#allocation4 + $0x178] sm:$0xff]  ;;  %v4879_v23 = vld [vmem:[#allocation4 + $0x160] sm:$0xff]  ;;  %v4897_v29 = vld [vmem:[#allocation4 + $0x128] sm:$0xff] }
 0x3f3   :  { %v739_v26 = vpop.f32.mrf.mxu0  ;;  %v810_v32 = vpop.f32.mrf.mxu1  ;;  %v4912_v34 = vld [vmem:[#allocation4 + $0x118] sm:$0xff] }
 0x3f4   :  { %v3606_v27 = vmul.f32 -1.442695, %v813_v25  ;;  %v814_v28 = vadd.f32 %v3603_v24, %v739_v26  ;;  %v816_v33 = vadd.f32 %v3605_v31, %v810_v32  ;;  %v4882_v24 = vld [vmem:[#allocation4 + $0x170] sm:$0xff]  ;;  %v4885_v25 = vld [vmem:[#allocation4 + $0x148] sm:$0xff]  ;;  %v4888_v26 = vld [vmem:[#allocation4 + $0x158] sm:$0xff] }
 0x3f5   :  { %v4903_v31 = vld [vmem:[#allocation4 + $0x120] sm:$0xff]  ;;  %v4906_v32 = vld [vmem:[#allocation4 + $0x130] sm:$0xff] }
 0x3f6   :  { %3822 = vpow2.f32 %v3606_v27  ;;  %v3607_v30 = vmul.f32 -1.442695, %v814_v28  ;;  %v3608_v35 = vmul.f32 -1.442695, %v816_v33  ;;  %v4891_v27 = vld [vmem:[#allocation4 + $0x140] sm:$0xff]  ;;  %v4894_v28 = vld [vmem:[#allocation4 + $0x150] sm:$0xff] }
 0x3f7   :  { %v4909_v33 = vld [vmem:[#allocation4 + $0x108] sm:$0xff] }
 0x3f8   :  { %3824 = vpow2.f32 %v3607_v30  ;;  %v4900_v30 = vld [vmem:[#allocation4 + $0x138] sm:$0xff] }
 0x3f9   :  { %3826 = vpow2.f32 %v3608_v35  ;;  %v4915_v35 = vld [vmem:[#allocation4 + $0x100] sm:$0xff] }
 0x403   :  { %v3823_v36 = vpop.eup %3822 }
 0x404   :  { %v820_v38 = vadd.f32 1.0, %v3823_v36  ;;  %v4918_v36 = vld [vmem:[#allocation4 + $0x110] sm:$0xff] }
 0x405   :  { %v3825_v39 = vpop.eup %3824 }
 0x406   :  { %3828 = vrcp.f32 %v820_v38  ;;  %v826_v40 = vadd.f32 1.0, %v3825_v39  ;;  %v3827_v41 = vpop.eup %3826  ;;  %v4924_v38 = vld [vmem:[#allocation4 + $0xf8] sm:$0xff]  ;;  %v4927_v39 = vld [vmem:[#allocation4 + $0xe0] sm:$0xff] }
 0x407   :  { %3830 = vtanh.f32 %v815_v37  ;;  %v833_v54 = vadd.f32 1.0, %v3827_v41  ;;  %v4921_v37 = vld [vmem:[#allocation4 + $0xe8] sm:$0xff] }
 0x408   :  { %3832 = vrcp.f32 %v826_v40  ;;  %v4930_v40 = vld [vmem:[#allocation4 + $0xf0] sm:$0xff]  ;;  %v4933_v41 = vld [vmem:[#allocation4 + $0xc8] sm:$0xff] }
 0x409   :  { %3834 = vrcp.f32 %v833_v54  ;;  %v4947_v54 = vld [vmem:[#allocation4 + $0xa0] sm:$0xff] }
 0x413   :  { %v3829_v42 = vpop.eup %3828 }
 0x414   :  { %v3831_v43 = vpop.eup %3830 }
 0x415   :  { %v3833_v46 = vpop.eup %3832  ;;  %v837_v48 = vmul.f32 %v3831_v43, %v3829_v42  ;;  %v4936_v42 = vld [vmem:[#allocation4 + $0xd8] sm:$0xff]  ;;  %v4939_v43 = vld [vmem:[#allocation4 + $0xc0] sm:$0xff] }
 0x416   :  { %v836_v61 = vmul.f32 %v3833_v46, %v4736_v53  ;;  %v3835_v9 = vpop.eup %3834  ;;  %v4837_v53 = vld [vmem:[#allocation4 + $0x1c8] sm:$0xff] }
 0x417   :  { %v4943_v46 = vld [vmem:[#allocation4 + $0xa8] sm:$0xff] }
 0x418   :  { %v4824_v63 = vadd.f32 %v837_v48, %v836_v61  ;;  %v4951_v48 = vld [vmem:[#allocation4 + $0x88] sm:$0xff]  ;;  %v4955_v61 = vld [vmem:[#allocation4 + $0x80] sm:$0xff] }
 0x41a   :  { %3836 = vtanh.f32 %v4824_v63 }
 0x427   :  { %v3837_v50 = vpop.eup %3836 }
 0x428   :  { %v4827_v62 = vmul.f32 %v3837_v50, %v3835_v9 }
 0x42a   :  { %6604 = vst [vmem:[#allocation20_spill] sm:$0xff] %v4827_v62  ;;  %913 = vmatmul.mubr.f32.vlgmr.msra.gmra.mxu0 %v4827_v62  ;;  %984 = vmatmul.mubr.f32.vlgmr.msra.gmra.mxu1 %v4827_v62  ;;  %v3611_v62 = vld [vmem:[%s6336_s0 + $0x90] sm:$0xff] }
 0x42b   :  { %1026 = vmatpush1.msra.mxu0 %v4831_v1  ;;  %1097 = vmatpush1.msra.mxu1 %v4834_v56 }
 0x42c   :  { %1027 = vmatprep.subr.mxu0 %v4837_v53  ;;  %1098 = vmatprep.subr.mxu1 %v4840_v58 }
 0x42d   :  { %1028 = vmatpush1.msra.mxu0 %v4843_v55  ;;  %1099 = vmatpush1.msra.mxu1 %v4846_v0 }
 0x42e   :  { %1029 = vmatprep.subr.mxu0 %v4849_v52  ;;  %1100 = vmatprep.subr.mxu1 %v4852_v57 }
 0x42f   :  { %1030 = vmatpush1.msra.mxu0 %v4855_v59  ;;  %1101 = vmatpush1.msra.mxu1 %v4858_v2 }
 0x430   :  { %1031 = vmatprep.subr.mxu0 %v4861_v4  ;;  %1102 = vmatprep.subr.mxu1 %v4864_v6 }
 0x431   :  { %1032 = vmatpush1.msra.mxu0 %v4867_v8  ;;  %1103 = vmatpush1.msra.mxu1 %v4870_v11 }
 0x432   :  { %1033 = vmatprep.subr.mxu0 %v4873_v21  ;;  %1104 = vmatprep.subr.mxu1 %v4876_v22 }
 0x433   :  { %1034 = vmatpush1.msra.mxu0 %v4879_v23  ;;  %1105 = vmatpush1.msra.mxu1 %v4882_v24 }
 0x434   :  { %1035 = vmatprep.subr.mxu0 %v4885_v25  ;;  %1106 = vmatprep.subr.mxu1 %v4888_v26 }
 0x435   :  { %1036 = vmatpush1.msra.mxu0 %v4891_v27  ;;  %1107 = vmatpush1.msra.mxu1 %v4894_v28 }
 0x436   :  { %1037 = vmatprep.subr.mxu0 %v4897_v29  ;;  %1108 = vmatprep.subr.mxu1 %v4900_v30 }
 0x437   :  { %1038 = vmatpush1.msra.mxu0 %v4903_v31  ;;  %1109 = vmatpush1.msra.mxu1 %v4906_v32 }
 0x438   :  { %1039 = vmatprep.subr.mxu0 %v4909_v33  ;;  %1110 = vmatprep.subr.mxu1 %v4912_v34 }
 0x439   :  { %1040 = vmatpush1.msra.mxu0 %v4915_v35  ;;  %1111 = vmatpush1.msra.mxu1 %v4918_v36 }
 0x43a   :  { %1041 = vmatprep.subr.mxu0 %v4921_v37  ;;  %1112 = vmatprep.subr.mxu1 %v4924_v38 }
 0x43b   :  { %1042 = vmatpush1.msra.mxu0 %v4927_v39  ;;  %1113 = vmatpush1.msra.mxu1 %v4930_v40 }
 0x43c   :  { %1043 = vmatprep.subr.mxu0 %v4933_v41  ;;  %1114 = vmatprep.subr.mxu1 %v4936_v42 }
 0x43d   :  { %1044 = vmatpush1.msra.mxu0 %v4939_v43  ;;  %1115 = vmatpush1.msra.mxu1 %v4417_v45  ;;  %v4959_v45 = vld [vmem:[#allocation4 + $0x68] sm:$0xff] }
 0x43e   :  { %1045 = vmatprep.subr.mxu0 %v4943_v46  ;;  %1116 = vmatprep.subr.mxu1 %v4423_v47  ;;  %6605 = vst [vmem:[#allocation14_spill] sm:$0xff] %v4959_v45  ;;  %v4963_v47 = vld [vmem:[#allocation4 + $0x60] sm:$0xff] }
 0x43f   :  { %1046 = vmatpush1.msra.mxu0 %v4947_v54  ;;  %1117 = vmatpush1.msra.mxu1 %v4429_v49  ;;  %6606 = vst [vmem:[#allocation22_spill] sm:$0xff] %v4963_v47  ;;  %v4967_v49 = vld [vmem:[#allocation4 + $0x48] sm:$0xff] }
 0x440   :  { %1047 = vmatprep.subr.mxu0 %v4951_v48  ;;  %1118 = vmatprep.subr.mxu1 %v4435_v51  ;;  %6607 = vst [vmem:[#allocation15_spill] sm:$0xff] %v4967_v49  ;;  %v4971_v51 = vld [vmem:[#allocation4 + $0x40] sm:$0xff] }
 0x441   :  { %1048 = vmatpush1.msra.mxu0 %v4955_v61  ;;  %1119 = vmatpush1.msra.mxu1 %v6544_v44  ;;  %6608 = vst [vmem:[#allocation24_spill] sm:$0xff] %v4971_v51  ;;  %v4975_v44 = vld [vmem:[#allocation4 + $0x28] sm:$0xff] }
 0x442   :  { %1049 = vmatprep.subr.mxu0 %v4959_v45  ;;  %1120 = vmatprep.subr.mxu1 %v6586_v3  ;;  %6609 = vst [vmem:[#allocation16_spill] sm:$0xff] %v4975_v44  ;;  %v4988_v3 = vld [vmem:[#allocation4 + $0x1f8] sm:$0xff] }
 0x443   :  { %1050 = vmatpush1.msra.mxu0 %v4963_v47  ;;  %1121 = vmatpush1.msra.mxu1 %v6588_v5  ;;  %6610 = vst [vmem:[#allocation25_spill] sm:$0xff] %v4988_v3  ;;  %v3609_v5 = vld [vmem:[%s6336_s0 + $0x80] sm:$0xff] }
 0x444   :  { %1051 = vmatprep.subr.mxu0 %v4967_v49  ;;  %1122 = vmatprep.subr.mxu1 %v6590_v7 }
 0x445   :  { %1052 = vmatpush1.msra.mxu0 %v4971_v51  ;;  %1123 = vmatpush1.msra.mxu1 %v6592_v10  ;;  %v3610_v10 = vld [vmem:[%s6336_s0 + $0x88] sm:$0xff] }
 0x446   :  { %1053 = vmatprep.subr.mxu0 %v4975_v44  ;;  %1124 = vmatprep.subr.mxu1 %v6594_v12 }
 0x447   :  { %1054 = vmatpush1.msra.mxu0 %v6595_v13  ;;  %1125 = vmatpush1.msra.mxu1 %v6596_v14 }
 0x448   :  { %1055 = vmatprep.subr.mxu0 %v6597_v15  ;;  %1126 = vmatprep.subr.mxu1 %v6598_v16 }
 0x449   :  { %1056 = vmatpush1.msra.mxu0 %v6599_v17  ;;  %1089 = vmatprep.mubr.f32.mxu0 %v6600_v18 }
 0x44a   :  { %1127 = vmatpush1.msra.mxu1 %v6601_v19  ;;  %1160 = vmatprep.mubr.f32.mxu1 %v6600_v18  ;;  %v3612_v19 = vld [vmem:[%s6336_s0 + $0x98] sm:$0xff] }
 0x44b   :  { %1202 = vmatprep.subr.mxu0 %v4807_v20  ;;  %1273 = vmatprep.subr.mxu1 %v4988_v3 }
 0x4ea   :  { %v914_v7 = vpop.f32.mrf.mxu0  ;;  %v985_v16 = vpop.f32.mrf.mxu1 }
 0x4eb   :  { %v990_v12 = vadd.f32 %v3609_v5, %v914_v7  ;;  %v992_v5 = vadd.f32 %v3611_v62, %v985_v16  ;;  %v5056_v16 = vld [vmem:[#allocation4 + $0xb0] sm:$0xff] }
 0x4ec   :  { %v916_v13 = vpop.f32.mrf.mxu0  ;;  %v987_v9 = vpop.f32.mrf.mxu1 }
 0x4ed   :  { %v3613_v14 = vmul.f32 -1.442695, %v990_v12  ;;  %v991_v15 = vadd.f32 %v3610_v10, %v916_v13  ;;  %v993_v50 = vadd.f32 %v3612_v19, %v987_v9 }
 0x4ef   :  { %3838 = vpow2.f32 %v3613_v14  ;;  %v3614_v17 = vmul.f32 -1.442695, %v991_v15  ;;  %v3615_v60 = vmul.f32 -1.442695, %v993_v50  ;;  %v5060_v50 = vld [vmem:[#allocation4 + $0x98] sm:$0xff] }
 0x4f1   :  { %3840 = vpow2.f32 %v3614_v17 }
 0x4f2   :  { %3842 = vpow2.f32 %v3615_v60 }
 0x4fc   :  { %v3839_v3 = vpop.eup %3838 }
 0x4fd   :  { %v997_v7 = vadd.f32 1.0, %v3839_v3 }
 0x4fe   :  { %v3841_v12 = vpop.eup %3840 }
 0x4ff   :  { %3844 = vrcp.f32 %v997_v7  ;;  %v1003_v10 = vadd.f32 1.0, %v3841_v12  ;;  %v3843_v13 = vpop.eup %3842  ;;  %v5068_v7 = vld [vmem:[#allocation4 + $0x78] sm:$0xff]  ;;  %v5072_v12 = vld [vmem:[#allocation4 + $0x70] sm:$0xff] }
 0x500   :  { %3846 = vtanh.f32 %v992_v5  ;;  %v1010_v20 = vadd.f32 1.0, %v3843_v13  ;;  %v5064_v5 = vld [vmem:[#allocation4 + $0x90] sm:$0xff]  ;;  %6612 = vst [vmem:[#allocation26_spill] sm:$0xff] %v5068_v7  ;;  %6613 = vst [vmem:[#allocation19_spill] sm:$0xff] %v5072_v12 }
 0x501   :  { %3848 = vrcp.f32 %v1003_v10  ;;  %v5076_v10 = vld [vmem:[#allocation4 + $0x58] sm:$0xff]  ;;  %v5080_v13 = vld [vmem:[#allocation4 + $0x50] sm:$0xff] }
 0x502   :  { %3850 = vrcp.f32 %v1010_v20  ;;  %v5048_v20 = vld [vmem:[#allocation4 + $0xd0] sm:$0xff]  ;;  %6614 = vst [vmem:[#allocation27_spill] sm:$0xff] %v5076_v10  ;;  %6615 = vst [vmem:[#allocation21_spill] sm:$0xff] %v5080_v13 }
 0x50c   :  { %v3845_v14 = vpop.eup %3844 }
 0x50d   :  { %v3847_v15 = vpop.eup %3846 }
 0x50e   :  { %v3849_v17 = vpop.eup %3848  ;;  %v1014_v19 = vmul.f32 %v3847_v15, %v3845_v14  ;;  %v5084_v14 = vld [vmem:[#allocation4 + $0x38] sm:$0xff]  ;;  %v5087_v15 = vld [vmem:[#allocation4 + $0x20] sm:$0xff] }
 0x50f   :  { %v1013_v9 = vmul.f32 %v3849_v17, %v4824_v63  ;;  %v3851_v62 = vpop.eup %3850  ;;  %v5052_v63 = vld [vmem:[#allocation4 + $0xb8] sm:$0xff]  ;;  %6616 = vst [vmem:[#allocation28_spill] sm:$0xff] %v5084_v14  ;;  %6617 = vst [vmem:[#allocation23_spill] sm:$0xff] %v5087_v15  ;;  %v5090_v17 = vld [vmem:[#allocation4 + $0x30] sm:$0xff] }
 0x510   :  { %6618 = vst [vmem:[#allocation29_spill] sm:$0xff] %v5090_v17 }
 0x511   :  { %v5004_v18 = vadd.f32 %v1014_v19, %v1013_v9  ;;  %v5093_v19 = vld [vmem:[#allocation4 + $0x8] sm:$0xff]  ;;  %v5096_v9 = vld [vmem:[#allocation4 + $0x18] sm:$0xff] }
 0x512   :  { %6619 = vst [vmem:[#allocation12_spill] sm:$0xff] %v5093_v19  ;;  %6620 = vst [vmem:[#allocation31_spill] sm:$0xff] %v5096_v9 }
 0x513   :  { %3852 = vtanh.f32 %v5004_v18 }
 0x520   :  { %v3853_v3 = vpop.eup %3852 }
 0x521   :  { %v5007_v60 = vmul.f32 %v3853_v3, %v3851_v62  ;;  %v5099_v62 = vld [vmem:[#allocation4] sm:$0xff]  ;;  %v6622_v3 = vmov 0.0  }
 0x522   :  { %6621 = vst [vmem:[#allocation32_spill] sm:$0xff] %v5099_v62 }
 0x523   :  { %6611 = vst [vmem:[#allocation17_spill] sm:$0xff] %v5007_v60  ;;  %1090 = vmatmul.mubr.f32.vlgmr.msra.gmra.mxu0 %v5007_v60  ;;  %1161 = vmatmul.mubr.f32.vlgmr.msra.gmra.mxu1 %v5007_v60  ;;  %v5103_v60 = vld [vmem:[#allocation4 + $0x10] sm:$0xff] }
 0x524   :  { %1203 = vmatpush1.msra.mxu0 %v4831_v1  ;;  %1274 = vmatpush1.msra.mxu1 %v4834_v56  ;;  %6623 = vst [vmem:[#allocation33_spill] sm:$0xff] %v5103_v60 }
 0x525   :  { %1204 = vmatprep.subr.mxu0 %v4837_v53  ;;  %1275 = vmatprep.subr.mxu1 %v4840_v58 }
 0x526   :  { %1205 = vmatpush1.msra.mxu0 %v4843_v55  ;;  %1276 = vmatpush1.msra.mxu1 %v4846_v0 }
 0x527   :  { %1206 = vmatprep.subr.mxu0 %v4849_v52  ;;  %1277 = vmatprep.subr.mxu1 %v4852_v57 }
 0x528   :  { %1207 = vmatpush1.msra.mxu0 %v4855_v59  ;;  %1278 = vmatpush1.msra.mxu1 %v4858_v2 }
 0x529   :  { %1208 = vmatprep.subr.mxu0 %v4861_v4  ;;  %1279 = vmatprep.subr.mxu1 %v4864_v6 }
 0x52a   :  { %1209 = vmatpush1.msra.mxu0 %v4867_v8  ;;  %1280 = vmatpush1.msra.mxu1 %v4870_v11 }
 0x52b   :  { %1210 = vmatprep.subr.mxu0 %v4873_v21  ;;  %1281 = vmatprep.subr.mxu1 %v4876_v22 }
 0x52c   :  { %1211 = vmatpush1.msra.mxu0 %v4879_v23  ;;  %1282 = vmatpush1.msra.mxu1 %v4882_v24 }
 0x52d   :  { %1212 = vmatprep.subr.mxu0 %v4885_v25  ;;  %1283 = vmatprep.subr.mxu1 %v4888_v26 }
 0x52e   :  { %1213 = vmatpush1.msra.mxu0 %v4891_v27  ;;  %1284 = vmatpush1.msra.mxu1 %v4894_v28 }
 0x52f   :  { %1214 = vmatprep.subr.mxu0 %v4897_v29  ;;  %1285 = vmatprep.subr.mxu1 %v4900_v30 }
 0x530   :  { %1215 = vmatpush1.msra.mxu0 %v4903_v31  ;;  %1286 = vmatpush1.msra.mxu1 %v4906_v32 }
 0x531   :  { %1216 = vmatprep.subr.mxu0 %v4909_v33  ;;  %1287 = vmatprep.subr.mxu1 %v4912_v34 }
 0x532   :  { %1217 = vmatpush1.msra.mxu0 %v4915_v35  ;;  %1288 = vmatpush1.msra.mxu1 %v4918_v36 }
 0x533   :  { %1218 = vmatprep.subr.mxu0 %v4921_v37  ;;  %1289 = vmatprep.subr.mxu1 %v4924_v38 }
 0x534   :  { %1219 = vmatpush1.msra.mxu0 %v4927_v39  ;;  %1290 = vmatpush1.msra.mxu1 %v4930_v40 }
 0x535   :  { %1220 = vmatprep.subr.mxu0 %v4933_v41  ;;  %1291 = vmatprep.subr.mxu1 %v4936_v42 }
 0x536   :  { %1221 = vmatpush1.msra.mxu0 %v4939_v43  ;;  %1292 = vmatpush1.msra.mxu1 %v5048_v20 }
 0x537   :  { %1222 = vmatprep.subr.mxu0 %v4943_v46  ;;  %1293 = vmatprep.subr.mxu1 %v5052_v63 }
 0x538   :  { %1223 = vmatpush1.msra.mxu0 %v4947_v54  ;;  %1294 = vmatpush1.msra.mxu1 %v5056_v16 }
 0x539   :  { %1224 = vmatprep.subr.mxu0 %v4951_v48  ;;  %1295 = vmatprep.subr.mxu1 %v5060_v50 }
 0x53a   :  { %1225 = vmatpush1.msra.mxu0 %v4955_v61  ;;  %1296 = vmatpush1.msra.mxu1 %v5064_v5 }
 0x53b   :  { %1226 = vmatprep.subr.mxu0 %v4959_v45  ;;  %1297 = vmatprep.subr.mxu1 %v5068_v7 }
 0x53c   :  { %1227 = vmatpush1.msra.mxu0 %v4963_v47  ;;  %1298 = vmatpush1.msra.mxu1 %v5072_v12 }
 0x53d   :  { %1228 = vmatprep.subr.mxu0 %v4967_v49  ;;  %1299 = vmatprep.subr.mxu1 %v5076_v10  ;;  %v3618_v49 = vld [vmem:[%s6336_s0 + $0xb0] sm:$0xff] }
 0x53e   :  { %1229 = vmatpush1.msra.mxu0 %v4971_v51  ;;  %1300 = vmatpush1.msra.mxu1 %v5080_v13 }
 0x53f   :  { %1230 = vmatprep.subr.mxu0 %v4975_v44  ;;  %1301 = vmatprep.subr.mxu1 %v5084_v14 }
 0x540   :  { %1231 = vmatpush1.msra.mxu0 %v5087_v15  ;;  %1302 = vmatpush1.msra.mxu1 %v5090_v17  ;;  %v6624_v17 = vld [vmem:[#allocation13_spill] sm:$0xff] }
 0x541   :  { %1232 = vmatprep.subr.mxu0 %v5093_v19  ;;  %1303 = vmatprep.subr.mxu1 %v5096_v9  ;;  %v6625_v15 = vld [vmem:[#allocation25_spill] sm:$0xff]  ;;  %v3616_v9 = vld [vmem:[%s6336_s0 + $0xa0] sm:$0xff] }
 0x542   :  { %1233 = vmatpush1.msra.mxu0 %v5099_v62  ;;  %1266 = vmatprep.mubr.f32.mxu0 %v6622_v3  ;;  %v3617_v62 = vld [vmem:[%s6336_s0 + $0xa8] sm:$0xff] }
 0x543   :  { %1304 = vmatpush1.msra.mxu1 %v5103_v60  ;;  %1337 = vmatprep.mubr.f32.mxu1 %v6622_v3 }
 0x544   :  { %1379 = vmatprep.subr.mxu0 %v6624_v17  ;;  %1450 = vmatprep.subr.mxu1 %v6625_v15  ;;  %v3619_v15 = vld [vmem:[%s6336_s0 + $0xb8] sm:$0xff] }
 0x5e3   :  { %v1091_v19 = vpop.f32.mrf.mxu0  ;;  %v1162_v60 = vpop.f32.mrf.mxu1 }
 0x5e4   :  { %v1167_v14 = vadd.f32 %v3616_v9, %v1091_v19  ;;  %v1169_v19 = vadd.f32 %v3618_v49, %v1162_v60 }
 0x5e5   :  { %v1093_v44 = vpop.f32.mrf.mxu0  ;;  %v1164_v17 = vpop.f32.mrf.mxu1 }
 0x5e6   :  { %v3620_v13 = vmul.f32 -1.442695, %v1167_v14  ;;  %v1168_v51 = vadd.f32 %v3617_v62, %v1093_v44  ;;  %v1170_v10 = vadd.f32 %v3619_v15, %v1164_v17 }
 0x5e8   :  { %3854 = vpow2.f32 %v3620_v13  ;;  %v3621_v3 = vmul.f32 -1.442695, %v1168_v51  ;;  %v3622_v12 = vmul.f32 -1.442695, %v1170_v10  ;;  %v1619_v10 = vld [vmem:[#allocation6 + $0x1e0] sm:$0xff] }
 0x5ea   :  { %3856 = vpow2.f32 %v3621_v3 }
 0x5eb   :  { %3858 = vpow2.f32 %v3622_v12 }
 0x5f5   :  { %v3855_v47 = vpop.eup %3854 }
 0x5f6   :  { %v1174_v9 = vadd.f32 1.0, %v3855_v47 }
 0x5f7   :  { %v3857_v14 = vpop.eup %3856 }
 0x5f8   :  { %3860 = vrcp.f32 %v1174_v9  ;;  %v1180_v44 = vadd.f32 1.0, %v3857_v14  ;;  %v3859_v51 = vpop.eup %3858  ;;  %v1616_v9 = vld [vmem:[#allocation6 + $0x1c8] sm:$0xff]  ;;  %v1618_v14 = vld [vmem:[#allocation6 + $0x1d8] sm:$0xff] }
 0x5f9   :  { %3862 = vtanh.f32 %v1169_v19  ;;  %v1187_v7 = vadd.f32 1.0, %v3859_v51  ;;  %v1621_v19 = vld [vmem:[#allocation6 + $0x1f0] sm:$0xff] }
 0x5fa   :  { %3864 = vrcp.f32 %v1180_v44  ;;  %v1615_v44 = vld [vmem:[#allocation6 + $0x1c0] sm:$0xff]  ;;  %v1617_v51 = vld [vmem:[#allocation6 + $0x1d0] sm:$0xff] }
 0x5fb   :  { %3866 = vrcp.f32 %v1187_v7 }
 0x605   :  { %v3861_v13 = vpop.eup %3860 }
 0x606   :  { %v3863_v62 = vpop.eup %3862 }
 0x607   :  { %v3865_v3 = vpop.eup %3864  ;;  %v1191_v15 = vmul.f32 %v3863_v62, %v3861_v13  ;;  %v1614_v13 = vld [vmem:[#allocation6 + $0x1b8] sm:$0xff]  ;;  %v1611_v62 = vld [vmem:[#allocation6 + $0x1a0] sm:$0xff] }
 0x608   :  { %v1190_v17 = vmul.f32 %v3865_v3, %v5004_v18  ;;  %v3867_v47 = vpop.eup %3866  ;;  %v6626_v18 = vld [vmem:[#allocation14_spill] sm:$0xff]  ;;  %v1613_v3 = vld [vmem:[#allocation6 + $0x1b0] sm:$0xff] }
 0x60a   :  { %v5122_v45 = vadd.f32 %v1191_v15, %v1190_v17  ;;  %v1608_v15 = vld [vmem:[#allocation6 + $0x188] sm:$0xff]  ;;  %v1610_v17 = vld [vmem:[#allocation6 + $0x198] sm:$0xff] }
 0x60c   :  { %3868 = vtanh.f32 %v5122_v45 }
 0x619   :  { %v3869_v49 = vpop.eup %3868 }
 0x61a   :  { %v5125_v60 = vmul.f32 %v3869_v49, %v3867_v47  ;;  %v1607_v47 = vld [vmem:[#allocation6 + $0x180] sm:$0xff]  ;;  %v1609_v49 = vld [vmem:[#allocation6 + $0x190] sm:$0xff] }
 0x61c   :  { %1267 = vmatmul.mubr.f32.vlgmr.msra.gmra.mxu0 %v5125_v60  ;;  %1338 = vmatmul.mubr.f32.vlgmr.msra.gmra.mxu1 %v5125_v60 }
 0x61d   :  { %1380 = vmatpush1.msra.mxu0 %v4831_v1  ;;  %1451 = vmatpush1.msra.mxu1 %v4834_v56  ;;  %v6627_v1 = vld [vmem:[#allocation26_spill] sm:$0xff] }
 0x61e   :  { %1381 = vmatprep.subr.mxu0 %v4837_v53  ;;  %1452 = vmatprep.subr.mxu1 %v4840_v58  ;;  %v6628_v56 = vld [vmem:[#allocation22_spill] sm:$0xff]  ;;  %v6629_v53 = vld [vmem:[#allocation19_spill] sm:$0xff] }
 0x61f   :  { %1382 = vmatpush1.msra.mxu0 %v4843_v55  ;;  %1453 = vmatpush1.msra.mxu1 %v4846_v0  ;;  %v6630_v58 = vld [vmem:[#allocation15_spill] sm:$0xff]  ;;  %v6632_v0 = vld [vmem:[#allocation24_spill] sm:$0xff] }
 0x620   :  { %1383 = vmatprep.subr.mxu0 %v4849_v52  ;;  %1454 = vmatprep.subr.mxu1 %v4852_v57  ;;  %v6631_v55 = vld [vmem:[#allocation27_spill] sm:$0xff]  ;;  %v6633_v52 = vld [vmem:[#allocation21_spill] sm:$0xff]  ;;  %v6634_v57 = vld [vmem:[#allocation16_spill] sm:$0xff] }
 0x621   :  { %1384 = vmatpush1.msra.mxu0 %v4855_v59  ;;  %1455 = vmatpush1.msra.mxu1 %v4858_v2  ;;  %v6635_v59 = vld [vmem:[#allocation28_spill] sm:$0xff]  ;;  %v6636_v2 = vld [vmem:[#allocation23_spill] sm:$0xff] }
 0x622   :  { %1385 = vmatprep.subr.mxu0 %v4861_v4  ;;  %1456 = vmatprep.subr.mxu1 %v4864_v6  ;;  %v6637_v4 = vld [vmem:[#allocation29_spill] sm:$0xff]  ;;  %v6638_v6 = vld [vmem:[#allocation12_spill] sm:$0xff] }
 0x623   :  { %1386 = vmatpush1.msra.mxu0 %v4867_v8  ;;  %1457 = vmatpush1.msra.mxu1 %v4870_v11  ;;  %v6639_v8 = vld [vmem:[#allocation31_spill] sm:$0xff]  ;;  %v6640_v11 = vld [vmem:[#allocation32_spill] sm:$0xff] }
 0x624   :  { %1387 = vmatprep.subr.mxu0 %v4873_v21  ;;  %1458 = vmatprep.subr.mxu1 %v4876_v22  ;;  %v6641_v21 = vld [vmem:[#allocation33_spill] sm:$0xff]  ;;  %v6642_v22 = vmov 0.0  }
 0x625   :  { %1388 = vmatpush1.msra.mxu0 %v4879_v23  ;;  %1459 = vmatpush1.msra.mxu1 %v4882_v24  ;;  %v1620_v23 = vld [vmem:[#allocation6 + $0x1e8] sm:$0xff]  ;;  %v1622_v24 = vld [vmem:[#allocation6 + $0x1f8] sm:$0xff] }
 0x626   :  { %1389 = vmatprep.subr.mxu0 %v4885_v25  ;;  %1460 = vmatprep.subr.mxu1 %v4888_v26  ;;  %v3623_v25 = vld [vmem:[%s6336_s0 + $0xc0] sm:$0xff] }
 0x627   :  { %1390 = vmatpush1.msra.mxu0 %v4891_v27  ;;  %1461 = vmatpush1.msra.mxu1 %v4894_v28  ;;  %v3624_v27 = vld [vmem:[%s6336_s0 + $0xc8] sm:$0xff] }
 0x628   :  { %1391 = vmatprep.subr.mxu0 %v4897_v29  ;;  %1462 = vmatprep.subr.mxu1 %v4900_v30 }
 0x629   :  { %1392 = vmatpush1.msra.mxu0 %v4903_v31  ;;  %1463 = vmatpush1.msra.mxu1 %v4906_v32 }
 0x62a   :  { %1393 = vmatprep.subr.mxu0 %v4909_v33  ;;  %1464 = vmatprep.subr.mxu1 %v4912_v34  ;;  %v3626_v34 = vld [vmem:[%s6336_s0 + $0xd8] sm:$0xff] }
 0x62b   :  { %1394 = vmatpush1.msra.mxu0 %v4915_v35  ;;  %1465 = vmatpush1.msra.mxu1 %v4918_v36 }
 0x62c   :  { %1395 = vmatprep.subr.mxu0 %v4921_v37  ;;  %1466 = vmatprep.subr.mxu1 %v4924_v38  ;;  %v3625_v37 = vld [vmem:[%s6336_s0 + $0xd0] sm:$0xff] }
 0x62d   :  { %1396 = vmatpush1.msra.mxu0 %v4927_v39  ;;  %1467 = vmatpush1.msra.mxu1 %v4930_v40 }
 0x62e   :  { %1397 = vmatprep.subr.mxu0 %v4933_v41  ;;  %1468 = vmatprep.subr.mxu1 %v4936_v42 }
 0x62f   :  { %1398 = vmatpush1.msra.mxu0 %v4939_v43  ;;  %1469 = vmatpush1.msra.mxu1 %v5048_v20 }
 0x630   :  { %1399 = vmatprep.subr.mxu0 %v4943_v46  ;;  %1470 = vmatprep.subr.mxu1 %v5052_v63 }
 0x631   :  { %1400 = vmatpush1.msra.mxu0 %v4947_v54  ;;  %1471 = vmatpush1.msra.mxu1 %v5056_v16 }
 0x632   :  { %1401 = vmatprep.subr.mxu0 %v4951_v48  ;;  %1472 = vmatprep.subr.mxu1 %v5060_v50 }
 0x633   :  { %1402 = vmatpush1.msra.mxu0 %v4955_v61  ;;  %1473 = vmatpush1.msra.mxu1 %v5064_v5 }
 0x634   :  { %1403 = vmatprep.subr.mxu0 %v6626_v18  ;;  %1474 = vmatprep.subr.mxu1 %v6627_v1  ;;  %v1604_v18 = vld [vmem:[#allocation6 + $0x168] sm:$0xff]  ;;  %v1606_v1 = vld [vmem:[#allocation6 + $0x178] sm:$0xff] }
 0x635   :  { %1404 = vmatpush1.msra.mxu0 %v6628_v56  ;;  %1475 = vmatpush1.msra.mxu1 %v6629_v53  ;;  %v1603_v56 = vld [vmem:[#allocation6 + $0x160] sm:$0xff]  ;;  %v1605_v53 = vld [vmem:[#allocation6 + $0x170] sm:$0xff] }
 0x636   :  { %1405 = vmatprep.subr.mxu0 %v6630_v58  ;;  %1476 = vmatprep.subr.mxu1 %v6631_v55  ;;  %v1600_v58 = vld [vmem:[#allocation6 + $0x148] sm:$0xff]  ;;  %v1602_v55 = vld [vmem:[#allocation6 + $0x158] sm:$0xff] }
 0x637   :  { %1406 = vmatpush1.msra.mxu0 %v6632_v0  ;;  %1477 = vmatpush1.msra.mxu1 %v6633_v52  ;;  %v1599_v0 = vld [vmem:[#allocation6 + $0x140] sm:$0xff]  ;;  %v1601_v52 = vld [vmem:[#allocation6 + $0x150] sm:$0xff] }
 0x638   :  { %1407 = vmatprep.subr.mxu0 %v6634_v57  ;;  %1478 = vmatprep.subr.mxu1 %v6635_v59  ;;  %v1596_v57 = vld [vmem:[#allocation6 + $0x128] sm:$0xff]  ;;  %v1598_v59 = vld [vmem:[#allocation6 + $0x138] sm:$0xff] }
 0x639   :  { %1408 = vmatpush1.msra.mxu0 %v6636_v2  ;;  %1479 = vmatpush1.msra.mxu1 %v6637_v4  ;;  %v1595_v2 = vld [vmem:[#allocation6 + $0x120] sm:$0xff]  ;;  %v1597_v4 = vld [vmem:[#allocation6 + $0x130] sm:$0xff] }
 0x63a   :  { %1409 = vmatprep.subr.mxu0 %v6638_v6  ;;  %1480 = vmatprep.subr.mxu1 %v6639_v8  ;;  %v1592_v6 = vld [vmem:[#allocation6 + $0x108] sm:$0xff]  ;;  %v1594_v8 = vld [vmem:[#allocation6 + $0x118] sm:$0xff] }
 0x63b   :  { %1410 = vmatpush1.msra.mxu0 %v6640_v11  ;;  %1481 = vmatpush1.msra.mxu1 %v6641_v21  ;;  %v1591_v11 = vld [vmem:[#allocation6 + $0x100] sm:$0xff]  ;;  %v1593_v21 = vld [vmem:[#allocation6 + $0x110] sm:$0xff] }
 0x63c   :  { %1443 = vmatprep.mubr.f32.mxu0 %v6642_v22  ;;  %1514 = vmatprep.mubr.f32.mxu1 %v6642_v22 }
 0x63d   :  { %1645 = vmatprep.subr.mxu0 %v1620_v23  ;;  %1758 = vmatprep.subr.mxu1 %v1622_v24  ;;  %v1588_v23 = vld [vmem:[#allocation6 + $0xe8] sm:$0xff]  ;;  %v1590_v24 = vld [vmem:[#allocation6 + $0xf8] sm:$0xff] }
 0x6dc   :  { %v1268_v26 = vpop.f32.mrf.mxu0  ;;  %v1339_v32 = vpop.f32.mrf.mxu1 }
 0x6dd   :  { %v1344_v28 = vadd.f32 %v3623_v25, %v1268_v26  ;;  %v1346_v40 = vadd.f32 %v3625_v37, %v1339_v32  ;;  %v1587_v25 = vld [vmem:[#allocation6 + $0xe0] sm:$0xff]  ;;  %v1589_v26 = vld [vmem:[#allocation6 + $0xf0] sm:$0xff]  ;;  %v1582_v32 = vld [vmem:[#allocation6 + $0xb8] sm:$0xff] }
 0x6de   :  { %v1270_v29 = vpop.f32.mrf.mxu0  ;;  %v1341_v35 = vpop.f32.mrf.mxu1  ;;  %v1575_v37 = vld [vmem:[#allocation6 + $0x80] sm:$0xff] }
 0x6df   :  { %v3627_v30 = vmul.f32 -1.442695, %v1344_v28  ;;  %v1345_v31 = vadd.f32 %v3624_v27, %v1270_v29  ;;  %v1347_v36 = vadd.f32 %v3626_v34, %v1341_v35  ;;  %v1584_v27 = vld [vmem:[#allocation6 + $0xc8] sm:$0xff]  ;;  %v1586_v28 = vld [vmem:[#allocation6 + $0xd8] sm:$0xff]  ;;  %v1583_v29 = vld [vmem:[#allocation6 + $0xc0] sm:$0xff] }
 0x6e0   :  { %v1581_v34 = vld [vmem:[#allocation6 + $0xb0] sm:$0xff]  ;;  %v1576_v35 = vld [vmem:[#allocation6 + $0x88] sm:$0xff] }
 0x6e1   :  { %3870 = vpow2.f32 %v3627_v30  ;;  %v3628_v33 = vmul.f32 -1.442695, %v1345_v31  ;;  %v3629_v38 = vmul.f32 -1.442695, %v1347_v36  ;;  %v1585_v30 = vld [vmem:[#allocation6 + $0xd0] sm:$0xff]  ;;  %v1580_v31 = vld [vmem:[#allocation6 + $0xa8] sm:$0xff] }
 0x6e2   :  { %v1578_v36 = vld [vmem:[#allocation6 + $0x98] sm:$0xff] }
 0x6e3   :  { %3872 = vpow2.f32 %v3628_v33  ;;  %v1579_v33 = vld [vmem:[#allocation6 + $0xa0] sm:$0xff] }
 0x6e4   :  { %3874 = vpow2.f32 %v3629_v38  ;;  %v1577_v38 = vld [vmem:[#allocation6 + $0x90] sm:$0xff] }
 0x6ee   :  { %v3871_v39 = vpop.eup %3870 }
 0x6ef   :  { %v1351_v41 = vadd.f32 1.0, %v3871_v39  ;;  %v1572_v39 = vld [vmem:[#allocation6 + $0x68] sm:$0xff] }
 0x6f0   :  { %v3873_v42 = vpop.eup %3872 }
 0x6f1   :  { %3876 = vrcp.f32 %v1351_v41  ;;  %v1357_v43 = vadd.f32 1.0, %v3873_v42  ;;  %v3875_v46 = vpop.eup %3874  ;;  %v1571_v41 = vld [vmem:[#allocation6 + $0x60] sm:$0xff]  ;;  %v1573_v42 = vld [vmem:[#allocation6 + $0x70] sm:$0xff] }
 0x6f2   :  { %3878 = vtanh.f32 %v1346_v40  ;;  %v1364_v20 = vadd.f32 1.0, %v3875_v46  ;;  %v1574_v40 = vld [vmem:[#allocation6 + $0x78] sm:$0xff] }
 0x6f3   :  { %3880 = vrcp.f32 %v1357_v43  ;;  %v1568_v43 = vld [vmem:[#allocation6 + $0x48] sm:$0xff]  ;;  %v1570_v46 = vld [vmem:[#allocation6 + $0x58] sm:$0xff] }
 0x6f4   :  { %3882 = vrcp.f32 %v1364_v20  ;;  %v1566_v20 = vld [vmem:[#allocation6 + $0x38] sm:$0xff] }
 0x6fe   :  { %v3877_v54 = vpop.eup %3876 }
 0x6ff   :  { %v3879_v48 = vpop.eup %3878 }
 0x700   :  { %v3881_v61 = vpop.eup %3880  ;;  %v1368_v63 = vmul.f32 %v3879_v48, %v3877_v54  ;;  %v1567_v54 = vld [vmem:[#allocation6 + $0x40] sm:$0xff]  ;;  %v1569_v48 = vld [vmem:[#allocation6 + $0x50] sm:$0xff] }
 0x701   :  { %v1367_v16 = vmul.f32 %v3881_v61, %v5122_v45  ;;  %v3883_v5 = vpop.eup %3882  ;;  %v1612_v45 = vld [vmem:[#allocation6 + $0x1a8] sm:$0xff] }
 0x702   :  { %v1564_v61 = vld [vmem:[#allocation6 + $0x28] sm:$0xff] }
 0x703   :  { %v5206_v50 = vadd.f32 %v1368_v63, %v1367_v16  ;;  %v1563_v63 = vld [vmem:[#allocation6 + $0x20] sm:$0xff]  ;;  %v1565_v16 = vld [vmem:[#allocation6 + $0x30] sm:$0xff] }
 0x705   :  { %3884 = vtanh.f32 %v5206_v50 }
 0x712   :  { %v3885_v7 = vpop.eup %3884 }
 0x713   :  { %v5209_v12 = vmul.f32 %v3885_v7, %v3883_v5  ;;  %v1560_v5 = vld [vmem:[#allocation6 + $0x8] sm:$0xff]  ;;  %v1562_v7 = vld [vmem:[#allocation6 + $0x18] sm:$0xff] }
 0x715   :  { %1444 = vmatmul.mubr.f32.vlgmr.msra.gmra.mxu0 %v5209_v12  ;;  %1515 = vmatmul.mubr.f32.vlgmr.msra.gmra.mxu1 %v5209_v12 }
 0x716   :  { %1646 = vmatpush1.msra.mxu0 %v1619_v10  ;;  %1759 = vmatpush1.msra.mxu1 %v1621_v19  ;;  %v1559_v10 = vld [vmem:[#allocation6] sm:$0xff]  ;;  %v1561_v19 = vld [vmem:[#allocation6 + $0x10] sm:$0xff] }
 0x717   :  { %1647 = vmatprep.subr.mxu0 %v1616_v9  ;;  %1760 = vmatprep.subr.mxu1 %v1618_v14  ;;  %v6643_v9 = vld [vmem:[#allocation30_spill] sm:$0xff] }
 0x718   :  { %1648 = vmatpush1.msra.mxu0 %v1615_v44  ;;  %1761 = vmatpush1.msra.mxu1 %v1617_v51  ;;  %v6644_v14 = vld [vmem:[#allocation18_spill] sm:$0xff]  ;;  %v6645_v44 = vld [vmem:[#allocation11_spill] sm:$0xff]  ;;  %v6646_v51 = vld [vmem:[#allocation20_spill] sm:$0xff] }
 0x719   :  { %1649 = vmatprep.subr.mxu0 %v1612_v45  ;;  %1762 = vmatprep.subr.mxu1 %v1614_v13  ;;  %v6647_v45 = vld [vmem:[#allocation17_spill] sm:$0xff]  ;;  %v5243_v13 = vld [vmem:[#allocation8 + $0x1e8] sm:$0xff] }
 0x71a   :  { %1650 = vmatpush1.msra.mxu0 %v1611_v62  ;;  %1763 = vmatpush1.msra.mxu1 %v1613_v3  ;;  %6648 = vst [vmem:[#allocation13_spill] sm:$0xff] %v5243_v13  ;;  %v5245_v62 = vld [vmem:[#allocation8 + $0x1f8] sm:$0xff]  ;;  %v5248_v3 = vld [vmem:[#allocation8 + $0x1e0] sm:$0xff] }
 0x71b   :  { %1651 = vmatprep.subr.mxu0 %v1608_v15  ;;  %1764 = vmatprep.subr.mxu1 %v1610_v17  ;;  %6649 = vst [vmem:[#allocation25_spill] sm:$0xff] %v5245_v62  ;;  %v5254_v15 = vld [vmem:[#allocation8 + $0x1c8] sm:$0xff]  ;;  %v5260_v17 = vld [vmem:[#allocation8 + $0x1c0] sm:$0xff] }
 0x71c   :  { %1652 = vmatpush1.msra.mxu0 %v1607_v47  ;;  %1765 = vmatpush1.msra.mxu1 %v1609_v49  ;;  %v5263_v47 = vld [vmem:[#allocation8 + $0x1d0] sm:$0xff]  ;;  %v5266_v49 = vld [vmem:[#allocation8 + $0x1a8] sm:$0xff] }
 0x71d   :  { %1653 = vmatprep.subr.mxu0 %v1604_v18  ;;  %1766 = vmatprep.subr.mxu1 %v1606_v1  ;;  %v5269_v18 = vld [vmem:[#allocation8 + $0x1b8] sm:$0xff]  ;;  %v5272_v1 = vld [vmem:[#allocation8 + $0x1a0] sm:$0xff] }
 0x71e   :  { %1654 = vmatpush1.msra.mxu0 %v1603_v56  ;;  %1767 = vmatpush1.msra.mxu1 %v1605_v53  ;;  %v5275_v56 = vld [vmem:[#allocation8 + $0x1b0] sm:$0xff]  ;;  %v5278_v53 = vld [vmem:[#allocation8 + $0x188] sm:$0xff] }
 0x71f   :  { %1655 = vmatprep.subr.mxu0 %v1600_v58  ;;  %1768 = vmatprep.subr.mxu1 %v1602_v55  ;;  %v5281_v58 = vld [vmem:[#allocation8 + $0x198] sm:$0xff]  ;;  %v5284_v55 = vld [vmem:[#allocation8 + $0x180] sm:$0xff] }
 0x720   :  { %1656 = vmatpush1.msra.mxu0 %v1599_v0  ;;  %1769 = vmatpush1.msra.mxu1 %v1601_v52  ;;  %v5287_v0 = vld [vmem:[#allocation8 + $0x190] sm:$0xff]  ;;  %v5290_v52 = vld [vmem:[#allocation8 + $0x168] sm:$0xff] }
 0x721   :  { %1657 = vmatprep.subr.mxu0 %v1596_v57  ;;  %1770 = vmatprep.subr.mxu1 %v1598_v59  ;;  %v5293_v57 = vld [vmem:[#allocation8 + $0x178] sm:$0xff]  ;;  %v5296_v59 = vld [vmem:[#allocation8 + $0x160] sm:$0xff] }
 0x722   :  { %1658 = vmatpush1.msra.mxu0 %v1595_v2  ;;  %1771 = vmatpush1.msra.mxu1 %v1597_v4  ;;  %v5299_v2 = vld [vmem:[#allocation8 + $0x170] sm:$0xff]  ;;  %v5302_v4 = vld [vmem:[#allocation8 + $0x148] sm:$0xff] }
 0x723   :  { %1659 = vmatprep.subr.mxu0 %v1592_v6  ;;  %1772 = vmatprep.subr.mxu1 %v1594_v8  ;;  %v5305_v6 = vld [vmem:[#allocation8 + $0x158] sm:$0xff]  ;;  %v5308_v8 = vld [vmem:[#allocation8 + $0x140] sm:$0xff] }
 0x724   :  { %1660 = vmatpush1.msra.mxu0 %v1591_v11  ;;  %1773 = vmatpush1.msra.mxu1 %v1593_v21  ;;  %v5311_v11 = vld [vmem:[#allocation8 + $0x150] sm:$0xff]  ;;  %v5314_v21 = vld [vmem:[#allocation8 + $0x128] sm:$0xff] }
 0x725   :  { %1661 = vmatprep.subr.mxu0 %v1588_v23  ;;  %1774 = vmatprep.subr.mxu1 %v1590_v24  ;;  %v5317_v23 = vld [vmem:[#allocation8 + $0x138] sm:$0xff]  ;;  %v5320_v24 = vld [vmem:[#allocation8 + $0x120] sm:$0xff] }
 0x726   :  { %1662 = vmatpush1.msra.mxu0 %v1587_v25  ;;  %1775 = vmatpush1.msra.mxu1 %v1589_v26  ;;  %v5323_v25 = vld [vmem:[#allocation8 + $0x130] sm:$0xff]  ;;  %v5326_v26 = vld [vmem:[#allocation8 + $0x108] sm:$0xff] }
 0x727   :  { %1663 = vmatprep.subr.mxu0 %v1584_v27  ;;  %1776 = vmatprep.subr.mxu1 %v1586_v28  ;;  %v5329_v27 = vld [vmem:[#allocation8 + $0x118] sm:$0xff]  ;;  %v5332_v28 = vld [vmem:[#allocation8 + $0x100] sm:$0xff] }
 0x728   :  { %1664 = vmatpush1.msra.mxu0 %v1583_v29  ;;  %1777 = vmatpush1.msra.mxu1 %v1585_v30  ;;  %v5335_v29 = vld [vmem:[#allocation8 + $0x110] sm:$0xff]  ;;  %v5338_v30 = vld [vmem:[#allocation8 + $0xe8] sm:$0xff] }
 0x729   :  { %1665 = vmatprep.subr.mxu0 %v1580_v31  ;;  %1778 = vmatprep.subr.mxu1 %v1582_v32  ;;  %v5341_v31 = vld [vmem:[#allocation8 + $0xf8] sm:$0xff]  ;;  %v5344_v32 = vld [vmem:[#allocation8 + $0xe0] sm:$0xff] }
 0x72a   :  { %1666 = vmatpush1.msra.mxu0 %v1579_v33  ;;  %1779 = vmatpush1.msra.mxu1 %v1581_v34  ;;  %v5347_v33 = vld [vmem:[#allocation8 + $0xf0] sm:$0xff]  ;;  %v5350_v34 = vld [vmem:[#allocation8 + $0xc8] sm:$0xff] }
 0x72b   :  { %1667 = vmatprep.subr.mxu0 %v1576_v35  ;;  %1780 = vmatprep.subr.mxu1 %v1578_v36  ;;  %v5353_v35 = vld [vmem:[#allocation8 + $0xd8] sm:$0xff]  ;;  %v5356_v36 = vld [vmem:[#allocation8 + $0xc0] sm:$0xff] }
 0x72c   :  { %1668 = vmatpush1.msra.mxu0 %v1575_v37  ;;  %1781 = vmatpush1.msra.mxu1 %v1577_v38  ;;  %v5359_v37 = vld [vmem:[#allocation8 + $0xd0] sm:$0xff]  ;;  %v5362_v38 = vld [vmem:[#allocation8 + $0xa8] sm:$0xff] }
 0x72d   :  { %1669 = vmatprep.subr.mxu0 %v1572_v39  ;;  %1782 = vmatprep.subr.mxu1 %v1574_v40  ;;  %v5365_v39 = vld [vmem:[#allocation8 + $0xb8] sm:$0xff]  ;;  %v5368_v40 = vld [vmem:[#allocation8 + $0xa0] sm:$0xff] }
 0x72e   :  { %1670 = vmatpush1.msra.mxu0 %v1571_v41  ;;  %1783 = vmatpush1.msra.mxu1 %v1573_v42  ;;  %v5371_v41 = vld [vmem:[#allocation8 + $0xb0] sm:$0xff]  ;;  %v5374_v42 = vld [vmem:[#allocation8 + $0x88] sm:$0xff] }
 0x72f   :  { %1671 = vmatprep.subr.mxu0 %v1568_v43  ;;  %1784 = vmatprep.subr.mxu1 %v1570_v46  ;;  %6650 = vst [vmem:[#allocation14_spill] sm:$0xff] %v5371_v41  ;;  %6651 = vst [vmem:[#allocation26_spill] sm:$0xff] %v5374_v42  ;;  %v5377_v43 = vld [vmem:[#allocation8 + $0x98] sm:$0xff]  ;;  %v5380_v46 = vld [vmem:[#allocation8 + $0x80] sm:$0xff] }
 0x730   :  { %1672 = vmatpush1.msra.mxu0 %v1567_v54  ;;  %1785 = vmatpush1.msra.mxu1 %v1569_v48  ;;  %6652 = vst [vmem:[#allocation22_spill] sm:$0xff] %v5377_v43  ;;  %6653 = vst [vmem:[#allocation19_spill] sm:$0xff] %v5380_v46  ;;  %v5383_v54 = vld [vmem:[#allocation8 + $0x90] sm:$0xff]  ;;  %v5386_v48 = vld [vmem:[#allocation8 + $0x68] sm:$0xff] }
 0x731   :  { %1673 = vmatprep.subr.mxu0 %v1564_v61  ;;  %1786 = vmatprep.subr.mxu1 %v1566_v20  ;;  %6654 = vst [vmem:[#allocation15_spill] sm:$0xff] %v5383_v54  ;;  %6655 = vst [vmem:[#allocation27_spill] sm:$0xff] %v5386_v48  ;;  %v5389_v61 = vld [vmem:[#allocation8 + $0x78] sm:$0xff]  ;;  %v5392_v20 = vld [vmem:[#allocation8 + $0x60] sm:$0xff] }
 0x732   :  { %1674 = vmatpush1.msra.mxu0 %v1563_v63  ;;  %1787 = vmatpush1.msra.mxu1 %v1565_v16  ;;  %6656 = vst [vmem:[#allocation24_spill] sm:$0xff] %v5389_v61  ;;  %6657 = vst [vmem:[#allocation21_spill] sm:$0xff] %v5392_v20  ;;  %v5395_v63 = vld [vmem:[#allocation8 + $0x70] sm:$0xff]  ;;  %v5398_v16 = vld [vmem:[#allocation8 + $0x48] sm:$0xff] }
 0x733   :  { %1675 = vmatprep.subr.mxu0 %v1560_v5  ;;  %1788 = vmatprep.subr.mxu1 %v1562_v7  ;;  %6658 = vst [vmem:[#allocation16_spill] sm:$0xff] %v5395_v63  ;;  %6659 = vst [vmem:[#allocation28_spill] sm:$0xff] %v5398_v16  ;;  %v5401_v5 = vld [vmem:[#allocation8 + $0x58] sm:$0xff]  ;;  %v5404_v7 = vld [vmem:[#allocation8 + $0x40] sm:$0xff] }
 0x734   :  { %1676 = vmatpush1.msra.mxu0 %v1559_v10  ;;  %1709 = vmatprep.mubr.f32.mxu0 %v6642_v22  ;;  %6660 = vst [vmem:[#allocation23_spill] sm:$0xff] %v5401_v5  ;;  %6661 = vst [vmem:[#allocation29_spill] sm:$0xff] %v5404_v7  ;;  %v5407_v10 = vld [vmem:[#allocation8 + $0x50] sm:$0xff] }
 0x735   :  { %1789 = vmatpush1.msra.mxu1 %v1561_v19  ;;  %1822 = vmatprep.mubr.f32.mxu1 %v6642_v22  ;;  %6662 = vst [vmem:[#allocation12_spill] sm:$0xff] %v5407_v10  ;;  %v5410_v19 = vld [vmem:[#allocation8 + $0x28] sm:$0xff] }
 0x736   :  { %1710 = vmatmul.mubr.f32.vlgmr.msra.gmra.mxu0 %v6643_v9  ;;  %1823 = vmatmul.mubr.f32.vlgmr.msra.gmra.mxu1 %v6643_v9  ;;  %6663 = vst [vmem:[#allocation31_spill] sm:$0xff] %v5410_v19  ;;  %v5413_v9 = vld [vmem:[#allocation8 + $0x38] sm:$0xff] }
 0x737   :  { %1715 = vmatprep.mubr.f32.mxu0 %v6642_v22  ;;  %1828 = vmatprep.mubr.f32.mxu1 %v6642_v22  ;;  %6664 = vst [vmem:[#allocation32_spill] sm:$0xff] %v5413_v9 }
 0x738   :  { %1974 = vmatprep.subr.mxu0 %v5243_v13  ;;  %2045 = vmatprep.subr.mxu1 %v5245_v62 }
 0x739   :  { %1975 = vmatpush1.msra.mxu0 %v5248_v3 }
 0x73a   :  { %1716 = vmatmul.mubr.f32.gmra.mxu0 %v6644_v14  ;;  %1829 = vmatmul.mubr.f32.gmra.mxu1 %v6644_v14  ;;  %v5416_v14 = vld [vmem:[#allocation8 + $0x20] sm:$0xff] }
 0x73b   :  { %1721 = vmatprep.mubr.f32.mxu0 %v6642_v22  ;;  %1834 = vmatprep.mubr.f32.mxu1 %v6642_v22  ;;  %6665 = vst [vmem:[#allocation33_spill] sm:$0xff] %v5416_v14 }
 0x73c   :  { %1976 = vmatprep.subr.mxu0 %v5254_v15 }
 0x73d   :  { %1977 = vmatpush1.msra.mxu0 %v5260_v17 }
 0x73e   :  { %1722 = vmatmul.mubr.f32.gmra.mxu0 %v6645_v44  ;;  %1835 = vmatmul.mubr.f32.gmra.mxu1 %v6645_v44  ;;  %v5419_v44 = vld [vmem:[#allocation8 + $0x30] sm:$0xff] }
 0x73f   :  { %1727 = vmatprep.mubr.f32.mxu0 %v6642_v22  ;;  %1840 = vmatprep.mubr.f32.mxu1 %v6642_v22  ;;  %6666 = vst [vmem:[#allocation30_spill] sm:$0xff] %v5419_v44 }
 0x740   :  { %1978 = vmatprep.subr.mxu0 %v5266_v49 }
 0x741   :  { %1979 = vmatpush1.msra.mxu0 %v5272_v1 }
 0x742   :  { %1728 = vmatmul.mubr.f32.gmra.mxu0 %v6646_v51  ;;  %1841 = vmatmul.mubr.f32.gmra.mxu1 %v6646_v51  ;;  %v5422_v51 = vld [vmem:[#allocation8 + $0x8] sm:$0xff] }
 0x743   :  { %1733 = vmatprep.mubr.f32.mxu0 %v6642_v22  ;;  %1846 = vmatprep.mubr.f32.mxu1 %v6642_v22  ;;  %6667 = vst [vmem:[#allocation18_spill] sm:$0xff] %v5422_v51 }
 0x744   :  { %1980 = vmatprep.subr.mxu0 %v5278_v53 }
 0x745   :  { %1981 = vmatpush1.msra.mxu0 %v5284_v55 }
 0x746   :  { %1734 = vmatmul.mubr.f32.gmra.mxu0 %v6647_v45  ;;  %1847 = vmatmul.mubr.f32.gmra.mxu1 %v6647_v45  ;;  %v5425_v45 = vld [vmem:[#allocation8] sm:$0xff] }
 0x747   :  { %1739 = vmatprep.mubr.f32.mxu0 %v6642_v22  ;;  %1852 = vmatprep.mubr.f32.mxu1 %v6642_v22  ;;  %6668 = vst [vmem:[#allocation11_spill] sm:$0xff] %v5425_v45 }
 0x748   :  { %1982 = vmatprep.subr.mxu0 %v5290_v52 }
 0x749   :  { %1983 = vmatpush1.msra.mxu0 %v5296_v59 }
 0x74a   :  { %1740 = vmatmul.mubr.f32.gmra.mxu0 %v5125_v60  ;;  %1853 = vmatmul.mubr.f32.gmra.mxu1 %v5125_v60  ;;  %v5251_v60 = vld [vmem:[#allocation8 + $0x1f0] sm:$0xff] }
 0x74b   :  { %1745 = vmatprep.mubr.f32.mxu0 %v6642_v22  ;;  %1858 = vmatprep.mubr.f32.mxu1 %v6642_v22 }
 0x74c   :  { %2046 = vmatpush1.msra.mxu1 %v5251_v60  ;;  %1984 = vmatprep.subr.mxu0 %v5302_v4 }
 0x74d   :  { %1985 = vmatpush1.msra.mxu0 %v5308_v8 }
 0x74e   :  { %1746 = vmatmul.mubr.f32.gmra.mxu0 %v5209_v12  ;;  %1859 = vmatmul.mubr.f32.gmra.mxu1 %v5209_v12  ;;  %v5257_v12 = vld [vmem:[#allocation8 + $0x1d8] sm:$0xff] }
 0x74f   :  { %1751 = vmatprep.mubr.f32.mxu0 %v6642_v22  ;;  %1864 = vmatprep.mubr.f32.mxu1 %v6642_v22 }
 0x750   :  { %2047 = vmatprep.subr.mxu1 %v5257_v12  ;;  %1986 = vmatprep.subr.mxu0 %v5314_v21 }
 0x751   :  { %2048 = vmatpush1.msra.mxu1 %v5263_v47  ;;  %1987 = vmatpush1.msra.mxu0 %v5320_v24 }
 0x752   :  { %2049 = vmatprep.subr.mxu1 %v5269_v18  ;;  %1988 = vmatprep.subr.mxu0 %v5326_v26 }
 0x753   :  { %2050 = vmatpush1.msra.mxu1 %v5275_v56  ;;  %1989 = vmatpush1.msra.mxu0 %v5332_v28 }
 0x754   :  { %2051 = vmatprep.subr.mxu1 %v5281_v58  ;;  %1990 = vmatprep.subr.mxu0 %v5338_v30 }
 0x755   :  { %2052 = vmatpush1.msra.mxu1 %v5287_v0  ;;  %1991 = vmatpush1.msra.mxu0 %v5344_v32 }
 0x756   :  { %2053 = vmatprep.subr.mxu1 %v5293_v57  ;;  %1992 = vmatprep.subr.mxu0 %v5350_v34 }
 0x757   :  { %2054 = vmatpush1.msra.mxu1 %v5299_v2  ;;  %1993 = vmatpush1.msra.mxu0 %v5356_v36 }
 0x758   :  { %2055 = vmatprep.subr.mxu1 %v5305_v6  ;;  %1994 = vmatprep.subr.mxu0 %v5362_v38 }
 0x759   :  { %2056 = vmatpush1.msra.mxu1 %v5311_v11  ;;  %1995 = vmatpush1.msra.mxu0 %v5368_v40 }
 0x75a   :  { %2057 = vmatprep.subr.mxu1 %v5317_v23  ;;  %1996 = vmatprep.subr.mxu0 %v5374_v42 }
 0x75b   :  { %2058 = vmatpush1.msra.mxu1 %v5323_v25  ;;  %1997 = vmatpush1.msra.mxu0 %v5380_v46 }
 0x75c   :  { %2059 = vmatprep.subr.mxu1 %v5329_v27  ;;  %1998 = vmatprep.subr.mxu0 %v5386_v48 }
 0x75d   :  { %2060 = vmatpush1.msra.mxu1 %v5335_v29  ;;  %1999 = vmatpush1.msra.mxu0 %v5392_v20 }
 0x75e   :  { %2061 = vmatprep.subr.mxu1 %v5341_v31  ;;  %2000 = vmatprep.subr.mxu0 %v5398_v16 }
 0x75f   :  { %2062 = vmatpush1.msra.mxu1 %v5347_v33  ;;  %2001 = vmatpush1.msra.mxu0 %v5404_v7  ;;  %v5427_v7 = vld [vmem:[#allocation8 + $0x18] sm:$0xff] }
 0x760   :  { %2063 = vmatprep.subr.mxu1 %v5353_v35  ;;  %2002 = vmatprep.subr.mxu0 %v5410_v19  ;;  %6669 = vst [vmem:[#allocation20_spill] sm:$0xff] %v5427_v7  ;;  %v5431_v19 = vld [vmem:[#allocation8 + $0x10] sm:$0xff] }
 0x761   :  { %2064 = vmatpush1.msra.mxu1 %v5359_v37  ;;  %2003 = vmatpush1.msra.mxu0 %v5416_v14  ;;  %6670 = vst [vmem:[#allocation17_spill] sm:$0xff] %v5431_v19 }
 0x762   :  { %2065 = vmatprep.subr.mxu1 %v5365_v39  ;;  %2004 = vmatprep.subr.mxu0 %v5422_v51  ;;  %v3631_v51 = vld [vmem:[%s6336_s0 + $0xe8] sm:$0xff] }
 0x763   :  { %2066 = vmatpush1.msra.mxu1 %v5371_v41  ;;  %2005 = vmatpush1.msra.mxu0 %v5425_v45 }
 0x764   :  { %2067 = vmatprep.subr.mxu1 %v5377_v43  ;;  %2151 = vmatprep.subr.mxu0 %v5243_v13 }
 0x765   :  { %2068 = vmatpush1.msra.mxu1 %v5383_v54 }
 0x766   :  { %2069 = vmatprep.subr.mxu1 %v5389_v61 }
 0x767   :  { %2070 = vmatpush1.msra.mxu1 %v5395_v63  ;;  %v3632_v63 = vld [vmem:[%s6336_s0 + $0xf0] sm:$0xff] }
 0x768   :  { %2071 = vmatprep.subr.mxu1 %v5401_v5 }
 0x769   :  { %2072 = vmatpush1.msra.mxu1 %v5407_v10 }
 0x76a   :  { %2073 = vmatprep.subr.mxu1 %v5413_v9 }
 0x76b   :  { %2074 = vmatpush1.msra.mxu1 %v5419_v44  ;;  %v3630_v44 = vld [vmem:[%s6336_s0 + $0xe0] sm:$0xff] }
 0x76c   :  { %2075 = vmatprep.subr.mxu1 %v5427_v7 }
 0x76d   :  { %2076 = vmatpush1.msra.mxu1 %v5431_v19 }
 0x76e   :  { %2222 = vmatprep.subr.mxu1 %v5245_v62  ;;  %v3633_v62 = vld [vmem:[%s6336_s0 + $0xf8] sm:$0xff] }
 0x7d5   :  { %v1445_v14 = vpop.f32.mrf.mxu0  ;;  %v1516_v45 = vpop.f32.mrf.mxu1 }
 0x7d6   :  { %v1521_v7 = vadd.f32 %v3630_v44, %v1445_v14  ;;  %v1523_v14 = vadd.f32 %v3632_v63, %v1516_v45  ;;  %v6675_v45 = vld [vmem:[#allocation16_spill] sm:$0xff] }
 0x7d7   :  { %v1447_v9 = vpop.f32.mrf.mxu0  ;;  %v1518_v13 = vpop.f32.mrf.mxu1 }
 0x7d8   :  { %v3634_v10 = vmul.f32 -1.442695, %v1521_v7  ;;  %v1522_v5 = vadd.f32 %v3631_v51, %v1447_v9  ;;  %v1524_v16 = vadd.f32 %v3633_v62, %v1518_v13 }
 0x7da   :  { %3886 = vpow2.f32 %v3634_v10  ;;  %v3635_v19 = vmul.f32 -1.442695, %v1522_v5  ;;  %v3636_v20 = vmul.f32 -1.442695, %v1524_v16 }
 0x7dc   :  { %3888 = vpow2.f32 %v3635_v19 }
 0x7dd   :  { %3890 = vpow2.f32 %v3636_v20  ;;  %v6674_v20 = vld [vmem:[#allocation21_spill] sm:$0xff] }
 0x7e7   :  { %v3887_v61 = vpop.eup %3886 }
 0x7e8   :  { %v1528_v44 = vadd.f32 1.0, %v3887_v61 }
 0x7e9   :  { %v3889_v7 = vpop.eup %3888 }
 0x7ea   :  { %3892 = vrcp.f32 %v1528_v44  ;;  %v1534_v10 = vadd.f32 1.0, %v3889_v7  ;;  %v3891_v5 = vpop.eup %3890  ;;  %v6677_v44 = vld [vmem:[#allocation23_spill] sm:$0xff]  ;;  %v6678_v7 = vld [vmem:[#allocation29_spill] sm:$0xff] }
 0x7eb   :  { %3894 = vtanh.f32 %v1523_v14  ;;  %v1541_v48 = vadd.f32 1.0, %v3891_v5  ;;  %v6676_v14 = vld [vmem:[#allocation28_spill] sm:$0xff]  ;;  %v6680_v5 = vld [vmem:[#allocation31_spill] sm:$0xff] }
 0x7ec   :  { %3896 = vrcp.f32 %v1534_v10  ;;  %v6679_v10 = vld [vmem:[#allocation12_spill] sm:$0xff] }
 0x7ed   :  { %3898 = vrcp.f32 %v1541_v48  ;;  %v6673_v48 = vld [vmem:[#allocation24_spill] sm:$0xff] }
 0x7f7   :  { %v3893_v19 = vpop.eup %3892 }
 0x7f8   :  { %v3895_v9 = vpop.eup %3894 }
 0x7f9   :  { %v3897_v51 = vpop.eup %3896  ;;  %v1545_v13 = vmul.f32 %v3895_v9, %v3893_v19  ;;  %v6681_v19 = vld [vmem:[#allocation32_spill] sm:$0xff]  ;;  %v6682_v9 = vld [vmem:[#allocation33_spill] sm:$0xff] }
 0x7fa   :  { %v1544_v62 = vmul.f32 %v3897_v51, %v5206_v50  ;;  %v3899_v16 = vpop.eup %3898  ;;  %v6671_v50 = vld [vmem:[#allocation15_spill] sm:$0xff]  ;;  %v6683_v51 = vld [vmem:[#allocation30_spill] sm:$0xff] }
 0x7fc   :  { %v1546_v54 = vadd.f32 %v1545_v13, %v1544_v62  ;;  %v6684_v13 = vld [vmem:[#allocation18_spill] sm:$0xff]  ;;  %v6685_v62 = vld [vmem:[#allocation20_spill] sm:$0xff] }
 0x7fe   :  { %3900 = vtanh.f32 %v1546_v54  ;;  %v6672_v54 = vld [vmem:[#allocation27_spill] sm:$0xff] }
 0x80b   :  { %v3901_v63 = vpop.eup %3900 }
 0x80c   :  { %v1548_v61 = vmul.f32 %v3901_v63, %v3899_v16  ;;  %v6686_v16 = vld [vmem:[#allocation11_spill] sm:$0xff]  ;;  %v6687_v63 = vld [vmem:[#allocation17_spill] sm:$0xff] }
 0x80e   :  { %1752 = vmatmul.mubr.f32.gmra.mxu0 %v1548_v61  ;;  %1865 = vmatmul.mubr.f32.gmra.mxu1 %v1548_v61  ;;  %v6688_v61 = vld [vmem:[#allocation13_spill] sm:$0xff] }
 0x80f   :  { %2038 = vmatprep.mubr.f32.mxu0 %v6642_v22  ;;  %2109 = vmatprep.mubr.f32.mxu1 %v6642_v22 }
 0x812   :  { %2039 = vmatmul.mubr.f32.vlgmr.msra.gmra.mxu0 %v6642_v22  ;;  %2110 = vmatmul.mubr.f32.vlgmr.msra.gmra.mxu1 %v6642_v22 }
 0x813   :  { %2152 = vmatpush1.msra.mxu0 %v5248_v3  ;;  %2223 = vmatpush1.msra.mxu1 %v5251_v60 }
 0x814   :  { %2153 = vmatprep.subr.mxu0 %v5254_v15  ;;  %2224 = vmatprep.subr.mxu1 %v5257_v12 }
 0x815   :  { %2154 = vmatpush1.msra.mxu0 %v5260_v17  ;;  %2225 = vmatpush1.msra.mxu1 %v5263_v47 }
 0x816   :  { %2155 = vmatprep.subr.mxu0 %v5266_v49  ;;  %2226 = vmatprep.subr.mxu1 %v5269_v18 }
 0x817   :  { %2156 = vmatpush1.msra.mxu0 %v5272_v1  ;;  %2227 = vmatpush1.msra.mxu1 %v5275_v56 }
 0x818   :  { %2157 = vmatprep.subr.mxu0 %v5278_v53  ;;  %2228 = vmatprep.subr.mxu1 %v5281_v58 }
 0x819   :  { %2158 = vmatpush1.msra.mxu0 %v5284_v55  ;;  %2229 = vmatpush1.msra.mxu1 %v5287_v0 }
 0x81a   :  { %2159 = vmatprep.subr.mxu0 %v5290_v52  ;;  %2230 = vmatprep.subr.mxu1 %v5293_v57 }
 0x81b   :  { %2160 = vmatpush1.msra.mxu0 %v5296_v59  ;;  %2231 = vmatpush1.msra.mxu1 %v5299_v2 }
 0x81c   :  { %2161 = vmatprep.subr.mxu0 %v5302_v4  ;;  %2232 = vmatprep.subr.mxu1 %v5305_v6 }
 0x81d   :  { %2162 = vmatpush1.msra.mxu0 %v5308_v8  ;;  %2233 = vmatpush1.msra.mxu1 %v5311_v11 }
 0x81e   :  { %2163 = vmatprep.subr.mxu0 %v5314_v21  ;;  %2234 = vmatprep.subr.mxu1 %v5317_v23 }
 0x81f   :  { %2164 = vmatpush1.msra.mxu0 %v5320_v24  ;;  %2235 = vmatpush1.msra.mxu1 %v5323_v25 }
 0x820   :  { %2165 = vmatprep.subr.mxu0 %v5326_v26  ;;  %2236 = vmatprep.subr.mxu1 %v5329_v27 }
 0x821   :  { %2166 = vmatpush1.msra.mxu0 %v5332_v28  ;;  %2237 = vmatpush1.msra.mxu1 %v5335_v29 }
 0x822   :  { %2167 = vmatprep.subr.mxu0 %v5338_v30  ;;  %2238 = vmatprep.subr.mxu1 %v5341_v31 }
 0x823   :  { %2168 = vmatpush1.msra.mxu0 %v5344_v32  ;;  %2239 = vmatpush1.msra.mxu1 %v5347_v33 }
 0x824   :  { %2169 = vmatprep.subr.mxu0 %v5350_v34  ;;  %2240 = vmatprep.subr.mxu1 %v5353_v35 }
 0x825   :  { %2170 = vmatpush1.msra.mxu0 %v5356_v36  ;;  %2241 = vmatpush1.msra.mxu1 %v5359_v37 }
 0x826   :  { %2171 = vmatprep.subr.mxu0 %v5362_v38  ;;  %2242 = vmatprep.subr.mxu1 %v5365_v39 }
 0x827   :  { %2172 = vmatpush1.msra.mxu0 %v5368_v40  ;;  %2243 = vmatpush1.msra.mxu1 %v5371_v41 }
 0x828   :  { %2173 = vmatprep.subr.mxu0 %v5374_v42  ;;  %2244 = vmatprep.subr.mxu1 %v5377_v43 }
 0x829   :  { %2174 = vmatpush1.msra.mxu0 %v5380_v46  ;;  %2245 = vmatpush1.msra.mxu1 %v6671_v50 }
 0x82a   :  { %2175 = vmatprep.subr.mxu0 %v6672_v54  ;;  %2246 = vmatprep.subr.mxu1 %v6673_v48 }
 0x82b   :  { %2176 = vmatpush1.msra.mxu0 %v6674_v20  ;;  %2247 = vmatpush1.msra.mxu1 %v6675_v45 }
 0x82c   :  { %2177 = vmatprep.subr.mxu0 %v6676_v14  ;;  %2248 = vmatprep.subr.mxu1 %v6677_v44 }
 0x82d   :  { %2178 = vmatpush1.msra.mxu0 %v6678_v7  ;;  %2249 = vmatpush1.msra.mxu1 %v6679_v10 }
 0x82e   :  { %2179 = vmatprep.subr.mxu0 %v6680_v5  ;;  %2250 = vmatprep.subr.mxu1 %v6681_v19  ;;  %v6689_v5 = vld [vmem:[#allocation25_spill] sm:$0xff]  ;;  %v1711_v19 = vpop.f32.mrf.mxu0 }
 0x82f   :  { %2180 = vmatpush1.msra.mxu0 %v6682_v9  ;;  %2251 = vmatpush1.msra.mxu1 %v6683_v51  ;;  %v1824_v9 = vpop.f32.mrf.mxu1 }
 0x830   :  { %2181 = vmatprep.subr.mxu0 %v6684_v13  ;;  %2252 = vmatprep.subr.mxu1 %v6685_v62  ;;  %v1713_v10 = vpop.f32.mrf.mxu0 }
 0x831   :  { %2182 = vmatpush1.msra.mxu0 %v6686_v16  ;;  %2215 = vmatprep.mubr.f32.mxu0 %v6642_v22  ;;  %v1826_v51 = vpop.f32.mrf.mxu1 }
 0x832   :  { %2253 = vmatpush1.msra.mxu1 %v6687_v63  ;;  %2286 = vmatprep.mubr.f32.mxu1 %v6642_v22  ;;  %v5520_v7 = vpop.f32.mrf.mxu0 }
 0x833   :  { %2328 = vmatprep.subr.mxu0 %v6688_v61  ;;  %2399 = vmatprep.subr.mxu1 %v6689_v5  ;;  %6690 = vst [vmem:[#allocation34_spill] sm:$0xff] %v5520_v7  ;;  %v5522_v13 = vpop.f32.mrf.mxu1 }
 0x834   :  { %6691 = vst [vmem:[#allocation35_spill] sm:$0xff] %v5522_v13  ;;  %v5524_v62 = vpop.f32.mrf.mxu0 }
 0x835   :  { %6692 = vst [vmem:[#allocation36_spill] sm:$0xff] %v5524_v62  ;;  %v5526_v16 = vpop.f32.mrf.mxu1 }
 0x836   :  { %6693 = vst [vmem:[#allocation37_spill] sm:$0xff] %v5526_v16  ;;  %v5528_v44 = vpop.f32.mrf.mxu0 }
 0x837   :  { %6694 = vst [vmem:[#allocation38_spill] sm:$0xff] %v5528_v44  ;;  %v5530_v63 = vpop.f32.mrf.mxu1 }
 0x838   :  { %6695 = vst [vmem:[#allocation39_spill] sm:$0xff] %v5530_v63  ;;  %v5532_v22 = vpop.f32.mrf.mxu0 }
 0x839   :  { %6696 = vst [vmem:[#allocation40_spill] sm:$0xff] %v5532_v22  ;;  %v5534_v61 = vpop.f32.mrf.mxu1  ;;  %v1625_v22 = vlaneseq }
 0x83a   :  { %6697 = vst [vmem:[#allocation41_spill] sm:$0xff] %v5534_v61  ;;  %v5536_v5 = vpop.f32.mrf.mxu0 }
 0x83b   :  { %6698 = vst [vmem:[#allocation42_spill] sm:$0xff] %v5536_v5  ;;  %v5538_v14 = vpop.f32.mrf.mxu1 }
 0x83c   :  { %6699 = vst [vmem:[#allocation43_spill] sm:$0xff] %v5538_v14  ;;  %v5540_v45 = vpop.f32.mrf.mxu0  ;;  %v1626_v14 = vshrl.u32 %v1625_v22, 7 }
 0x83d   :  { %6700 = vst [vmem:[#allocation44_spill] sm:$0xff] %v5540_v45  ;;  %v5542_v7 = vpop.f32.mrf.mxu1 }
 0x83e   :  { %6701 = vst [vmem:[#allocation45_spill] sm:$0xff] %v5542_v7  ;;  %v5544_v13 = vpop.f32.mrf.mxu0  ;;  %v1627_v7 = vsub.s32 0, %v1626_v14 }
 0x83f   :  { %6702 = vst [vmem:[#allocation46_spill] sm:$0xff] %v5544_v13  ;;  %v5546_v62 = vpop.f32.mrf.mxu1 }
 0x840   :  { %6703 = vst [vmem:[#allocation47_spill] sm:$0xff] %v5546_v62  ;;  %v5548_v16 = vpop.f32.mrf.mxu0  ;;  %v1623_v62 = vld [vmem:[%s6339_s3] sm:$0xf] }
 0x841   :  { %6704 = vst [vmem:[#allocation48_spill] sm:$0xff] %v5548_v16  ;;  %v5550_v44 = vpop.f32.mrf.mxu1 }
 0x842   :  { %6705 = vst [vmem:[#allocation49_spill] sm:$0xff] %v5550_v44  ;;  %v5552_v63 = vpop.f32.mrf.mxu0  ;;  %v1631_v44 = vsub.s32 1, %v1626_v14 }
 0x843   :  { %6706 = vst [vmem:[#allocation50_spill] sm:$0xff] %v5552_v63  ;;  %v5554_v61 = vpop.f32.mrf.mxu1  ;;  %v5569_v63 = vrot.slane %v1623_v62, %v1627_v7  ;;  %v1639_v7 = vsub.s32 3, %v1626_v14 }
 0x844   :  { %6707 = vst [vmem:[#allocation51_spill] sm:$0xff] %v5554_v61  ;;  %v5556_v5 = vpop.f32.mrf.mxu0  ;;  %v5575_v22 = vrot.slane %v1623_v62, %v1631_v44 }
 0x845   :  { %6708 = vst [vmem:[#allocation52_spill] sm:$0xff] %v5556_v5  ;;  %v5558_v20 = vpop.f32.mrf.mxu1  ;;  %6713 = vst [vmem:[#allocation57_spill] sm:$0xff] %v5569_v63  ;;  %v5585_v42 = vrot.slane %v1623_v62, %v1639_v7 }
 0x846   :  { %6709 = vst [vmem:[#allocation53_spill] sm:$0xff] %v5558_v20  ;;  %v5560_v45 = vpop.f32.mrf.mxu0  ;;  %6716 = vst [vmem:[#allocation60_spill] sm:$0xff] %v5575_v22  ;;  %v1714_v54 = vadd.f32 %v1713_v10, %v5575_v22 }
 0x847   :  { %6710 = vst [vmem:[#allocation54_spill] sm:$0xff] %v5560_v45  ;;  %v5562_v13 = vpop.f32.mrf.mxu1 }
 0x848   :  { %6711 = vst [vmem:[#allocation55_spill] sm:$0xff] %v5562_v13  ;;  %v5567_v16 = vpop.f32.mrf.mxu0  ;;  %v1712_v13 = vadd.f32 %v1711_v19, %v5569_v63  ;;  %v1827_v19 = vadd.f32 %v1826_v51, %v5585_v42 }
 0x849   :  { %6712 = vst [vmem:[#allocation56_spill] sm:$0xff] %v5567_v16  ;;  %v5571_v61 = vpop.f32.mrf.mxu1 }
 0x84a   :  { %6714 = vst [vmem:[#allocation58_spill] sm:$0xff] %v5571_v61 }
 0x8ce   :  { %v5573_v5 = vpop.f32.mrf.mxu0  ;;  %v5577_v20 = vpop.f32.mrf.mxu1 }
 0x8cf   :  { %6715 = vst [vmem:[#allocation59_spill] sm:$0xff] %v5573_v5  ;;  %6717 = vst [vmem:[#allocation61_spill] sm:$0xff] %v5577_v20  ;;  %v1635_v20 = vsub.s32 2, %v1626_v14 }
 0x8d0   :  { %v5579_v45 = vpop.f32.mrf.mxu0  ;;  %v5583_v50 = vpop.f32.mrf.mxu1 }
 0x8d1   :  { %6718 = vst [vmem:[#allocation62_spill] sm:$0xff] %v5579_v45  ;;  %6719 = vst [vmem:[#allocation63_spill] sm:$0xff] %v5583_v50  ;;  %v5588_v63 = vrot.slane %v1623_v62, %v1635_v20 }
 0x8d2   :  { %v2040_v48 = vpop.f32.mrf.mxu0  ;;  %v2111_v5 = vpop.f32.mrf.mxu1 }
 0x8d3   :  { %v2116_v16 = vadd.f32 %v2040_v48, %v1712_v13  ;;  %v1825_v50 = vadd.f32 %v1824_v9, %v5588_v63 }
 0x8d4   :  { %v2042_v46 = vpop.f32.mrf.mxu0  ;;  %v2113_v45 = vpop.f32.mrf.mxu1 }
 0x8d5   :  { %v3637_v43 = vmul.f32 -1.442695, %v2116_v16  ;;  %v2117_v61 = vadd.f32 %v2042_v46, %v1714_v54  ;;  %v2119_v10 = vadd.f32 %v2113_v45, %v1827_v19  ;;  %v2118_v22 = vadd.f32 %v2111_v5, %v1825_v50  ;;  %v6722_v19 = vld [vmem:[#allocation19_spill] sm:$0xff] }
 0x8d7   :  { %3902 = vpow2.f32 %v3637_v43  ;;  %v3638_v44 = vmul.f32 -1.442695, %v2117_v61  ;;  %v3639_v48 = vmul.f32 -1.442695, %v2119_v10  ;;  %v6723_v10 = vld [vmem:[#allocation15_spill] sm:$0xff] }
 0x8d9   :  { %3904 = vpow2.f32 %v3638_v44  ;;  %v6721_v44 = vld [vmem:[#allocation22_spill] sm:$0xff] }
 0x8da   :  { %3906 = vpow2.f32 %v3639_v48  ;;  %v6724_v48 = vld [vmem:[#allocation27_spill] sm:$0xff] }
 0x8e4   :  { %v3903_v13 = vpop.eup %3902 }
 0x8e5   :  { %v2123_v16 = vadd.f32 1.0, %v3903_v13  ;;  %v6725_v13 = vld [vmem:[#allocation24_spill] sm:$0xff] }
 0x8e6   :  { %v3905_v46 = vpop.eup %3904 }
 0x8e7   :  { %3908 = vrcp.f32 %v2123_v16  ;;  %v2129_v43 = vadd.f32 1.0, %v3905_v46  ;;  %v3907_v54 = vpop.eup %3906  ;;  %v6726_v16 = vld [vmem:[#allocation21_spill] sm:$0xff]  ;;  %v6727_v46 = vld [vmem:[#allocation16_spill] sm:$0xff] }
 0x8e8   :  { %3910 = vtanh.f32 %v2118_v22  ;;  %v2136_v51 = vadd.f32 1.0, %v3907_v54  ;;  %v6720_v22 = vld [vmem:[#allocation26_spill] sm:$0xff]  ;;  %v6729_v54 = vld [vmem:[#allocation23_spill] sm:$0xff] }
 0x8e9   :  { %3912 = vrcp.f32 %v2129_v43  ;;  %v6728_v43 = vld [vmem:[#allocation28_spill] sm:$0xff] }
 0x8ea   :  { %3914 = vrcp.f32 %v2136_v51  ;;  %v6733_v51 = vld [vmem:[#allocation32_spill] sm:$0xff] }
 0x8f4   :  { %v3909_v14 = vpop.eup %3908 }
 0x8f5   :  { %v3911_v61 = vpop.eup %3910 }
 0x8f6   :  { %v3913_v7 = vpop.eup %3912  ;;  %v2140_v62 = vmul.f32 %v3911_v61, %v3909_v14  ;;  %v6730_v14 = vld [vmem:[#allocation29_spill] sm:$0xff]  ;;  %v6731_v61 = vld [vmem:[#allocation12_spill] sm:$0xff] }
 0x8f7   :  { %v2139_v20 = vmul.f32 0.0, %v3913_v7  ;;  %v3915_v50 = vpop.eup %3914  ;;  %v6732_v7 = vld [vmem:[#allocation31_spill] sm:$0xff] }
 0x8f9   :  { %v5591_v45 = vadd.f32 %v2140_v62, %v2139_v20  ;;  %v6734_v20 = vld [vmem:[#allocation33_spill] sm:$0xff]  ;;  %v6735_v62 = vld [vmem:[#allocation30_spill] sm:$0xff] }
 0x8fb   :  { %3916 = vtanh.f32 %v5591_v45 }
 0x908   :  { %v3917_v5 = vpop.eup %3916 }
 0x909   :  { %v2143_v9 = vmul.f32 %v3917_v5, %v3915_v50  ;;  %v6736_v50 = vld [vmem:[#allocation18_spill] sm:$0xff]  ;;  %v6737_v5 = vld [vmem:[#allocation20_spill] sm:$0xff] }
 0x90b   :  { %2216 = vmatmul.mubr.f32.vlgmr.msra.gmra.mxu0 %v2143_v9  ;;  %2287 = vmatmul.mubr.f32.vlgmr.msra.gmra.mxu1 %v2143_v9  ;;  %v6738_v9 = vld [vmem:[#allocation11_spill] sm:$0xff] }
 0x90c   :  { %2329 = vmatpush1.msra.mxu0 %v5248_v3  ;;  %2400 = vmatpush1.msra.mxu1 %v5251_v60 }
 0x90d   :  { %2330 = vmatprep.subr.mxu0 %v5254_v15  ;;  %2401 = vmatprep.subr.mxu1 %v5257_v12 }
 0x90e   :  { %2331 = vmatpush1.msra.mxu0 %v5260_v17  ;;  %2402 = vmatpush1.msra.mxu1 %v5263_v47 }
 0x90f   :  { %2332 = vmatprep.subr.mxu0 %v5266_v49  ;;  %2403 = vmatprep.subr.mxu1 %v5269_v18 }
 0x910   :  { %2333 = vmatpush1.msra.mxu0 %v5272_v1  ;;  %2404 = vmatpush1.msra.mxu1 %v5275_v56 }
 0x911   :  { %2334 = vmatprep.subr.mxu0 %v5278_v53  ;;  %2405 = vmatprep.subr.mxu1 %v5281_v58 }
 0x912   :  { %2335 = vmatpush1.msra.mxu0 %v5284_v55  ;;  %2406 = vmatpush1.msra.mxu1 %v5287_v0 }
 0x913   :  { %2336 = vmatprep.subr.mxu0 %v5290_v52  ;;  %2407 = vmatprep.subr.mxu1 %v5293_v57 }
 0x914   :  { %2337 = vmatpush1.msra.mxu0 %v5296_v59  ;;  %2408 = vmatpush1.msra.mxu1 %v5299_v2 }
 0x915   :  { %2338 = vmatprep.subr.mxu0 %v5302_v4  ;;  %2409 = vmatprep.subr.mxu1 %v5305_v6 }
 0x916   :  { %2339 = vmatpush1.msra.mxu0 %v5308_v8  ;;  %2410 = vmatpush1.msra.mxu1 %v5311_v11 }
 0x917   :  { %2340 = vmatprep.subr.mxu0 %v5314_v21  ;;  %2411 = vmatprep.subr.mxu1 %v5317_v23 }
 0x918   :  { %2341 = vmatpush1.msra.mxu0 %v5320_v24  ;;  %2412 = vmatpush1.msra.mxu1 %v5323_v25 }
 0x919   :  { %2342 = vmatprep.subr.mxu0 %v5326_v26  ;;  %2413 = vmatprep.subr.mxu1 %v5329_v27 }
 0x91a   :  { %2343 = vmatpush1.msra.mxu0 %v5332_v28  ;;  %2414 = vmatpush1.msra.mxu1 %v5335_v29 }
 0x91b   :  { %2344 = vmatprep.subr.mxu0 %v5338_v30  ;;  %2415 = vmatprep.subr.mxu1 %v5341_v31 }
 0x91c   :  { %2345 = vmatpush1.msra.mxu0 %v5344_v32  ;;  %2416 = vmatpush1.msra.mxu1 %v5347_v33 }
 0x91d   :  { %2346 = vmatprep.subr.mxu0 %v5350_v34  ;;  %2417 = vmatprep.subr.mxu1 %v5353_v35 }
 0x91e   :  { %2347 = vmatpush1.msra.mxu0 %v5356_v36  ;;  %2418 = vmatpush1.msra.mxu1 %v5359_v37 }
 0x91f   :  { %2348 = vmatprep.subr.mxu0 %v5362_v38  ;;  %2419 = vmatprep.subr.mxu1 %v5365_v39 }
 0x920   :  { %2349 = vmatpush1.msra.mxu0 %v5368_v40  ;;  %2420 = vmatpush1.msra.mxu1 %v5371_v41 }
 0x921   :  { %2350 = vmatprep.subr.mxu0 %v6720_v22  ;;  %2421 = vmatprep.subr.mxu1 %v6721_v44  ;;  %v6748_v44 = vld [vmem:[#allocation35_spill] sm:$0xff] }
 0x922   :  { %2351 = vmatpush1.msra.mxu0 %v6722_v19  ;;  %2422 = vmatpush1.msra.mxu1 %v6723_v10 }
 0x923   :  { %2352 = vmatprep.subr.mxu0 %v6724_v48  ;;  %2423 = vmatprep.subr.mxu1 %v6725_v13 }
 0x924   :  { %2353 = vmatpush1.msra.mxu0 %v6726_v16  ;;  %2424 = vmatpush1.msra.mxu1 %v6727_v46  ;;  %v6745_v46 = vld [vmem:[#allocation60_spill] sm:$0xff] }
 0x925   :  { %2354 = vmatprep.subr.mxu0 %v6728_v43  ;;  %2425 = vmatprep.subr.mxu1 %v6729_v54  ;;  %v6739_v43 = vmov 0.0   ;;  %v6740_v54 = vld [vmem:[#allocation17_spill] sm:$0xff] }
 0x926   :  { %2355 = vmatpush1.msra.mxu0 %v6730_v14  ;;  %2426 = vmatpush1.msra.mxu1 %v6731_v61  ;;  %v6741_v61 = vld [vmem:[#allocation13_spill] sm:$0xff] }
 0x927   :  { %2356 = vmatprep.subr.mxu0 %v6732_v7  ;;  %2427 = vmatprep.subr.mxu1 %v6733_v51  ;;  %v6742_v7 = vld [vmem:[#allocation25_spill] sm:$0xff] }
 0x928   :  { %2357 = vmatpush1.msra.mxu0 %v6734_v20  ;;  %2428 = vmatpush1.msra.mxu1 %v6735_v62  ;;  %v6743_v51 = vld [vmem:[#allocation57_spill] sm:$0xff]  ;;  %v6744_v20 = vld [vmem:[#allocation34_spill] sm:$0xff] }
 0x929   :  { %2358 = vmatprep.subr.mxu0 %v6736_v50  ;;  %2429 = vmatprep.subr.mxu1 %v6737_v5  ;;  %v1718_v14 = vadd.f32 %v6744_v20, %v6743_v51  ;;  %v6746_v50 = vld [vmem:[#allocation36_spill] sm:$0xff]  ;;  %v1831_v20 = vadd.f32 %v6748_v44, %v5588_v63 }
 0x92a   :  { %2359 = vmatpush1.msra.mxu0 %v6738_v9  ;;  %2392 = vmatprep.mubr.f32.mxu0 %v6739_v43  ;;  %v1720_v16 = vadd.f32 %v6746_v50, %v6745_v46 }
 0x92b   :  { %2430 = vmatpush1.msra.mxu1 %v6740_v54  ;;  %2463 = vmatprep.mubr.f32.mxu1 %v6739_v43 }
 0x92c   :  { %2505 = vmatprep.subr.mxu0 %v6741_v61  ;;  %2576 = vmatprep.subr.mxu1 %v6742_v7  ;;  %v6747_v61 = vld [vmem:[#allocation37_spill] sm:$0xff] }
 0x92d   :  { %v1833_v19 = vadd.f32 %v6747_v61, %v5585_v42 }
 0x9cb   :  { %v2217_v62 = vpop.f32.mrf.mxu0  ;;  %v2288_v10 = vpop.f32.mrf.mxu1 }
 0x9cc   :  { %v2293_v5 = vadd.f32 %v2217_v62, %v1718_v14  ;;  %v2295_v51 = vadd.f32 %v2288_v10, %v1831_v20 }
 0x9cd   :  { %v2219_v13 = vpop.f32.mrf.mxu0  ;;  %v2290_v43 = vpop.f32.mrf.mxu1 }
 0x9ce   :  { %v3640_v9 = vmul.f32 -1.442695, %v2293_v5  ;;  %v2294_v48 = vadd.f32 %v2219_v13, %v1720_v16  ;;  %v2296_v7 = vadd.f32 %v2290_v43, %v1833_v19 }
 0x9d0   :  { %3918 = vpow2.f32 %v3640_v9  ;;  %v3641_v54 = vmul.f32 -1.442695, %v2294_v48  ;;  %v3642_v22 = vmul.f32 -1.442695, %v2296_v7  ;;  %v6772_v7 = vld [vmem:[#allocation25_spill] sm:$0xff]  ;;  %v6774_v9 = vld [vmem:[#allocation38_spill] sm:$0xff] }
 0x9d2   :  { %3920 = vpow2.f32 %v3641_v54 }
 0x9d3   :  { %3922 = vtanh.f32 %v2295_v51  ;;  %v6773_v51 = vld [vmem:[#allocation57_spill] sm:$0xff] }
 0x9d4   :  { %3924 = vpow2.f32 %v3642_v22  ;;  %v6771_v22 = vld [vmem:[#allocation13_spill] sm:$0xff]  ;;  %v1724_v20 = vadd.f32 %v6774_v9, %v6773_v51 }
 0x9dd   :  { %v3919_v41 = vpop.eup %3918 }
 0x9de   :  { %v2300_v50 = vadd.f32 1.0, %v3919_v41 }
 0x9df   :  { %v3921_v14 = vpop.eup %3920 }
 0x9e0   :  { %3926 = vrcp.f32 %v2300_v50  ;;  %v2306_v13 = vadd.f32 1.0, %v3921_v14  ;;  %v3923_v48 = vpop.eup %3922  ;;  %v6775_v14 = vld [vmem:[#allocation40_spill] sm:$0xff] }
 0x9e1   :  { %v3925_v16 = vpop.eup %3924 }
 0x9e2   :  { %3928 = vrcp.f32 %v2306_v13  ;;  %v2313_v61 = vadd.f32 1.0, %v3925_v16  ;;  %v1726_v13 = vadd.f32 %v6775_v14, %v6745_v46 }
 0x9e4   :  { %3930 = vrcp.f32 %v2313_v61 }
 0x9ed   :  { %v3927_v54 = vpop.eup %3926 }
 0x9ee   :  { %v2317_v62 = vmul.f32 %v3927_v54, %v3923_v48 }
 0x9ef   :  { %v3929_v5 = vpop.eup %3928 }
 0x9f0   :  { %v2316_v19 = vmul.f32 %v3929_v5, %v5591_v45  ;;  %v6770_v45 = vld [vmem:[#allocation17_spill] sm:$0xff] }
 0x9f1   :  { %v3931_v41 = vpop.eup %3930 }
 0x9f2   :  { %v5669_v43 = vadd.f32 %v2317_v62, %v2316_v19 }
 0x9f4   :  { %3932 = vtanh.f32 %v5669_v43 }
 0xa01   :  { %v3933_v44 = vpop.eup %3932 }
 0xa02   :  { %v2320_v10 = vmul.f32 %v3933_v44, %v3931_v41  ;;  %v6776_v41 = vld [vmem:[#allocation41_spill] sm:$0xff] }
 0xa03   :  { %v1839_v44 = vadd.f32 %v6776_v41, %v5585_v42 }
 0xa04   :  { %2393 = vmatmul.mubr.f32.vlgmr.msra.gmra.mxu0 %v2320_v10  ;;  %2464 = vmatmul.mubr.f32.vlgmr.msra.gmra.mxu1 %v2320_v10 }
 0xa05   :  { %2506 = vmatpush1.msra.mxu0 %v5248_v3  ;;  %2577 = vmatpush1.msra.mxu1 %v5251_v60  ;;  %v6749_v3 = vld [vmem:[#allocation14_spill] sm:$0xff] }
 0xa06   :  { %2507 = vmatprep.subr.mxu0 %v5254_v15  ;;  %2578 = vmatprep.subr.mxu1 %v5257_v12  ;;  %v6750_v60 = vld [vmem:[#allocation26_spill] sm:$0xff]  ;;  %v6752_v12 = vld [vmem:[#allocation19_spill] sm:$0xff] }
 0xa07   :  { %2508 = vmatpush1.msra.mxu0 %v5260_v17  ;;  %2579 = vmatpush1.msra.mxu1 %v5263_v47  ;;  %v6751_v15 = vld [vmem:[#allocation22_spill] sm:$0xff]  ;;  %v6753_v17 = vld [vmem:[#allocation15_spill] sm:$0xff] }
 0xa08   :  { %2509 = vmatprep.subr.mxu0 %v5266_v49  ;;  %2580 = vmatprep.subr.mxu1 %v5269_v18  ;;  %v6754_v47 = vld [vmem:[#allocation27_spill] sm:$0xff]  ;;  %v6755_v49 = vld [vmem:[#allocation24_spill] sm:$0xff]  ;;  %v6756_v18 = vld [vmem:[#allocation21_spill] sm:$0xff] }
 0xa09   :  { %2510 = vmatpush1.msra.mxu0 %v5272_v1  ;;  %2581 = vmatpush1.msra.mxu1 %v5275_v56  ;;  %v6757_v1 = vld [vmem:[#allocation16_spill] sm:$0xff] }
 0xa0a   :  { %2511 = vmatprep.subr.mxu0 %v5278_v53  ;;  %2582 = vmatprep.subr.mxu1 %v5281_v58  ;;  %v6758_v56 = vld [vmem:[#allocation28_spill] sm:$0xff]  ;;  %v6759_v53 = vld [vmem:[#allocation23_spill] sm:$0xff]  ;;  %v6760_v58 = vld [vmem:[#allocation29_spill] sm:$0xff] }
 0xa0b   :  { %2512 = vmatpush1.msra.mxu0 %v5284_v55  ;;  %2583 = vmatpush1.msra.mxu1 %v5287_v0  ;;  %v6761_v55 = vld [vmem:[#allocation12_spill] sm:$0xff]  ;;  %v6762_v0 = vld [vmem:[#allocation31_spill] sm:$0xff] }
 0xa0c   :  { %2513 = vmatprep.subr.mxu0 %v5290_v52  ;;  %2584 = vmatprep.subr.mxu1 %v5293_v57  ;;  %v6763_v52 = vld [vmem:[#allocation32_spill] sm:$0xff]  ;;  %v6764_v57 = vld [vmem:[#allocation33_spill] sm:$0xff] }
 0xa0d   :  { %2514 = vmatpush1.msra.mxu0 %v5296_v59  ;;  %2585 = vmatpush1.msra.mxu1 %v5299_v2  ;;  %v6765_v59 = vld [vmem:[#allocation30_spill] sm:$0xff] }
 0xa0e   :  { %2515 = vmatprep.subr.mxu0 %v5302_v4  ;;  %2586 = vmatprep.subr.mxu1 %v5305_v6  ;;  %v6766_v2 = vld [vmem:[#allocation18_spill] sm:$0xff]  ;;  %v6767_v4 = vld [vmem:[#allocation20_spill] sm:$0xff]  ;;  %v6768_v6 = vld [vmem:[#allocation11_spill] sm:$0xff] }
 0xa0f   :  { %2516 = vmatpush1.msra.mxu0 %v5308_v8  ;;  %2587 = vmatpush1.msra.mxu1 %v5311_v11  ;;  %v6769_v8 = vmov 0.0  }
 0xa10   :  { %2517 = vmatprep.subr.mxu0 %v5314_v21  ;;  %2588 = vmatprep.subr.mxu1 %v5317_v23 }
 0xa11   :  { %2518 = vmatpush1.msra.mxu0 %v5320_v24  ;;  %2589 = vmatpush1.msra.mxu1 %v5323_v25 }
 0xa12   :  { %2519 = vmatprep.subr.mxu0 %v5326_v26  ;;  %2590 = vmatprep.subr.mxu1 %v5329_v27 }
 0xa13   :  { %2520 = vmatpush1.msra.mxu0 %v5332_v28  ;;  %2591 = vmatpush1.msra.mxu1 %v5335_v29 }
 0xa14   :  { %2521 = vmatprep.subr.mxu0 %v5338_v30  ;;  %2592 = vmatprep.subr.mxu1 %v5341_v31 }
 0xa15   :  { %2522 = vmatpush1.msra.mxu0 %v5344_v32  ;;  %2593 = vmatpush1.msra.mxu1 %v5347_v33 }
 0xa16   :  { %2523 = vmatprep.subr.mxu0 %v5350_v34  ;;  %2594 = vmatprep.subr.mxu1 %v5353_v35 }
 0xa17   :  { %2524 = vmatpush1.msra.mxu0 %v5356_v36  ;;  %2595 = vmatpush1.msra.mxu1 %v5359_v37 }
 0xa18   :  { %2525 = vmatprep.subr.mxu0 %v5362_v38  ;;  %2596 = vmatprep.subr.mxu1 %v5365_v39 }
 0xa19   :  { %2526 = vmatpush1.msra.mxu0 %v5368_v40  ;;  %2597 = vmatpush1.msra.mxu1 %v6749_v3 }
 0xa1a   :  { %2527 = vmatprep.subr.mxu0 %v6750_v60  ;;  %2598 = vmatprep.subr.mxu1 %v6751_v15 }
 0xa1b   :  { %2528 = vmatpush1.msra.mxu0 %v6752_v12  ;;  %2599 = vmatpush1.msra.mxu1 %v6753_v17 }
 0xa1c   :  { %2529 = vmatprep.subr.mxu0 %v6754_v47  ;;  %2600 = vmatprep.subr.mxu1 %v6755_v49 }
 0xa1d   :  { %2530 = vmatpush1.msra.mxu0 %v6756_v18  ;;  %2601 = vmatpush1.msra.mxu1 %v6757_v1 }
 0xa1e   :  { %2531 = vmatprep.subr.mxu0 %v6758_v56  ;;  %2602 = vmatprep.subr.mxu1 %v6759_v53 }
 0xa1f   :  { %2532 = vmatpush1.msra.mxu0 %v6760_v58  ;;  %2603 = vmatpush1.msra.mxu1 %v6761_v55 }
 0xa20   :  { %2533 = vmatprep.subr.mxu0 %v6762_v0  ;;  %2604 = vmatprep.subr.mxu1 %v6763_v52 }
 0xa21   :  { %2534 = vmatpush1.msra.mxu0 %v6764_v57  ;;  %2605 = vmatpush1.msra.mxu1 %v6765_v59 }
 0xa22   :  { %2535 = vmatprep.subr.mxu0 %v6766_v2  ;;  %2606 = vmatprep.subr.mxu1 %v6767_v4 }
 0xa23   :  { %2536 = vmatpush1.msra.mxu0 %v6768_v6  ;;  %2569 = vmatprep.mubr.f32.mxu0 %v6769_v8 }
 0xa24   :  { %2607 = vmatpush1.msra.mxu1 %v6770_v45  ;;  %2640 = vmatprep.mubr.f32.mxu1 %v6769_v8 }
 0xa25   :  { %2682 = vmatprep.subr.mxu0 %v6771_v22  ;;  %2753 = vmatprep.subr.mxu1 %v6772_v7  ;;  %v6777_v22 = vld [vmem:[#allocation39_spill] sm:$0xff] }
 0xa26   :  { %v1837_v7 = vadd.f32 %v6777_v22, %v5588_v63  ;;  %v5756_v22 = vld [vmem:[#allocation8 + $0x1c8] sm:$0xff] }
 0xac4   :  { %v2394_v50 = vpop.f32.mrf.mxu0  ;;  %v2465_v5 = vpop.f32.mrf.mxu1 }
 0xac5   :  { %v2470_v48 = vadd.f32 %v2394_v50, %v1724_v20  ;;  %v2472_v9 = vadd.f32 %v2465_v5, %v1837_v7  ;;  %v5762_v7 = vld [vmem:[#allocation8 + $0x1c0] sm:$0xff] }
 0xac6   :  { %v2396_v16 = vpop.f32.mrf.mxu0  ;;  %v2467_v19 = vpop.f32.mrf.mxu1 }
 0xac7   :  { %v3643_v54 = vmul.f32 -1.442695, %v2470_v48  ;;  %v2471_v62 = vadd.f32 %v2396_v16, %v1726_v13  ;;  %v2473_v10 = vadd.f32 %v2467_v19, %v1839_v44 }
 0xac9   :  { %3934 = vpow2.f32 %v3643_v54  ;;  %v3644_v61 = vmul.f32 -1.442695, %v2471_v62  ;;  %v3645_v51 = vmul.f32 -1.442695, %v2473_v10  ;;  %v5753_v10 = vld [vmem:[#allocation8 + $0x1f0] sm:$0xff] }
 0xacb   :  { %3936 = vpow2.f32 %v3644_v61 }
 0xacc   :  { %3938 = vtanh.f32 %v2472_v9  ;;  %v5765_v9 = vld [vmem:[#allocation8 + $0x1d0] sm:$0xff] }
 0xacd   :  { %3940 = vpow2.f32 %v3645_v51  ;;  %v5750_v51 = vld [vmem:[#allocation8 + $0x1e0] sm:$0xff] }
 0xad6   :  { %v3935_v45 = vpop.eup %3934 }
 0xad7   :  { %v2477_v14 = vadd.f32 1.0, %v3935_v45 }
 0xad8   :  { %v3937_v20 = vpop.eup %3936 }
 0xad9   :  { %3942 = vrcp.f32 %v2477_v14  ;;  %v2483_v50 = vadd.f32 1.0, %v3937_v20  ;;  %v3939_v13 = vpop.eup %3938  ;;  %v5768_v14 = vld [vmem:[#allocation8 + $0x1a8] sm:$0xff]  ;;  %v5771_v20 = vld [vmem:[#allocation8 + $0x1b8] sm:$0xff] }
 0xada   :  { %v3941_v48 = vpop.eup %3940 }
 0xadb   :  { %3944 = vrcp.f32 %v2483_v50  ;;  %v2490_v61 = vadd.f32 1.0, %v3941_v48  ;;  %v5774_v50 = vld [vmem:[#allocation8 + $0x1a0] sm:$0xff]  ;;  %v5780_v48 = vld [vmem:[#allocation8 + $0x188] sm:$0xff] }
 0xadd   :  { %3946 = vrcp.f32 %v2490_v61  ;;  %v5792_v61 = vld [vmem:[#allocation8 + $0x168] sm:$0xff] }
 0xade   :  { %6779 = vst [vmem:[#allocation60_spill] sm:$0xff] %v5792_v61 }
 0xae6   :  { %v3943_v16 = vpop.eup %3942 }
 0xae7   :  { %v2494_v54 = vmul.f32 %v3943_v16, %v3939_v13  ;;  %v5777_v13 = vld [vmem:[#allocation8 + $0x1b0] sm:$0xff]  ;;  %v5783_v16 = vld [vmem:[#allocation8 + $0x198] sm:$0xff] }
 0xae8   :  { %v3945_v62 = vpop.eup %3944 }
 0xae9   :  { %v2493_v19 = vmul.f32 %v3945_v62, %v5669_v43  ;;  %v5759_v43 = vld [vmem:[#allocation8 + $0x1d8] sm:$0xff]  ;;  %v5789_v62 = vld [vmem:[#allocation8 + $0x190] sm:$0xff] }
 0xaea   :  { %v3947_v45 = vpop.eup %3946  ;;  %6778 = vst [vmem:[#allocation34_spill] sm:$0xff] %v5789_v62 }
 0xaeb   :  { %v5747_v41 = vadd.f32 %v2494_v54, %v2493_v19  ;;  %v5786_v54 = vld [vmem:[#allocation8 + $0x180] sm:$0xff]  ;;  %v5795_v19 = vld [vmem:[#allocation8 + $0x178] sm:$0xff] }
 0xaed   :  { %3948 = vtanh.f32 %v5747_v41 }
 0xafa   :  { %v3949_v5 = vpop.eup %3948 }
 0xafb   :  { %v2497_v44 = vmul.f32 %v3949_v5, %v3947_v45  ;;  %v5798_v45 = vld [vmem:[#allocation8 + $0x160] sm:$0xff]  ;;  %v5801_v5 = vld [vmem:[#allocation8 + $0x170] sm:$0xff] }
 0xafd   :  { %2570 = vmatmul.mubr.f32.vlgmr.msra.gmra.mxu0 %v2497_v44  ;;  %2641 = vmatmul.mubr.f32.vlgmr.msra.gmra.mxu1 %v2497_v44  ;;  %v5804_v44 = vld [vmem:[#allocation8 + $0x148] sm:$0xff] }
 0xafe   :  { %2683 = vmatpush1.msra.mxu0 %v5750_v51  ;;  %2754 = vmatpush1.msra.mxu1 %v5753_v10 }
 0xaff   :  { %2684 = vmatprep.subr.mxu0 %v5756_v22  ;;  %2755 = vmatprep.subr.mxu1 %v5759_v43 }
 0xb00   :  { %2685 = vmatpush1.msra.mxu0 %v5762_v7  ;;  %2756 = vmatpush1.msra.mxu1 %v5765_v9 }
 0xb01   :  { %2686 = vmatprep.subr.mxu0 %v5768_v14  ;;  %2757 = vmatprep.subr.mxu1 %v5771_v20 }
 0xb02   :  { %2687 = vmatpush1.msra.mxu0 %v5774_v50  ;;  %2758 = vmatpush1.msra.mxu1 %v5777_v13 }
 0xb03   :  { %2688 = vmatprep.subr.mxu0 %v5780_v48  ;;  %2759 = vmatprep.subr.mxu1 %v5783_v16 }
 0xb04   :  { %2689 = vmatpush1.msra.mxu0 %v5786_v54  ;;  %2760 = vmatpush1.msra.mxu1 %v5789_v62  ;;  %v5807_v62 = vld [vmem:[#allocation8 + $0x158] sm:$0xff] }
 0xb05   :  { %2690 = vmatprep.subr.mxu0 %v5792_v61  ;;  %2761 = vmatprep.subr.mxu1 %v5795_v19  ;;  %v5810_v61 = vld [vmem:[#allocation8 + $0x140] sm:$0xff] }
 0xb06   :  { %2691 = vmatpush1.msra.mxu0 %v5798_v45  ;;  %2762 = vmatpush1.msra.mxu1 %v5801_v5 }
 0xb07   :  { %2692 = vmatprep.subr.mxu0 %v5804_v44  ;;  %2763 = vmatprep.subr.mxu1 %v5807_v62 }
 0xb08   :  { %2693 = vmatpush1.msra.mxu0 %v5810_v61  ;;  %2764 = vmatpush1.msra.mxu1 %v5311_v11  ;;  %v6780_v11 = vld [vmem:[#allocation17_spill] sm:$0xff] }
 0xb09   :  { %2694 = vmatprep.subr.mxu0 %v5314_v21  ;;  %2765 = vmatprep.subr.mxu1 %v5317_v23  ;;  %v5856_v21 = vld [vmem:[#allocation8 + $0x1e8] sm:$0xff]  ;;  %v5859_v23 = vld [vmem:[#allocation8 + $0x1f8] sm:$0xff] }
 0xb0a   :  { %2695 = vmatpush1.msra.mxu0 %v5320_v24  ;;  %2766 = vmatpush1.msra.mxu1 %v5323_v25  ;;  %6781 = vst [vmem:[#allocation36_spill] sm:$0xff] %v5856_v21  ;;  %6782 = vst [vmem:[#allocation37_spill] sm:$0xff] %v5859_v23  ;;  %v6783_v24 = vld [vmem:[#allocation57_spill] sm:$0xff]  ;;  %v6784_v25 = vld [vmem:[#allocation42_spill] sm:$0xff] }
 0xb0b   :  { %2696 = vmatprep.subr.mxu0 %v5326_v26  ;;  %2767 = vmatprep.subr.mxu1 %v5329_v27  ;;  %v1730_v26 = vadd.f32 %v6784_v25, %v6783_v24  ;;  %v5901_v25 = vld [vmem:[#allocation8 + $0x138] sm:$0xff] }
 0xb0c   :  { %2697 = vmatpush1.msra.mxu0 %v5332_v28  ;;  %2768 = vmatpush1.msra.mxu1 %v5335_v29  ;;  %v6785_v28 = vld [vmem:[#allocation44_spill] sm:$0xff] }
 0xb0d   :  { %2698 = vmatprep.subr.mxu0 %v5338_v30  ;;  %2769 = vmatprep.subr.mxu1 %v5341_v31  ;;  %v1732_v29 = vadd.f32 %v6785_v28, %v6745_v46  ;;  %v5910_v28 = vld [vmem:[#allocation8 + $0x108] sm:$0xff] }
 0xb0e   :  { %2699 = vmatpush1.msra.mxu0 %v5344_v32  ;;  %2770 = vmatpush1.msra.mxu1 %v5347_v33 }
 0xb0f   :  { %2700 = vmatprep.subr.mxu0 %v5350_v34  ;;  %2771 = vmatprep.subr.mxu1 %v5353_v35 }
 0xb10   :  { %2701 = vmatpush1.msra.mxu0 %v5356_v36  ;;  %2772 = vmatpush1.msra.mxu1 %v5359_v37  ;;  %v6786_v37 = vld [vmem:[#allocation45_spill] sm:$0xff] }
 0xb11   :  { %2702 = vmatprep.subr.mxu0 %v5362_v38  ;;  %2773 = vmatprep.subr.mxu1 %v5365_v39  ;;  %v1845_v38 = vadd.f32 %v6786_v37, %v5585_v42  ;;  %v5937_v37 = vld [vmem:[#allocation8 + $0xd8] sm:$0xff] }
 0xb12   :  { %2703 = vmatpush1.msra.mxu0 %v5368_v40  ;;  %2774 = vmatpush1.msra.mxu1 %v6749_v3  ;;  %v6787_v40 = vld [vmem:[#allocation43_spill] sm:$0xff] }
 0xb13   :  { %2704 = vmatprep.subr.mxu0 %v6750_v60  ;;  %2775 = vmatprep.subr.mxu1 %v6751_v15  ;;  %v1843_v3 = vadd.f32 %v6787_v40, %v5588_v63  ;;  %v5946_v40 = vld [vmem:[#allocation8 + $0xa8] sm:$0xff] }
 0xb14   :  { %2705 = vmatpush1.msra.mxu0 %v6752_v12  ;;  %2776 = vmatpush1.msra.mxu1 %v6753_v17 }
 0xb15   :  { %2706 = vmatprep.subr.mxu0 %v6754_v47  ;;  %2777 = vmatprep.subr.mxu1 %v6755_v49 }
 0xb16   :  { %2707 = vmatpush1.msra.mxu0 %v6756_v18  ;;  %2778 = vmatpush1.msra.mxu1 %v6757_v1 }
 0xb17   :  { %2708 = vmatprep.subr.mxu0 %v6758_v56  ;;  %2779 = vmatprep.subr.mxu1 %v6759_v53 }
 0xb18   :  { %2709 = vmatpush1.msra.mxu0 %v6760_v58  ;;  %2780 = vmatpush1.msra.mxu1 %v6761_v55 }
 0xb19   :  { %2710 = vmatprep.subr.mxu0 %v6762_v0  ;;  %2781 = vmatprep.subr.mxu1 %v6763_v52 }
 0xb1a   :  { %2711 = vmatpush1.msra.mxu0 %v6764_v57  ;;  %2782 = vmatpush1.msra.mxu1 %v6765_v59 }
 0xb1b   :  { %2712 = vmatprep.subr.mxu0 %v6766_v2  ;;  %2783 = vmatprep.subr.mxu1 %v6767_v4  ;;  %v6788_v4 = vld [vmem:[#allocation34_spill] sm:$0xff] }
 0xb1c   :  { %2713 = vmatpush1.msra.mxu0 %v6768_v6  ;;  %2746 = vmatprep.mubr.f32.mxu0 %v6769_v8  ;;  %v6789_v6 = vld [vmem:[#allocation60_spill] sm:$0xff] }
 0xb1d   :  { %2784 = vmatpush1.msra.mxu1 %v6780_v11  ;;  %2817 = vmatprep.mubr.f32.mxu1 %v6769_v8  ;;  %v5898_v11 = vld [vmem:[#allocation8 + $0x128] sm:$0xff] }
 0xb1e   :  { %2859 = vmatprep.subr.mxu0 %v5856_v21  ;;  %2930 = vmatprep.subr.mxu1 %v5859_v23 }
 0xbbd   :  { %v2571_v27 = vpop.f32.mrf.mxu0  ;;  %v2642_v34 = vpop.f32.mrf.mxu1 }
 0xbbe   :  { %v2647_v30 = vadd.f32 %v2571_v27, %v1730_v26  ;;  %v2649_v60 = vadd.f32 %v2642_v34, %v1843_v3  ;;  %v5904_v26 = vld [vmem:[#allocation8 + $0x120] sm:$0xff]  ;;  %v5907_v27 = vld [vmem:[#allocation8 + $0x130] sm:$0xff]  ;;  %v5949_v3 = vld [vmem:[#allocation8 + $0xb8] sm:$0xff] }
 0xbbf   :  { %v2573_v31 = vpop.f32.mrf.mxu0  ;;  %v2644_v36 = vpop.f32.mrf.mxu1  ;;  %v5928_v34 = vld [vmem:[#allocation8 + $0xe0] sm:$0xff] }
 0xbc0   :  { %v3646_v32 = vmul.f32 -1.442695, %v2647_v30  ;;  %v2648_v33 = vadd.f32 %v2573_v31, %v1732_v29  ;;  %v2650_v39 = vadd.f32 %v2644_v36, %v1845_v38  ;;  %v5913_v29 = vld [vmem:[#allocation8 + $0x118] sm:$0xff]  ;;  %v5916_v30 = vld [vmem:[#allocation8 + $0x100] sm:$0xff]  ;;  %v5919_v31 = vld [vmem:[#allocation8 + $0x110] sm:$0xff] }
 0xbc1   :  { %v5934_v36 = vld [vmem:[#allocation8 + $0xc8] sm:$0xff]  ;;  %v5940_v38 = vld [vmem:[#allocation8 + $0xc0] sm:$0xff] }
 0xbc2   :  { %3950 = vpow2.f32 %v3646_v32  ;;  %v3647_v35 = vmul.f32 -1.442695, %v2648_v33  ;;  %v3648_v15 = vmul.f32 -1.442695, %v2650_v39  ;;  %v5922_v32 = vld [vmem:[#allocation8 + $0xe8] sm:$0xff]  ;;  %v5925_v33 = vld [vmem:[#allocation8 + $0xf8] sm:$0xff] }
 0xbc3   :  { %v5943_v39 = vld [vmem:[#allocation8 + $0xd0] sm:$0xff] }
 0xbc4   :  { %3952 = vpow2.f32 %v3647_v35  ;;  %v5931_v35 = vld [vmem:[#allocation8 + $0xf0] sm:$0xff] }
 0xbc5   :  { %3954 = vtanh.f32 %v2649_v60  ;;  %v5952_v60 = vld [vmem:[#allocation8 + $0xa0] sm:$0xff] }
 0xbc6   :  { %3956 = vpow2.f32 %v3648_v15  ;;  %v5955_v15 = vld [vmem:[#allocation8 + $0xb0] sm:$0xff] }
 0xbc7   :  { %6790 = vst [vmem:[#allocation35_spill] sm:$0xff] %v5955_v15 }
 0xbcf   :  { %v3951_v12 = vpop.eup %3950 }
 0xbd0   :  { %v2654_v17 = vadd.f32 1.0, %v3951_v12  ;;  %v5958_v12 = vld [vmem:[#allocation8 + $0x88] sm:$0xff] }
 0xbd1   :  { %v3953_v47 = vpop.eup %3952  ;;  %6791 = vst [vmem:[#allocation14_spill] sm:$0xff] %v5958_v12 }
 0xbd2   :  { %3958 = vrcp.f32 %v2654_v17  ;;  %v2660_v49 = vadd.f32 1.0, %v3953_v47  ;;  %v3955_v18 = vpop.eup %3954  ;;  %v5961_v17 = vld [vmem:[#allocation8 + $0x98] sm:$0xff]  ;;  %v5964_v47 = vld [vmem:[#allocation8 + $0x80] sm:$0xff] }
 0xbd3   :  { %v3957_v1 = vpop.eup %3956  ;;  %6792 = vst [vmem:[#allocation26_spill] sm:$0xff] %v5961_v17  ;;  %6793 = vst [vmem:[#allocation22_spill] sm:$0xff] %v5964_v47 }
 0xbd4   :  { %3960 = vrcp.f32 %v2660_v49  ;;  %v2667_v55 = vadd.f32 1.0, %v3957_v1  ;;  %v5967_v49 = vld [vmem:[#allocation8 + $0x90] sm:$0xff]  ;;  %v5973_v1 = vld [vmem:[#allocation8 + $0x78] sm:$0xff] }
 0xbd5   :  { %6794 = vst [vmem:[#allocation19_spill] sm:$0xff] %v5967_v49  ;;  %6796 = vst [vmem:[#allocation27_spill] sm:$0xff] %v5973_v1 }
 0xbd6   :  { %3962 = vrcp.f32 %v2667_v55  ;;  %v5985_v55 = vld [vmem:[#allocation8 + $0x58] sm:$0xff] }
 0xbd7   :  { %6800 = vst [vmem:[#allocation28_spill] sm:$0xff] %v5985_v55 }
 0xbdf   :  { %v3959_v56 = vpop.eup %3958 }
 0xbe0   :  { %v2671_v53 = vmul.f32 %v3959_v56, %v3955_v18  ;;  %v5970_v18 = vld [vmem:[#allocation8 + $0x68] sm:$0xff]  ;;  %v5976_v56 = vld [vmem:[#allocation8 + $0x60] sm:$0xff] }
 0xbe1   :  { %v3961_v58 = vpop.eup %3960  ;;  %6795 = vst [vmem:[#allocation15_spill] sm:$0xff] %v5970_v18  ;;  %6797 = vst [vmem:[#allocation24_spill] sm:$0xff] %v5976_v56 }
 0xbe2   :  { %v2670_v0 = vmul.f32 %v3961_v58, %v5747_v41  ;;  %v5895_v41 = vld [vmem:[#allocation8 + $0x150] sm:$0xff]  ;;  %v5982_v58 = vld [vmem:[#allocation8 + $0x48] sm:$0xff] }
 0xbe3   :  { %v3963_v57 = vpop.eup %3962  ;;  %6799 = vst [vmem:[#allocation16_spill] sm:$0xff] %v5982_v58 }
 0xbe4   :  { %v5871_v52 = vadd.f32 %v2671_v53, %v2670_v0  ;;  %v5979_v53 = vld [vmem:[#allocation8 + $0x70] sm:$0xff]  ;;  %v5988_v0 = vld [vmem:[#allocation8 + $0x40] sm:$0xff] }
 0xbe5   :  { %6798 = vst [vmem:[#allocation21_spill] sm:$0xff] %v5979_v53  ;;  %6801 = vst [vmem:[#allocation23_spill] sm:$0xff] %v5988_v0 }
 0xbe6   :  { %3964 = vtanh.f32 %v5871_v52 }
 0xbf3   :  { %v3965_v59 = vpop.eup %3964 }
 0xbf4   :  { %v2674_v2 = vmul.f32 %v3965_v59, %v3963_v57  ;;  %v5991_v57 = vld [vmem:[#allocation8 + $0x50] sm:$0xff]  ;;  %v5994_v59 = vld [vmem:[#allocation8 + $0x28] sm:$0xff] }
 0xbf5   :  { %6802 = vst [vmem:[#allocation29_spill] sm:$0xff] %v5991_v57  ;;  %6803 = vst [vmem:[#allocation12_spill] sm:$0xff] %v5994_v59 }
 0xbf6   :  { %2747 = vmatmul.mubr.f32.vlgmr.msra.gmra.mxu0 %v2674_v2  ;;  %2818 = vmatmul.mubr.f32.vlgmr.msra.gmra.mxu1 %v2674_v2  ;;  %v5997_v2 = vld [vmem:[#allocation8 + $0x38] sm:$0xff] }
 0xbf7   :  { %2860 = vmatpush1.msra.mxu0 %v5750_v51  ;;  %2931 = vmatpush1.msra.mxu1 %v5753_v10  ;;  %6804 = vst [vmem:[#allocation31_spill] sm:$0xff] %v5997_v2 }
 0xbf8   :  { %2861 = vmatprep.subr.mxu0 %v5756_v22  ;;  %2932 = vmatprep.subr.mxu1 %v5759_v43 }
 0xbf9   :  { %2862 = vmatpush1.msra.mxu0 %v5762_v7  ;;  %2933 = vmatpush1.msra.mxu1 %v5765_v9 }
 0xbfa   :  { %2863 = vmatprep.subr.mxu0 %v5768_v14  ;;  %2934 = vmatprep.subr.mxu1 %v5771_v20 }
 0xbfb   :  { %2864 = vmatpush1.msra.mxu0 %v5774_v50  ;;  %2935 = vmatpush1.msra.mxu1 %v5777_v13 }
 0xbfc   :  { %2865 = vmatprep.subr.mxu0 %v5780_v48  ;;  %2936 = vmatprep.subr.mxu1 %v5783_v16 }
 0xbfd   :  { %2866 = vmatpush1.msra.mxu0 %v5786_v54  ;;  %2937 = vmatpush1.msra.mxu1 %v6788_v4 }
 0xbfe   :  { %2867 = vmatprep.subr.mxu0 %v6789_v6  ;;  %2938 = vmatprep.subr.mxu1 %v5795_v19 }
 0xbff   :  { %2868 = vmatpush1.msra.mxu0 %v5798_v45  ;;  %2939 = vmatpush1.msra.mxu1 %v5801_v5 }
 0xc00   :  { %2869 = vmatprep.subr.mxu0 %v5804_v44  ;;  %2940 = vmatprep.subr.mxu1 %v5807_v62 }
 0xc01   :  { %2870 = vmatpush1.msra.mxu0 %v5810_v61  ;;  %2941 = vmatpush1.msra.mxu1 %v5895_v41 }
 0xc02   :  { %2871 = vmatprep.subr.mxu0 %v5898_v11  ;;  %2942 = vmatprep.subr.mxu1 %v5901_v25 }
 0xc03   :  { %2872 = vmatpush1.msra.mxu0 %v5904_v26  ;;  %2943 = vmatpush1.msra.mxu1 %v5907_v27 }
 0xc04   :  { %2873 = vmatprep.subr.mxu0 %v5910_v28  ;;  %2944 = vmatprep.subr.mxu1 %v5913_v29 }
 0xc05   :  { %2874 = vmatpush1.msra.mxu0 %v5916_v30  ;;  %2945 = vmatpush1.msra.mxu1 %v5919_v31 }
 0xc06   :  { %2875 = vmatprep.subr.mxu0 %v5922_v32  ;;  %2946 = vmatprep.subr.mxu1 %v5925_v33 }
 0xc07   :  { %2876 = vmatpush1.msra.mxu0 %v5928_v34  ;;  %2947 = vmatpush1.msra.mxu1 %v5931_v35 }
 0xc08   :  { %2877 = vmatprep.subr.mxu0 %v5934_v36  ;;  %2948 = vmatprep.subr.mxu1 %v5937_v37 }
 0xc09   :  { %2878 = vmatpush1.msra.mxu0 %v5940_v38  ;;  %2949 = vmatpush1.msra.mxu1 %v5943_v39 }
 0xc0a   :  { %2879 = vmatprep.subr.mxu0 %v5946_v40  ;;  %2950 = vmatprep.subr.mxu1 %v5949_v3 }
 0xc0b   :  { %2880 = vmatpush1.msra.mxu0 %v5952_v60  ;;  %2951 = vmatpush1.msra.mxu1 %v5955_v15 }
 0xc0c   :  { %2881 = vmatprep.subr.mxu0 %v5958_v12  ;;  %2952 = vmatprep.subr.mxu1 %v5961_v17  ;;  %v6814_v17 = vld [vmem:[#allocation47_spill] sm:$0xff] }
 0xc0d   :  { %2882 = vmatpush1.msra.mxu0 %v5964_v47  ;;  %2953 = vmatpush1.msra.mxu1 %v5967_v49 }
 0xc0e   :  { %2883 = vmatprep.subr.mxu0 %v5970_v18  ;;  %2954 = vmatprep.subr.mxu1 %v5973_v1 }
 0xc0f   :  { %2884 = vmatpush1.msra.mxu0 %v5976_v56  ;;  %2955 = vmatpush1.msra.mxu1 %v5979_v53 }
 0xc10   :  { %2885 = vmatprep.subr.mxu0 %v5982_v58  ;;  %2956 = vmatprep.subr.mxu1 %v5985_v55  ;;  %v6000_v58 = vld [vmem:[#allocation8 + $0x20] sm:$0xff]  ;;  %v6003_v55 = vld [vmem:[#allocation8 + $0x30] sm:$0xff] }
 0xc11   :  { %2886 = vmatpush1.msra.mxu0 %v5988_v0  ;;  %2957 = vmatpush1.msra.mxu1 %v5991_v57  ;;  %6805 = vst [vmem:[#allocation32_spill] sm:$0xff] %v6000_v58  ;;  %6806 = vst [vmem:[#allocation33_spill] sm:$0xff] %v6003_v55  ;;  %v6006_v0 = vld [vmem:[#allocation8 + $0x8] sm:$0xff]  ;;  %v6009_v57 = vld [vmem:[#allocation8 + $0x18] sm:$0xff] }
 0xc12   :  { %2887 = vmatprep.subr.mxu0 %v5994_v59  ;;  %2958 = vmatprep.subr.mxu1 %v5997_v2  ;;  %6807 = vst [vmem:[#allocation30_spill] sm:$0xff] %v6006_v0  ;;  %6808 = vst [vmem:[#allocation18_spill] sm:$0xff] %v6009_v57  ;;  %v6012_v59 = vld [vmem:[#allocation8] sm:$0xff]  ;;  %v6016_v2 = vld [vmem:[#allocation8 + $0x10] sm:$0xff] }
 0xc13   :  { %2888 = vmatpush1.msra.mxu0 %v6000_v58  ;;  %2959 = vmatpush1.msra.mxu1 %v6003_v55  ;;  %6809 = vst [vmem:[#allocation20_spill] sm:$0xff] %v6012_v59  ;;  %6810 = vst [vmem:[#allocation11_spill] sm:$0xff] %v6016_v2  ;;  %v6812_v58 = vld [vmem:[#allocation48_spill] sm:$0xff] }
 0xc14   :  { %2889 = vmatprep.subr.mxu0 %v6006_v0  ;;  %2960 = vmatprep.subr.mxu1 %v6009_v57  ;;  %v6811_v0 = vld [vmem:[#allocation46_spill] sm:$0xff]  ;;  %v1738_v53 = vadd.f32 %v6812_v58, %v6745_v46 }
 0xc15   :  { %2890 = vmatpush1.msra.mxu0 %v6012_v59  ;;  %2923 = vmatprep.mubr.f32.mxu0 %v6769_v8  ;;  %v1736_v55 = vadd.f32 %v6811_v0, %v6783_v24  ;;  %v1849_v0 = vadd.f32 %v6814_v17, %v5588_v63  ;;  %v6817_v17 = vld [vmem:[#allocation26_spill] sm:$0xff] }
 0xc16   :  { %2961 = vmatpush1.msra.mxu1 %v6016_v2  ;;  %2994 = vmatprep.mubr.f32.mxu1 %v6769_v8 }
 0xc17   :  { %3036 = vmatprep.subr.mxu0 %v5856_v21  ;;  %3107 = vmatprep.subr.mxu1 %v5859_v23  ;;  %v6813_v21 = vld [vmem:[#allocation49_spill] sm:$0xff] }
 0xc18   :  { %v1851_v47 = vadd.f32 %v6813_v21, %v5585_v42 }
 0xcb6   :  { %v2748_v57 = vpop.f32.mrf.mxu0  ;;  %v2819_v49 = vpop.f32.mrf.mxu1 }
 0xcb7   :  { %v2824_v59 = vadd.f32 %v2748_v57, %v1736_v55  ;;  %v2826_v24 = vadd.f32 %v2819_v49, %v1849_v0  ;;  %v6818_v49 = vld [vmem:[#allocation22_spill] sm:$0xff]  ;;  %v6820_v0 = vld [vmem:[#allocation15_spill] sm:$0xff] }
 0xcb8   :  { %v2750_v56 = vpop.f32.mrf.mxu0  ;;  %v2821_v8 = vpop.f32.mrf.mxu1 }
 0xcb9   :  { %v3649_v1 = vmul.f32 -1.442695, %v2824_v59  ;;  %v2825_v18 = vadd.f32 %v2750_v56, %v1738_v53  ;;  %v2827_v23 = vadd.f32 %v2821_v8, %v1851_v47 }
 0xcbb   :  { %3966 = vpow2.f32 %v3649_v1  ;;  %v3650_v2 = vmul.f32 -1.442695, %v2825_v18  ;;  %v3651_v12 = vmul.f32 -1.442695, %v2827_v23 }
 0xcbd   :  { %3968 = vpow2.f32 %v3650_v2  ;;  %v6819_v2 = vld [vmem:[#allocation19_spill] sm:$0xff] }
 0xcbe   :  { %3970 = vtanh.f32 %v2826_v24 }
 0xcbf   :  { %3972 = vpow2.f32 %v3651_v12  ;;  %v6816_v12 = vld [vmem:[#allocation14_spill] sm:$0xff] }
 0xcc8   :  { %v3967_v15 = vpop.eup %3966 }
 0xcc9   :  { %v2831_v58 = vadd.f32 1.0, %v3967_v15 }
 0xcca   :  { %v3969_v55 = vpop.eup %3968 }
 0xccb   :  { %3974 = vrcp.f32 %v2831_v58  ;;  %v2837_v1 = vadd.f32 1.0, %v3969_v55  ;;  %v3971_v18 = vpop.eup %3970  ;;  %v6821_v58 = vld [vmem:[#allocation27_spill] sm:$0xff]  ;;  %v6822_v55 = vld [vmem:[#allocation24_spill] sm:$0xff] }
 0xccc   :  { %v3973_v56 = vpop.eup %3972 }
 0xccd   :  { %3976 = vrcp.f32 %v2837_v1  ;;  %v2844_v21 = vadd.f32 1.0, %v3973_v56  ;;  %v6823_v1 = vld [vmem:[#allocation21_spill] sm:$0xff]  ;;  %v6825_v56 = vld [vmem:[#allocation28_spill] sm:$0xff] }
 0xccf   :  { %3978 = vrcp.f32 %v2844_v21  ;;  %v6829_v21 = vld [vmem:[#allocation31_spill] sm:$0xff] }
 0xcd8   :  { %v3975_v53 = vpop.eup %3974 }
 0xcd9   :  { %v2848_v57 = vmul.f32 %v3975_v53, %v3971_v18  ;;  %v6824_v18 = vld [vmem:[#allocation16_spill] sm:$0xff]  ;;  %v6826_v53 = vld [vmem:[#allocation23_spill] sm:$0xff] }
 0xcda   :  { %v3977_v59 = vpop.eup %3976 }
 0xcdb   :  { %v2847_v8 = vmul.f32 %v3977_v59, %v5871_v52  ;;  %v6815_v52 = vld [vmem:[#allocation35_spill] sm:$0xff]  ;;  %v6828_v59 = vld [vmem:[#allocation12_spill] sm:$0xff] }
 0xcdc   :  { %v3979_v23 = vpop.eup %3978 }
 0xcdd   :  { %v6031_v47 = vadd.f32 %v2848_v57, %v2847_v8  ;;  %v6827_v57 = vld [vmem:[#allocation29_spill] sm:$0xff]  ;;  %v6830_v8 = vld [vmem:[#allocation32_spill] sm:$0xff] }
 0xcdf   :  { %3980 = vtanh.f32 %v6031_v47 }
 0xcec   :  { %v3981_v24 = vpop.eup %3980 }
 0xced   :  { %v2851_v15 = vmul.f32 %v3981_v24, %v3979_v23  ;;  %v6831_v23 = vld [vmem:[#allocation33_spill] sm:$0xff]  ;;  %v6832_v24 = vld [vmem:[#allocation30_spill] sm:$0xff] }
 0xcef   :  { %2924 = vmatmul.mubr.f32.vlgmr.msra.gmra.mxu0 %v2851_v15  ;;  %2995 = vmatmul.mubr.f32.vlgmr.msra.gmra.mxu1 %v2851_v15  ;;  %v6833_v15 = vld [vmem:[#allocation18_spill] sm:$0xff] }
 0xcf0   :  { %3037 = vmatpush1.msra.mxu0 %v5750_v51  ;;  %3108 = vmatpush1.msra.mxu1 %v5753_v10 }
 0xcf1   :  { %3038 = vmatprep.subr.mxu0 %v5756_v22  ;;  %3109 = vmatprep.subr.mxu1 %v5759_v43 }
 0xcf2   :  { %3039 = vmatpush1.msra.mxu0 %v5762_v7  ;;  %3110 = vmatpush1.msra.mxu1 %v5765_v9 }
 0xcf3   :  { %3040 = vmatprep.subr.mxu0 %v5768_v14  ;;  %3111 = vmatprep.subr.mxu1 %v5771_v20 }
 0xcf4   :  { %3041 = vmatpush1.msra.mxu0 %v5774_v50  ;;  %3112 = vmatpush1.msra.mxu1 %v5777_v13 }
 0xcf5   :  { %3042 = vmatprep.subr.mxu0 %v5780_v48  ;;  %3113 = vmatprep.subr.mxu1 %v5783_v16 }
 0xcf6   :  { %3043 = vmatpush1.msra.mxu0 %v5786_v54  ;;  %3114 = vmatpush1.msra.mxu1 %v6788_v4 }
 0xcf7   :  { %3044 = vmatprep.subr.mxu0 %v6789_v6  ;;  %3115 = vmatprep.subr.mxu1 %v5795_v19 }
 0xcf8   :  { %3045 = vmatpush1.msra.mxu0 %v5798_v45  ;;  %3116 = vmatpush1.msra.mxu1 %v5801_v5 }
 0xcf9   :  { %3046 = vmatprep.subr.mxu0 %v5804_v44  ;;  %3117 = vmatprep.subr.mxu1 %v5807_v62 }
 0xcfa   :  { %3047 = vmatpush1.msra.mxu0 %v5810_v61  ;;  %3118 = vmatpush1.msra.mxu1 %v5895_v41 }
 0xcfb   :  { %3048 = vmatprep.subr.mxu0 %v5898_v11  ;;  %3119 = vmatprep.subr.mxu1 %v5901_v25 }
 0xcfc   :  { %3049 = vmatpush1.msra.mxu0 %v5904_v26  ;;  %3120 = vmatpush1.msra.mxu1 %v5907_v27 }
 0xcfd   :  { %3050 = vmatprep.subr.mxu0 %v5910_v28  ;;  %3121 = vmatprep.subr.mxu1 %v5913_v29 }
 0xcfe   :  { %3051 = vmatpush1.msra.mxu0 %v5916_v30  ;;  %3122 = vmatpush1.msra.mxu1 %v5919_v31 }
 0xcff   :  { %3052 = vmatprep.subr.mxu0 %v5922_v32  ;;  %3123 = vmatprep.subr.mxu1 %v5925_v33 }
 0xd00   :  { %3053 = vmatpush1.msra.mxu0 %v5928_v34  ;;  %3124 = vmatpush1.msra.mxu1 %v5931_v35 }
 0xd01   :  { %3054 = vmatprep.subr.mxu0 %v5934_v36  ;;  %3125 = vmatprep.subr.mxu1 %v5937_v37 }
 0xd02   :  { %3055 = vmatpush1.msra.mxu0 %v5940_v38  ;;  %3126 = vmatpush1.msra.mxu1 %v5943_v39 }
 0xd03   :  { %3056 = vmatprep.subr.mxu0 %v5946_v40  ;;  %3127 = vmatprep.subr.mxu1 %v5949_v3 }
 0xd04   :  { %3057 = vmatpush1.msra.mxu0 %v5952_v60  ;;  %3128 = vmatpush1.msra.mxu1 %v6815_v52 }
 0xd05   :  { %3058 = vmatprep.subr.mxu0 %v6816_v12  ;;  %3129 = vmatprep.subr.mxu1 %v6817_v17  ;;  %v6843_v17 = vld [vmem:[#allocation51_spill] sm:$0xff] }
 0xd06   :  { %3059 = vmatpush1.msra.mxu0 %v6818_v49  ;;  %3130 = vmatpush1.msra.mxu1 %v6819_v2 }
 0xd07   :  { %3060 = vmatprep.subr.mxu0 %v6820_v0  ;;  %3131 = vmatprep.subr.mxu1 %v6821_v58 }
 0xd08   :  { %3061 = vmatpush1.msra.mxu0 %v6822_v55  ;;  %3132 = vmatpush1.msra.mxu1 %v6823_v1  ;;  %v6834_v1 = vld [vmem:[#allocation20_spill] sm:$0xff] }
 0xd09   :  { %3062 = vmatprep.subr.mxu0 %v6824_v18  ;;  %3133 = vmatprep.subr.mxu1 %v6825_v56  ;;  %v6835_v18 = vmov 0.0   ;;  %v6836_v56 = vld [vmem:[#allocation11_spill] sm:$0xff] }
 0xd0a   :  { %3063 = vmatpush1.msra.mxu0 %v6826_v53  ;;  %3134 = vmatpush1.msra.mxu1 %v6827_v57  ;;  %v6837_v57 = vld [vmem:[#allocation36_spill] sm:$0xff] }
 0xd0b   :  { %3064 = vmatprep.subr.mxu0 %v6828_v59  ;;  %3135 = vmatprep.subr.mxu1 %v6829_v21  ;;  %v6838_v59 = vld [vmem:[#allocation37_spill] sm:$0xff] }
 0xd0c   :  { %3065 = vmatpush1.msra.mxu0 %v6830_v8  ;;  %3136 = vmatpush1.msra.mxu1 %v6831_v23  ;;  %v6839_v21 = vld [vmem:[#allocation57_spill] sm:$0xff]  ;;  %v6840_v8 = vld [vmem:[#allocation50_spill] sm:$0xff] }
 0xd0d   :  { %3066 = vmatprep.subr.mxu0 %v6832_v24  ;;  %3137 = vmatprep.subr.mxu1 %v6833_v15  ;;  %v1742_v53 = vadd.f32 %v6840_v8, %v6839_v21  ;;  %v6841_v24 = vld [vmem:[#allocation52_spill] sm:$0xff]  ;;  %v1855_v8 = vadd.f32 %v6843_v17, %v5588_v63 }
 0xd0e   :  { %3067 = vmatpush1.msra.mxu0 %v6834_v1  ;;  %3100 = vmatprep.mubr.f32.mxu0 %v6835_v18  ;;  %v1744_v55 = vadd.f32 %v6841_v24, %v6745_v46 }
 0xd0f   :  { %3138 = vmatpush1.msra.mxu1 %v6836_v56  ;;  %3171 = vmatprep.mubr.f32.mxu1 %v6835_v18 }
 0xd10   :  { %3213 = vmatprep.subr.mxu0 %v6837_v57  ;;  %3284 = vmatprep.subr.mxu1 %v6838_v59  ;;  %v6842_v57 = vld [vmem:[#allocation53_spill] sm:$0xff] }
 0xd11   :  { %v1857_v49 = vadd.f32 %v6842_v57, %v5585_v42 }
 0xdaf   :  { %v2925_v23 = vpop.f32.mrf.mxu0  ;;  %v2996_v2 = vpop.f32.mrf.mxu1 }
 0xdb0   :  { %v3001_v15 = vadd.f32 %v2925_v23, %v1742_v53  ;;  %v3003_v21 = vadd.f32 %v2996_v2, %v1855_v8 }
 0xdb1   :  { %v2927_v58 = vpop.f32.mrf.mxu0  ;;  %v2998_v18 = vpop.f32.mrf.mxu1 }
 0xdb2   :  { %v3652_v1 = vmul.f32 -1.442695, %v3001_v15  ;;  %v3002_v0 = vadd.f32 %v2927_v58, %v1744_v55  ;;  %v3004_v59 = vadd.f32 %v2998_v18, %v1857_v49 }
 0xdb4   :  { %3982 = vpow2.f32 %v3652_v1  ;;  %v3653_v56 = vmul.f32 -1.442695, %v3002_v0  ;;  %v3654_v12 = vmul.f32 -1.442695, %v3004_v59 }
 0xdb6   :  { %3984 = vpow2.f32 %v3653_v56 }
 0xdb7   :  { %3986 = vtanh.f32 %v3003_v21 }
 0xdb8   :  { %3988 = vpow2.f32 %v3654_v12 }
 0xdc1   :  { %v3983_v52 = vpop.eup %3982 }
 0xdc2   :  { %v3008_v24 = vadd.f32 1.0, %v3983_v52 }
 0xdc3   :  { %v3985_v53 = vpop.eup %3984 }
 0xdc4   :  { %3990 = vrcp.f32 %v3008_v24  ;;  %v3014_v58 = vadd.f32 1.0, %v3985_v53  ;;  %v3987_v0 = vpop.eup %3986 }
 0xdc5   :  { %v3989_v55 = vpop.eup %3988 }
 0xdc6   :  { %3992 = vrcp.f32 %v3014_v58  ;;  %v3021_v15 = vadd.f32 1.0, %v3989_v55 }
 0xdc8   :  { %3994 = vrcp.f32 %v3021_v15 }
 0xdd1   :  { %v3991_v1 = vpop.eup %3990 }
 0xdd2   :  { %v3025_v56 = vmul.f32 %v3991_v1, %v3987_v0 }
 0xdd3   :  { %v3993_v23 = vpop.eup %3992 }
 0xdd4   :  { %v3024_v49 = vmul.f32 %v3993_v23, %v6031_v47 }
 0xdd5   :  { %v3995_v52 = vpop.eup %3994 }
 0xdd6   :  { %v6109_v18 = vadd.f32 %v3025_v56, %v3024_v49 }
 0xdd8   :  { %3996 = vtanh.f32 %v6109_v18 }
 0xde5   :  { %v3997_v17 = vpop.eup %3996 }
 0xde6   :  { %v3028_v2 = vmul.f32 %v3997_v17, %v3995_v52  ;;  %v3399_v52 = vld [vmem:[%s6341_s5 + $0x78] sm:$0xff]  ;;  %v3397_v17 = vld [vmem:[%s6341_s5 + $0x68] sm:$0xff] }
 0xde8   :  { %3101 = vmatmul.mubr.f32.vlgmr.msra.gmra.mxu0 %v3028_v2  ;;  %3172 = vmatmul.mubr.f32.vlgmr.msra.gmra.mxu1 %v3028_v2  ;;  %v3396_v2 = vld [vmem:[%s6341_s5 + $0x60] sm:$0xff] }
 0xde9   :  { %3214 = vmatpush1.msra.mxu0 %v5750_v51  ;;  %3285 = vmatpush1.msra.mxu1 %v5753_v10  ;;  %v6844_v51 = vld [vmem:[#allocation35_spill] sm:$0xff]  ;;  %v6845_v10 = vld [vmem:[#allocation14_spill] sm:$0xff] }
 0xdea   :  { %3215 = vmatprep.subr.mxu0 %v5756_v22  ;;  %3286 = vmatprep.subr.mxu1 %v5759_v43  ;;  %v6846_v22 = vld [vmem:[#allocation26_spill] sm:$0xff] }
 0xdeb   :  { %3216 = vmatpush1.msra.mxu0 %v5762_v7  ;;  %3287 = vmatpush1.msra.mxu1 %v5765_v9  ;;  %v6847_v43 = vld [vmem:[#allocation22_spill] sm:$0xff]  ;;  %v6848_v7 = vld [vmem:[#allocation19_spill] sm:$0xff] }
 0xdec   :  { %3217 = vmatprep.subr.mxu0 %v5768_v14  ;;  %3288 = vmatprep.subr.mxu1 %v5771_v20  ;;  %v6849_v9 = vld [vmem:[#allocation15_spill] sm:$0xff]  ;;  %v6851_v20 = vld [vmem:[#allocation24_spill] sm:$0xff] }
 0xded   :  { %3218 = vmatpush1.msra.mxu0 %v5774_v50  ;;  %3289 = vmatpush1.msra.mxu1 %v5777_v13  ;;  %v6850_v14 = vld [vmem:[#allocation27_spill] sm:$0xff]  ;;  %v6852_v50 = vld [vmem:[#allocation21_spill] sm:$0xff]  ;;  %v6853_v13 = vld [vmem:[#allocation16_spill] sm:$0xff] }
 0xdee   :  { %3219 = vmatprep.subr.mxu0 %v5780_v48  ;;  %3290 = vmatprep.subr.mxu1 %v5783_v16  ;;  %v6854_v48 = vld [vmem:[#allocation28_spill] sm:$0xff]  ;;  %v6855_v16 = vld [vmem:[#allocation23_spill] sm:$0xff] }
 0xdef   :  { %3220 = vmatpush1.msra.mxu0 %v5786_v54  ;;  %3291 = vmatpush1.msra.mxu1 %v6788_v4  ;;  %v6856_v54 = vld [vmem:[#allocation29_spill] sm:$0xff]  ;;  %v6863_v4 = vld [vmem:[#allocation20_spill] sm:$0xff] }
 0xdf0   :  { %3221 = vmatprep.subr.mxu0 %v6789_v6  ;;  %3292 = vmatprep.subr.mxu1 %v5795_v19  ;;  %v6859_v19 = vld [vmem:[#allocation32_spill] sm:$0xff]  ;;  %v6864_v6 = vmov 0.0  }
 0xdf1   :  { %3222 = vmatpush1.msra.mxu0 %v5798_v45  ;;  %3293 = vmatpush1.msra.mxu1 %v5801_v5  ;;  %v6860_v45 = vld [vmem:[#allocation33_spill] sm:$0xff]  ;;  %v6861_v5 = vld [vmem:[#allocation30_spill] sm:$0xff] }
 0xdf2   :  { %3223 = vmatprep.subr.mxu0 %v5804_v44  ;;  %3294 = vmatprep.subr.mxu1 %v5807_v62  ;;  %v6857_v62 = vld [vmem:[#allocation12_spill] sm:$0xff]  ;;  %v6862_v44 = vld [vmem:[#allocation18_spill] sm:$0xff] }
 0xdf3   :  { %3224 = vmatpush1.msra.mxu0 %v5810_v61  ;;  %3295 = vmatpush1.msra.mxu1 %v5895_v41  ;;  %v6858_v61 = vld [vmem:[#allocation31_spill] sm:$0xff] }
 0xdf4   :  { %3225 = vmatprep.subr.mxu0 %v5898_v11  ;;  %3296 = vmatprep.subr.mxu1 %v5901_v25  ;;  %v6865_v41 = vld [vmem:[#allocation11_spill] sm:$0xff]  ;;  %v6866_v11 = vld [vmem:[#allocation57_spill] sm:$0xff]  ;;  %v6867_v25 = vld [vmem:[#allocation54_spill] sm:$0xff] }
 0xdf5   :  { %3226 = vmatpush1.msra.mxu0 %v5904_v26  ;;  %3297 = vmatpush1.msra.mxu1 %v5907_v27  ;;  %v1748_v26 = vadd.f32 %v6867_v25, %v6866_v11  ;;  %v3484_v25 = vld [vmem:[%s6343_s7 + $0x30] sm:$0xff] }
 0xdf6   :  { %3227 = vmatprep.subr.mxu0 %v5910_v28  ;;  %3298 = vmatprep.subr.mxu1 %v5913_v29  ;;  %v6868_v28 = vld [vmem:[#allocation56_spill] sm:$0xff] }
 0xdf7   :  { %3228 = vmatpush1.msra.mxu0 %v5916_v30  ;;  %3299 = vmatpush1.msra.mxu1 %v5919_v31  ;;  %v1750_v29 = vadd.f32 %v6868_v28, %v6745_v46  ;;  %v3481_v28 = vld [vmem:[%s6343_s7 + $0x18] sm:$0xff] }
 0xdf8   :  { %3229 = vmatprep.subr.mxu0 %v5922_v32  ;;  %3300 = vmatprep.subr.mxu1 %v5925_v33 }
 0xdf9   :  { %3230 = vmatpush1.msra.mxu0 %v5928_v34  ;;  %3301 = vmatpush1.msra.mxu1 %v5931_v35 }
 0xdfa   :  { %3231 = vmatprep.subr.mxu0 %v5934_v36  ;;  %3302 = vmatprep.subr.mxu1 %v5937_v37  ;;  %v6869_v37 = vld [vmem:[#allocation58_spill] sm:$0xff] }
 0xdfb   :  { %3232 = vmatpush1.msra.mxu0 %v5940_v38  ;;  %3303 = vmatpush1.msra.mxu1 %v5943_v39  ;;  %v1863_v38 = vadd.f32 %v6869_v37, %v5585_v42 }
 0xdfc   :  { %3233 = vmatprep.subr.mxu0 %v5946_v40  ;;  %3304 = vmatprep.subr.mxu1 %v5949_v3  ;;  %v6870_v40 = vld [vmem:[#allocation55_spill] sm:$0xff] }
 0xdfd   :  { %3234 = vmatpush1.msra.mxu0 %v5952_v60  ;;  %3305 = vmatpush1.msra.mxu1 %v6844_v51  ;;  %v1861_v3 = vadd.f32 %v6870_v40, %v5588_v63  ;;  %v3395_v51 = vld [vmem:[%s6341_s5 + $0x58] sm:$0xff] }
 0xdfe   :  { %3235 = vmatprep.subr.mxu0 %v6845_v10  ;;  %3306 = vmatprep.subr.mxu1 %v6846_v22  ;;  %v3394_v10 = vld [vmem:[%s6341_s5 + $0x50] sm:$0xff]  ;;  %v3393_v22 = vld [vmem:[%s6341_s5 + $0x48] sm:$0xff] }
 0xdff   :  { %3236 = vmatpush1.msra.mxu0 %v6847_v43  ;;  %3307 = vmatpush1.msra.mxu1 %v6848_v7  ;;  %v3392_v43 = vld [vmem:[%s6341_s5 + $0x40] sm:$0xff]  ;;  %v3391_v7 = vld [vmem:[%s6341_s5 + $0x38] sm:$0xff] }
 0xe00   :  { %3237 = vmatprep.subr.mxu0 %v6849_v9  ;;  %3308 = vmatprep.subr.mxu1 %v6850_v14  ;;  %v3390_v9 = vld [vmem:[%s6341_s5 + $0x30] sm:$0xff]  ;;  %v3389_v14 = vld [vmem:[%s6341_s5 + $0x28] sm:$0xff] }
 0xe01   :  { %3238 = vmatpush1.msra.mxu0 %v6851_v20  ;;  %3309 = vmatpush1.msra.mxu1 %v6852_v50  ;;  %v3388_v20 = vld [vmem:[%s6341_s5 + $0x20] sm:$0xff]  ;;  %v3387_v50 = vld [vmem:[%s6341_s5 + $0x18] sm:$0xff] }
 0xe02   :  { %3239 = vmatprep.subr.mxu0 %v6853_v13  ;;  %3310 = vmatprep.subr.mxu1 %v6854_v48  ;;  %v3386_v13 = vld [vmem:[%s6341_s5 + $0x10] sm:$0xff]  ;;  %v3385_v48 = vld [vmem:[%s6341_s5 + $0x8] sm:$0xff] }
 0xe03   :  { %3240 = vmatpush1.msra.mxu0 %v6855_v16  ;;  %3311 = vmatpush1.msra.mxu1 %v6856_v54  ;;  %v3384_v16 = vld [vmem:[%s6341_s5] sm:$0xff]  ;;  %v3493_v54 = vld [vmem:[%s6343_s7 + $0x78] sm:$0xff] }
 0xe04   :  { %3241 = vmatprep.subr.mxu0 %v6857_v62  ;;  %3312 = vmatprep.subr.mxu1 %v6858_v61  ;;  %v3492_v62 = vld [vmem:[%s6343_s7 + $0x70] sm:$0xff]  ;;  %v3491_v61 = vld [vmem:[%s6343_s7 + $0x68] sm:$0xff] }
 0xe05   :  { %3242 = vmatpush1.msra.mxu0 %v6859_v19  ;;  %3313 = vmatpush1.msra.mxu1 %v6860_v45  ;;  %v3490_v19 = vld [vmem:[%s6343_s7 + $0x60] sm:$0xff]  ;;  %v3489_v45 = vld [vmem:[%s6343_s7 + $0x58] sm:$0xff] }
 0xe06   :  { %3243 = vmatprep.subr.mxu0 %v6861_v5  ;;  %3314 = vmatprep.subr.mxu1 %v6862_v44  ;;  %v3488_v5 = vld [vmem:[%s6343_s7 + $0x50] sm:$0xff]  ;;  %v3487_v44 = vld [vmem:[%s6343_s7 + $0x48] sm:$0xff] }
 0xe07   :  { %3244 = vmatpush1.msra.mxu0 %v6863_v4  ;;  %3277 = vmatprep.mubr.f32.mxu0 %v6864_v6  ;;  %v3486_v4 = vld [vmem:[%s6343_s7 + $0x40] sm:$0xff] }
 0xe08   :  { %3315 = vmatpush1.msra.mxu1 %v6865_v41  ;;  %3348 = vmatprep.mubr.f32.mxu1 %v6864_v6  ;;  %v3485_v41 = vld [vmem:[%s6343_s7 + $0x38] sm:$0xff] }
 0xe09   :  { %3697 = vmatprep.subr.mxu0 %v6864_v6  ;;  %3732 = vmatprep.subr.mxu1 %v6864_v6 }
 0xea8   :  { %v3102_v27 = vpop.f32.mrf.mxu0  ;;  %v3173_v34 = vpop.f32.mrf.mxu1 }
 0xea9   :  { %v3178_v30 = vadd.f32 %v3102_v27, %v1748_v26  ;;  %v3180_v60 = vadd.f32 %v3173_v34, %v1861_v3  ;;  %v3483_v26 = vld [vmem:[%s6343_s7 + $0x28] sm:$0xff]  ;;  %v3482_v27 = vld [vmem:[%s6343_s7 + $0x20] sm:$0xff] }
 0xeaa   :  { %v3104_v31 = vpop.f32.mrf.mxu0  ;;  %v3175_v36 = vpop.f32.mrf.mxu1  ;;  %v6873_v3 = vld [vmem:[#allocation63_spill] sm:$0xff] }
 0xeab   :  { %v3655_v32 = vmul.f32 -1.442695, %v3178_v30  ;;  %v3179_v33 = vadd.f32 %v3104_v31, %v1750_v29  ;;  %v3181_v39 = vadd.f32 %v3175_v36, %v1863_v38  ;;  %v6871_v29 = vld [vmem:[#allocation59_spill] sm:$0xff] }
 0xeac   :  { %v1754_v30 = vadd.f32 %v6871_v29, %v6866_v11 }
 0xead   :  { %3998 = vpow2.f32 %v3655_v32  ;;  %v3656_v35 = vmul.f32 -1.442695, %v3179_v33  ;;  %v3657_v47 = vmul.f32 -1.442695, %v3181_v39  ;;  %v6872_v32 = vld [vmem:[#allocation62_spill] sm:$0xff] }
 0xeae   :  { %v1756_v33 = vadd.f32 %v6872_v32, %v6745_v46 }
 0xeaf   :  { %4000 = vpow2.f32 %v3656_v35 }
 0xeb0   :  { %4002 = vtanh.f32 %v3180_v60  ;;  %v1869_v60 = vadd.f32 %v6873_v3, %v5585_v42 }
 0xeb1   :  { %4004 = vpow2.f32 %v3657_v47 }
 0xeba   :  { %v3999_v12 = vpop.eup %3998 }
 0xebb   :  { %v3185_v21 = vadd.f32 1.0, %v3999_v12  ;;  %v6874_v12 = vld [vmem:[#allocation61_spill] sm:$0xff] }
 0xebc   :  { %v4001_v57 = vpop.eup %4000  ;;  %v1867_v11 = vadd.f32 %v6874_v12, %v5588_v63 }
 0xebd   :  { %4006 = vrcp.f32 %v3185_v21  ;;  %v3191_v59 = vadd.f32 1.0, %v4001_v57  ;;  %v4003_v8 = vpop.eup %4002 }
 0xebe   :  { %v4005_v24 = vpop.eup %4004 }
 0xebf   :  { %4008 = vrcp.f32 %v3191_v59  ;;  %v3198_v55 = vadd.f32 1.0, %v4005_v24 }
 0xec1   :  { %4010 = vrcp.f32 %v3198_v55 }
 0xeca   :  { %v4007_v53 = vpop.eup %4006 }
 0xecb   :  { %v3202_v58 = vmul.f32 %v4007_v53, %v4003_v8 }
 0xecc   :  { %v4009_v0 = vpop.eup %4008 }
 0xecd   :  { %v3201_v1 = vmul.f32 %v4009_v0, %v6109_v18  ;;  %v3398_v18 = vld [vmem:[%s6341_s5 + $0x70] sm:$0xff] }
 0xece   :  { %v4011_v23 = vpop.eup %4010 }
 0xecf   :  { %v6187_v56 = vadd.f32 %v3202_v58, %v3201_v1 }
 0xed1   :  { %4012 = vtanh.f32 %v6187_v56 }
 0xede   :  { %v4013_v15 = vpop.eup %4012 }
 0xedf   :  { %v3205_v49 = vmul.f32 %v4013_v15, %v4011_v23 }
 0xee1   :  { %3278 = vmatmul.mubr.f32.vlgmr.msra.gmra.mxu0 %v3205_v49  ;;  %3349 = vmatmul.mubr.f32.vlgmr.msra.gmra.mxu1 %v3205_v49 }
 0xee2   :  { %3698 = vmatpush3.msra.mxu0 %v3399_v52  ;;  %3729 = vmatprep.mubr.msk.f32.mxu0 %vm4228_vm0, %v6864_v6 }
 0xee3   :  { %3699 = vmatprep.subr.mxu0 %v6864_v6  ;;  %3764 = vmatprep.mubr.msk.f32.mxu1 %vm4228_vm0, %v6864_v6 }
 0xee4   :  { %3700 = vmatpush3.msra.mxu0 %v3398_v18  ;;  %3733 = vmatpush3.msra.mxu1 %v3493_v54 }
 0xee5   :  { %3701 = vmatprep.subr.mxu0 %v6864_v6  ;;  %3734 = vmatprep.subr.mxu1 %v6864_v6 }
 0xee6   :  { %3702 = vmatpush3.msra.mxu0 %v3397_v17  ;;  %3735 = vmatpush3.msra.mxu1 %v3492_v62  ;;  %v3480_v17 = vld [vmem:[%s6343_s7 + $0x10] sm:$0xff] }
 0xee7   :  { %3703 = vmatprep.subr.mxu0 %v6864_v6  ;;  %3736 = vmatprep.subr.mxu1 %v6864_v6 }
 0xee8   :  { %3704 = vmatpush3.msra.mxu0 %v3396_v2  ;;  %3737 = vmatpush3.msra.mxu1 %v3491_v61  ;;  %v3479_v2 = vld [vmem:[%s6343_s7 + $0x8] sm:$0xff] }
 0xee9   :  { %3705 = vmatprep.subr.mxu0 %v6864_v6  ;;  %3738 = vmatprep.subr.mxu1 %v6864_v6 }
 0xeea   :  { %3706 = vmatpush3.msra.mxu0 %v3395_v51  ;;  %3739 = vmatpush3.msra.mxu1 %v3490_v19  ;;  %v3661_v51 = vld [vmem:[%s6342_s6] ss:$0 sm:$0xff] }
 0xeeb   :  { %3707 = vmatprep.subr.mxu0 %v6864_v6  ;;  %3740 = vmatprep.subr.mxu1 %v6864_v6 }
 0xeec   :  { %3708 = vmatpush3.msra.mxu0 %v3394_v10  ;;  %3741 = vmatpush3.msra.mxu1 %v3489_v45 }
 0xeed   :  { %3709 = vmatprep.subr.mxu0 %v6864_v6  ;;  %3742 = vmatprep.subr.mxu1 %v6864_v6 }
 0xeee   :  { %3710 = vmatpush3.msra.mxu0 %v3393_v22  ;;  %3743 = vmatpush3.msra.mxu1 %v3488_v5 }
 0xeef   :  { %3711 = vmatprep.subr.mxu0 %v6864_v6  ;;  %3744 = vmatprep.subr.mxu1 %v6864_v6 }
 0xef0   :  { %3712 = vmatpush3.msra.mxu0 %v3392_v43  ;;  %3745 = vmatpush3.msra.mxu1 %v3487_v44 }
 0xef1   :  { %3713 = vmatprep.subr.mxu0 %v6864_v6  ;;  %3746 = vmatprep.subr.mxu1 %v6864_v6 }
 0xef2   :  { %3714 = vmatpush3.msra.mxu0 %v3391_v7  ;;  %3747 = vmatpush3.msra.mxu1 %v3486_v4 }
 0xef3   :  { %3715 = vmatprep.subr.mxu0 %v6864_v6  ;;  %3748 = vmatprep.subr.mxu1 %v6864_v6 }
 0xef4   :  { %3716 = vmatpush3.msra.mxu0 %v3390_v9  ;;  %3749 = vmatpush3.msra.mxu1 %v3485_v41  ;;  %v3662_v9 = vld [vmem:[%s6344_s8] ss:$0 sm:$0xff] }
 0xef5   :  { %3717 = vmatprep.subr.mxu0 %v6864_v6  ;;  %3750 = vmatprep.subr.mxu1 %v6864_v6 }
 0xef6   :  { %3718 = vmatpush3.msra.mxu0 %v3389_v14  ;;  %3751 = vmatpush3.msra.mxu1 %v3484_v25 }
 0xef7   :  { %3719 = vmatprep.subr.mxu0 %v6864_v6  ;;  %3752 = vmatprep.subr.mxu1 %v6864_v6 }
 0xef8   :  { %3720 = vmatpush3.msra.mxu0 %v3388_v20  ;;  %3753 = vmatpush3.msra.mxu1 %v3483_v26 }
 0xef9   :  { %3721 = vmatprep.subr.mxu0 %v6864_v6  ;;  %3754 = vmatprep.subr.mxu1 %v6864_v6 }
 0xefa   :  { %3722 = vmatpush3.msra.mxu0 %v3387_v50  ;;  %3755 = vmatpush3.msra.mxu1 %v3482_v27 }
 0xefb   :  { %3723 = vmatprep.subr.mxu0 %v6864_v6  ;;  %3756 = vmatprep.subr.mxu1 %v6864_v6 }
 0xefc   :  { %3724 = vmatpush3.msra.mxu0 %v3386_v13  ;;  %3757 = vmatpush3.msra.mxu1 %v3481_v28 }
 0xefd   :  { %3725 = vmatprep.subr.mxu0 %v6864_v6  ;;  %3758 = vmatprep.subr.mxu1 %v6864_v6 }
 0xefe   :  { %3726 = vmatpush3.msra.mxu0 %v3385_v48  ;;  %3759 = vmatpush3.msra.mxu1 %v3480_v17 }
 0xeff   :  { %3727 = vmatprep.subr.mxu0 %v6864_v6  ;;  %3760 = vmatprep.subr.mxu1 %v6864_v6 }
 0xf00   :  { %3728 = vmatpush3.msra.mxu0 %v3384_v16  ;;  %3761 = vmatpush3.msra.mxu1 %v3479_v2 }
 0xf01   :  { %3762 = vmatprep.subr.mxu1 %v6864_v6 }
 0xfa1   :  { %v3279_v31 = vpop.f32.mrf.mxu0  ;;  %v3350_v38 = vpop.f32.mrf.mxu1 }
 0xfa2   :  { %v3355_v34 = vadd.f32 %v3279_v31, %v1754_v30  ;;  %v3357_v21 = vadd.f32 %v3350_v38, %v1867_v11 }
 0xfa3   :  { %v3281_v35 = vpop.f32.mrf.mxu0  ;;  %v3352_v40 = vpop.f32.mrf.mxu1 }
 0xfa4   :  { %v3658_v36 = vmul.f32 -1.442695, %v3355_v34  ;;  %v3356_v37 = vadd.f32 %v3281_v35, %v1756_v33  ;;  %v3358_v47 = vadd.f32 %v3352_v40, %v1869_v60 }
 0xfa6   :  { %4014 = vpow2.f32 %v3658_v36  ;;  %v3659_v39 = vmul.f32 -1.442695, %v3356_v37  ;;  %v3660_v57 = vmul.f32 -1.442695, %v3358_v47 }
 0xfa8   :  { %4016 = vpow2.f32 %v3659_v39 }
 0xfa9   :  { %4018 = vtanh.f32 %v3357_v21 }
 0xfaa   :  { %4020 = vpow2.f32 %v3660_v57 }
 0xfb3   :  { %v4015_v59 = vpop.eup %4014 }
 0xfb4   :  { %v3362_v46 = vadd.f32 1.0, %v4015_v59 }
 0xfb5   :  { %v4017_v8 = vpop.eup %4016 }
 0xfb6   :  { %4022 = vrcp.f32 %v3362_v46  ;;  %v3368_v24 = vadd.f32 1.0, %v4017_v8  ;;  %v4019_v53 = vpop.eup %4018 }
 0xfb7   :  { %v4021_v58 = vpop.eup %4020 }
 0xfb8   :  { %4024 = vrcp.f32 %v3368_v24  ;;  %v3375_v42 = vadd.f32 1.0, %v4021_v58 }
 0xfba   :  { %4026 = vrcp.f32 %v3375_v42 }
 0xfc3   :  { %v4023_v0 = vpop.eup %4022 }
 0xfc4   :  { %v3379_v55 = vmul.f32 %v4023_v0, %v4019_v53 }
 0xfc5   :  { %v4025_v1 = vpop.eup %4024 }
 0xfc6   :  { %v3378_v23 = vmul.f32 %v4025_v1, %v6187_v56  ;;  %v3478_v56 = vld [vmem:[%s6343_s7] sm:$0xff] }
 0xfc7   :  { %v4027_v63 = vpop.eup %4026  ;;  %3763 = vmatpush3.msra.mxu1 %v3478_v56 }
 0xfc8   :  { %v3380_v15 = vadd.f32 %v3379_v55, %v3378_v23 }
 0xfca   :  { %4028 = vtanh.f32 %v3380_v15 }
 0xfd7   :  { %v4029_v49 = vpop.eup %4028 }
 0xfd8   :  { %v3382_v52 = vmul.f32 %v4029_v49, %v4027_v63 }
 0xfda   :  { %v3383_v18 = vmax.f32 %v3382_v52, 0.0 }
 0xfdc   :  { %3730 = vmatmul.mubr.f32.vlgmr.msra.gmra.mxu0 %v3383_v18 }
0x109c   :  { %v3473_v10 = vpop.f32.mrf.mxu0 }
0x109d   :  { %v3474_v22 = vadd.f32 %v3661_v51, %v3473_v10 }
0x109e   :  { %v3731_v43 = vpop.f32.mrf.mxu0 }
0x109f   :  { %v3477_v7 = vmax.f32 %v3474_v22, 0.0 }
0x10a1   :  { %3765 = vmatmul.mubr.f32.vlgmr.msra.gmra.mxu1 %v3477_v7 }
0x1161   :  { %v3567_v14 = vpop.f32.mrf.mxu1 }
0x1162   :  { %v3568_v20 = vadd.f32 %v3662_v9, %v3567_v14 }
0x1163   :  { %v3766_v50 = vpop.f32.mrf.mxu1 }
0x1164   :  { %3571 = vst [vmem:[%s6345_s9] sm:$0xff] %v3568_v20 }
0x1165   :  { %3576 = vsyncpa [#allocation5], 1 }
0x1166   :  { %3577 = vsyncpa [#allocation7], 1 }

</bundles_post_ra>
